<compile_context>
chip_gen: v5e
topology: v5e:2x2
jax: 0.10.0
libtpu: 0.0.40
codegen_flags: <defaults>
</compile_context>

<pallas_src>
import math

import jax
import jax.numpy as jnp
from jax.experimental import pallas as pl
from jax.experimental.pallas import tpu as pltpu

N_CHANNEL = 1
N_HEIGHT = 28
N_WIDTH = 28
IN_FEATURES = N_CHANNEL * N_HEIGHT * N_WIDTH   # 784
H1 = 512
H2 = 256
OUT_FEATURES = 1
_LANE = 128


def _round_up(x, m):
    return (x + m - 1) // m * m


def _leaky_relu(x, slope=0.2):
    # Identical to where(x > 0, x, slope*x) for 0 < slope < 1, but cheaper.
    return jnp.maximum(x, slope * x)


def _stable_sigmoid(x):
    # exp(-|x|) never overflows; equivalent to 1/(1+exp(-x)).
    e = jnp.exp(-jnp.abs(x))
    return jnp.where(x >= 0, 1.0 / (1.0 + e), e / (1.0 + e))


def discriminator_kernel(x_ref, w1_ref, b1_ref, w2_ref, b2_ref, w3_ref, b3_ref,
                         out_ref):
    # f32 -> bf16 cast happens in-kernel (free VPU filler under the matmul);
    # no extra HBM pass over the activations.
    x = x_ref[...].astype(jnp.bfloat16)                               # (TB, 784)

    # Layer 1: (TB, 784) @ (784, 512) on the MXU, f32 accumulation.
    h1 = jnp.dot(x, w1_ref[...], preferred_element_type=jnp.float32)
    h1 = _leaky_relu(h1 + b1_ref[...])                                # (TB, 512) f32

    # Layer 2: (TB, 512) @ (512, 256), bf16 operands, f32 accumulation.
    h2 = jnp.dot(h1.astype(jnp.bfloat16), w2_ref[...],
                 preferred_element_type=jnp.float32)
    h2 = _leaky_relu(h2 + b2_ref[...])                                # (TB, 256) f32

    # Layer 3 (256 -> 1): VPU multiply + XLU cross-lane reduce instead of a
    # 255/256-wasted MXU issue.  Result is written lane-dense as (1, TB).
    h3 = jnp.sum(h2 * w3_ref[...], axis=-1)                           # (TB,)
    h3 = h3.reshape(1, -1) + b3_ref[...]                              # (1, TB)
    out_ref[...] = _stable_sigmoid(h3)


def _choose_tiling(b, block_b):
    """Pick (batch tile, padded batch).  Batch rows are output lanes, so the
    tile is 128-aligned; guarantee >= 2 grid steps when the batch allows it so
    both v7x TensorCores get work."""
    b_pad = _round_up(b, _LANE)
    tb = min(_round_up(block_b, _LANE), b_pad)
    if b_pad >= 2 * _LANE and b_pad // tb < 2:
        tb = _round_up(b_pad // 2, _LANE)
    b_pad = _round_up(b_pad, tb)
    return tb, b_pad


def discriminator_forward(img, params, *, block_b=1024):
    """img: (B, 1, 28, 28) float32. Returns (B, 1) validity in [0, 1]."""
    b = img.shape[0]
    w1, b1, w2, b2, w3, b3 = params

    tb, b_pad = _choose_tiling(b, block_b)
    grid = (b_pad // tb,)

    # Flatten NCHW -> (B, 784); only pad batch rows when needed.  No feature
    # padding and no bf16 cast here -- that all happens inside the kernel.
    x = img.reshape(b, -1).astype(jnp.float32)
    if b_pad != b:
        x = jnp.pad(x, ((0, b_pad - b), (0, 0)))

    flops = 2 * b_pad * (IN_FEATURES * H1 + H1 * H2 + H2 * OUT_FEATURES)
    bytes_accessed = (b_pad * IN_FEATURES * 4                 # x (f32)
                      + (IN_FEATURES * H1 + H1 * H2) * 2      # bf16 weights
                      + (H1 + H2 + H2 + 1) * 4                # biases + w3 row
                      + b_pad * 4)                            # output

    out = pl.pallas_call(
        discriminator_kernel,
        out_shape=jax.ShapeDtypeStruct((1, b_pad), jnp.float32),
        grid=grid,
        in_specs=[
            pl.BlockSpec((tb, IN_FEATURES), lambda i: (i, 0)),   # x: batch-tiled
            pl.BlockSpec((IN_FEATURES, H1), lambda i: (0, 0)),   # w1: VMEM-resident
            pl.BlockSpec((1, H1), lambda i: (0, 0)),             # b1
            pl.BlockSpec((H1, H2), lambda i: (0, 0)),            # w2: VMEM-resident
            pl.BlockSpec((1, H2), lambda i: (0, 0)),             # b2
            pl.BlockSpec((1, H2), lambda i: (0, 0)),             # w3 row (1, 256)
            pl.BlockSpec((1, 1), lambda i: (0, 0)),              # b3
        ],
        out_specs=pl.BlockSpec((1, tb), lambda i: (0, i)),       # lane-dense output
        compiler_params=pltpu.CompilerParams(
            dimension_semantics=("parallel",),
            vmem_limit_bytes=32 * 1024 * 1024,
        ),
        cost_estimate=pl.CostEstimate(
            flops=flops, transcendentals=b_pad, bytes_accessed=bytes_accessed),
    )(x, w1, b1, w2, b2, w3, b3)

    return out[0, :b].reshape(b, 1)


def init_params(key):
    """Deterministic init matching nn.Linear default U[-1/sqrt(fan_in), +].

    Storage layout (kernel-friendly):
      w1: (784, 512) bf16
      w2: (512, 256) bf16
      w3: (1, 256)   f32   (used on the VPU/XLU, not the MXU)
      b*: (1, out)   f32
    """
    keys = jax.random.split(key, 6)

    def linear(kw, kb, fan_in, fan_out):
        bound = 1.0 / math.sqrt(fan_in)
        w = jax.random.uniform(kw, (fan_in, fan_out), jnp.float32, -bound, bound)
        bias = jax.random.uniform(kb, (1, fan_out), jnp.float32, -bound, bound)
        return w, bias

    w1, b1 = linear(keys[0], keys[1], IN_FEATURES, H1)
    w2, b2 = linear(keys[2], keys[3], H1, H2)
    w3c, b3 = linear(keys[4], keys[5], H2, OUT_FEATURES)      # (256, 1), (1, 1)
    w3 = w3c.T                                                # (1, 256)

    return (w1.astype(jnp.bfloat16), b1,
            w2.astype(jnp.bfloat16), b2,
            w3, b3)


def reference_forward(img, params):
    """Pure-JAX reference mirroring the kernel's bf16-operand / f32-accum math.
    Note: vs a strict f32 reference the bf16 operands give ~1e-2 relative error,
    which is fine for a GAN discriminator."""
    w1, b1, w2, b2, w3, b3 = params
    b = img.shape[0]
    x = img.reshape(b, -1).astype(jnp.bfloat16).astype(jnp.float32)

    h1 = x @ w1.astype(jnp.float32) + b1
    h1 = jnp.maximum(h1, 0.2 * h1)
    h1 = h1.astype(jnp.bfloat16).astype(jnp.float32)

    h2 = h1 @ w2.astype(jnp.float32) + b2
    h2 = jnp.maximum(h2, 0.2 * h2)

    h3 = jnp.sum(h2 * w3, axis=-1, keepdims=True) + b3
    return jax.nn.sigmoid(h3)


if __name__ == "__main__":
    key = jax.random.PRNGKey(0)
    k_params, k_img1, k_img2 = jax.random.split(key, 3)

    params = init_params(k_params)

    # Case 1: tiny batch -> single 128-row tile, grid=(1,).
    img = jax.random.normal(k_img1, (8, N_CHANNEL, N_HEIGHT, N_WIDTH),
                            dtype=jnp.float32)
    out = jax.block_until_ready(discriminator_forward(img, params))
    ref = reference_forward(img, params)
    assert out.shape == (8, 1), out.shape
    err = float(jnp.max(jnp.abs(out - ref)))
    assert err < 2e-4, f"batch=8 mismatch: max abs err {err}"

    # Case 2: batch not a tile multiple -> exercises batch padding, the >=2
    # grid-step guard, resident-weight revisiting, and lane-dense output tiling.
    img2 = jax.random.normal(k_img2, (272, N_CHANNEL, N_HEIGHT, N_WIDTH),
                             dtype=jnp.float32)
    out2 = jax.block_until_ready(discriminator_forward(img2, params))
    ref2 = reference_forward(img2, params)
    assert out2.shape == (272, 1), out2.shape
    err2 = float(jnp.max(jnp.abs(out2 - ref2)))
    assert err2 < 2e-4, f"batch=272 mismatch: max abs err {err2}"

    print("KERNEL_OK")
</pallas_src>

<mosaic_0001>
module attributes {stable_mosaic.version = 11 : i64} {
  func.func @discriminator_kernel(%arg0: i32, %arg1: memref<128x784xf32, #tpu.memory_space<vmem>>, %arg2: memref<784x512xbf16, #tpu.memory_space<vmem>>, %arg3: memref<1x512xf32, #tpu.memory_space<vmem>>, %arg4: memref<512x256xbf16, #tpu.memory_space<vmem>>, %arg5: memref<1x256xf32, #tpu.memory_space<vmem>>, %arg6: memref<1x256xf32, #tpu.memory_space<vmem>>, %arg7: memref<1x1xf32, #tpu.memory_space<vmem>>, %arg8: memref<1x128xf32, #tpu.memory_space<vmem>>) attributes {dimension_semantics = [#tpu.dimension_semantics<parallel>], iteration_bounds = array<i64: 1>, scalar_prefetch = 0 : i64, scratch_operands = 0 : i64, tpu.core_type = #tpu.core_type<tc>, window_params = [{transform_indices = @transform_0, window_bounds = array<i64: 128, 784>}, {pipeline_mode = #tpu.pipeline_mode<synchronous>, transform_indices = @transform_1, window_bounds = array<i64: 784, 512>}, {pipeline_mode = #tpu.pipeline_mode<synchronous>, transform_indices = @transform_2, window_bounds = array<i64: 1, 512>}, {pipeline_mode = #tpu.pipeline_mode<synchronous>, transform_indices = @transform_3, window_bounds = array<i64: 512, 256>}, {pipeline_mode = #tpu.pipeline_mode<synchronous>, transform_indices = @transform_4, window_bounds = array<i64: 1, 256>}, {pipeline_mode = #tpu.pipeline_mode<synchronous>, transform_indices = @transform_5, window_bounds = array<i64: 1, 256>}, {pipeline_mode = #tpu.pipeline_mode<synchronous>, transform_indices = @transform_6, window_bounds = array<i64: 1, 1>}, {transform_indices = @transform_7, window_bounds = array<i64: 1, 128>}]} {
    %c0 = arith.constant 0 : index
    %c0_0 = arith.constant 0 : index
    %0 = vector.load %arg1[%c0, %c0_0] : memref<128x784xf32, #tpu.memory_space<vmem>>, vector<128x784xf32>
    %1 = arith.truncf %0 : vector<128x784xf32> to vector<128x784xbf16>
    %c0_1 = arith.constant 0 : index
    %c0_2 = arith.constant 0 : index
    %2 = vector.load %arg2[%c0_1, %c0_2] : memref<784x512xbf16, #tpu.memory_space<vmem>>, vector<784x512xbf16>
    %cst = arith.constant dense<0.000000e+00> : vector<128x512xf32>
    %3 = tpu.matmul %1, %2, %cst {dimension_numbers = #tpu.dot_dimension_numbers<[1], [0], [0], [1], [0, 0, 1, 1], [], []>} : vector<128x784xbf16>, vector<784x512xbf16>, vector<128x512xf32> -> vector<128x512xf32>
    %c0_3 = arith.constant 0 : index
    %c0_4 = arith.constant 0 : index
    %4 = vector.load %arg3[%c0_3, %c0_4] : memref<1x512xf32, #tpu.memory_space<vmem>>, vector<1x512xf32>
    %5 = vector.broadcast %4 : vector<1x512xf32> to vector<128x512xf32>
    %6 = arith.addf %3, %5 : vector<128x512xf32>
    %cst_5 = arith.constant 2.000000e-01 : f32
    %7 = vector.broadcast %cst_5 : f32 to vector<128x512xf32>
    %8 = arith.mulf %7, %6 : vector<128x512xf32>
    %9 = arith.maximumf %6, %8 : vector<128x512xf32>
    %10 = arith.truncf %9 : vector<128x512xf32> to vector<128x512xbf16>
    %c0_6 = arith.constant 0 : index
    %c0_7 = arith.constant 0 : index
    %11 = vector.load %arg4[%c0_6, %c0_7] : memref<512x256xbf16, #tpu.memory_space<vmem>>, vector<512x256xbf16>
    %cst_8 = arith.constant dense<0.000000e+00> : vector<128x256xf32>
    %12 = tpu.matmul %10, %11, %cst_8 {dimension_numbers = #tpu.dot_dimension_numbers<[1], [0], [0], [1], [0, 0, 1, 1], [], []>} : vector<128x512xbf16>, vector<512x256xbf16>, vector<128x256xf32> -> vector<128x256xf32>
    %c0_9 = arith.constant 0 : index
    %c0_10 = arith.constant 0 : index
    %13 = vector.load %arg5[%c0_9, %c0_10] : memref<1x256xf32, #tpu.memory_space<vmem>>, vector<1x256xf32>
    %14 = vector.broadcast %13 : vector<1x256xf32> to vector<128x256xf32>
    %15 = arith.addf %12, %14 : vector<128x256xf32>
    %cst_11 = arith.constant 2.000000e-01 : f32
    %16 = vector.broadcast %cst_11 : f32 to vector<128x256xf32>
    %17 = arith.mulf %16, %15 : vector<128x256xf32>
    %18 = arith.maximumf %15, %17 : vector<128x256xf32>
    %c0_12 = arith.constant 0 : index
    %c0_13 = arith.constant 0 : index
    %19 = vector.load %arg6[%c0_12, %c0_13] : memref<1x256xf32, #tpu.memory_space<vmem>>, vector<1x256xf32>
    %20 = vector.broadcast %19 : vector<1x256xf32> to vector<128x256xf32>
    %21 = arith.mulf %18, %20 : vector<128x256xf32>
    %cst_14 = arith.constant dense<0.000000e+00> : vector<128xf32>
    %22 = vector.multi_reduction <add>, %21, %cst_14 [1] : vector<128x256xf32> to vector<128xf32>
    %23 = vector.shape_cast %22 : vector<128xf32> to vector<1x128xf32>
    %c0_15 = arith.constant 0 : index
    %c0_16 = arith.constant 0 : index
    %24 = vector.load %arg7[%c0_15, %c0_16] : memref<1x1xf32, #tpu.memory_space<vmem>>, vector<1x1xf32>
    %25 = vector.broadcast %24 : vector<1x1xf32> to vector<1x128xf32>
    %26 = arith.addf %23, %25 : vector<1x128xf32>
    %27 = math.absf %26 : vector<1x128xf32>
    %cst_17 = arith.constant 0.000000e+00 : f32
    %28 = vector.broadcast %cst_17 : f32 to vector<1x128xf32>
    %29 = arith.subf %28, %27 : vector<1x128xf32>
    %30 = math.exp %29 : vector<1x128xf32>
    %cst_18 = arith.constant 0.000000e+00 : f32
    %31 = vector.broadcast %cst_18 : f32 to vector<1x128xf32>
    %32 = arith.cmpf oge, %26, %31 : vector<1x128xf32>
    %cst_19 = arith.constant 1.000000e+00 : f32
    %33 = vector.broadcast %cst_19 : f32 to vector<1x128xf32>
    %34 = arith.addf %33, %30 : vector<1x128xf32>
    %cst_20 = arith.constant 1.000000e+00 : f32
    %35 = vector.broadcast %cst_20 : f32 to vector<1x128xf32>
    %36 = arith.divf %35, %34 : vector<1x128xf32>
    %cst_21 = arith.constant 1.000000e+00 : f32
    %37 = vector.broadcast %cst_21 : f32 to vector<1x128xf32>
    %38 = arith.addf %37, %30 : vector<1x128xf32>
    %39 = arith.divf %30, %38 : vector<1x128xf32>
    %40 = arith.select %32, %36, %39 : vector<1x128xi1>, vector<1x128xf32>
    %c0_22 = arith.constant 0 : index
    %c0_23 = arith.constant 0 : index
    %41 = vector.load %arg8[%c0_22, %c0_23] : memref<1x128xf32, #tpu.memory_space<vmem>>, vector<1x128xf32>
    tpu.vector_store %arg8[%c0_22, %c0_23], %40 {strides = array<i32>} : memref<1x128xf32, #tpu.memory_space<vmem>>, vector<1x128xf32>,
    return
  }
  func.func @transform_0(%arg0: i32) -> (i32, i32) {
    %c0_i32 = arith.constant 0 : i32
    %c0_i32_0 = arith.constant 0 : i32
    return %arg0, %c0_i32 : i32, i32
  }
  func.func @transform_1(%arg0: i32) -> (i32, i32) {
    %c0_i32 = arith.constant 0 : i32
    %c0_i32_0 = arith.constant 0 : i32
    %c0_i32_1 = arith.constant 0 : i32
    return %c0_i32, %c0_i32_0 : i32, i32
  }
  func.func @transform_2(%arg0: i32) -> (i32, i32) {
    %c0_i32 = arith.constant 0 : i32
    %c0_i32_0 = arith.constant 0 : i32
    %c0_i32_1 = arith.constant 0 : i32
    return %c0_i32, %c0_i32_0 : i32, i32
  }
  func.func @transform_3(%arg0: i32) -> (i32, i32) {
    %c0_i32 = arith.constant 0 : i32
    %c0_i32_0 = arith.constant 0 : i32
    %c0_i32_1 = arith.constant 0 : i32
    return %c0_i32, %c0_i32_0 : i32, i32
  }
  func.func @transform_4(%arg0: i32) -> (i32, i32) {
    %c0_i32 = arith.constant 0 : i32
    %c0_i32_0 = arith.constant 0 : i32
    %c0_i32_1 = arith.constant 0 : i32
    return %c0_i32, %c0_i32_0 : i32, i32
  }
  func.func @transform_5(%arg0: i32) -> (i32, i32) {
    %c0_i32 = arith.constant 0 : i32
    %c0_i32_0 = arith.constant 0 : i32
    %c0_i32_1 = arith.constant 0 : i32
    return %c0_i32, %c0_i32_0 : i32, i32
  }
  func.func @transform_6(%arg0: i32) -> (i32, i32) {
    %c0_i32 = arith.constant 0 : i32
    %c0_i32_0 = arith.constant 0 : i32
    %c0_i32_1 = arith.constant 0 : i32
    return %c0_i32, %c0_i32_0 : i32, i32
  }
  func.func @transform_7(%arg0: i32) -> (i32, i32) {
    %c0_i32 = arith.constant 0 : i32
    %c0_i32_0 = arith.constant 0 : i32
    return %c0_i32, %arg0 : i32, i32
  }
}

</mosaic_0001>

<bundles_post_ra>
// kernel: tpu_custom_call.1
= control target key start
LH: loop header
LB: loop body
LE: loop exit
PB: predicated region body
PF: predicated region fallthrough
CT: control target
= control target key end

     0   :  { %s9016_s0 = inlined_call_operand.vmem [shape: f32[128,784], index: 0, kind: input, shape index: {}]   ;;  %s9017_s1 = inlined_call_operand.vmem [shape: bf16[784,512], index: 1, kind: input, shape index: {}]   ;;  %s9018_s2 = inlined_call_operand.vmem [shape: f32[1,512], index: 2, kind: input, shape index: {}]   ;;  %s9019_s3 = inlined_call_operand.hbm [shape: bf16[512,256], index: 3, kind: input, shape index: {}]   ;;  %s9020_s4 = inlined_call_operand.vmem [shape: f32[1,256], index: 4, kind: input, shape index: {}]   ;;  %s9021_s5 = inlined_call_operand.vmem [shape: f32[1,256], index: 5, kind: input, shape index: {}]   ;;  %s9022_s6 = inlined_call_operand.<no memory space> [shape: f32[1,1], index: 6, kind: input, shape index: {}]   ;;  %s9023_s7 = inlined_call_operand.hbm [shape: f32[1,128], index: 7, kind: output, shape index: {}]  }
   0x1   :  { %v12_v0 = vstv %s9022_s6 }
   0x2   :  { %13 = vst [vmem:[#allocation2] sm:$0x1] %v12_v0 }
   0x3   :  { %14 = vsyncpa [#allocation4], 0 }
   0x4   :  { %15 = vsyncpa [#allocation5], 0  ;;  %s26_s28 = sshll.u32 %s9019_s3, 4  ;;  %s5834_s29 = smov [#allocation3]   ;;  %s27_s28 = int_to_ptr.hbm [resolvable:$true] %s26_s28 }
   0x5   :  { %s28_s30 = sshll.u32 %s5834_s29, 4  ;;  %s5835_s8 = smov 128   ;;  %s29_s30 = int_to_ptr.vmem [resolvable:$true] %s28_s30 }
   0x6   :  { %s5836_s9 = smov 8  }
   0x7   :  { %34 = dma.hbm_to_vmem [thread:$0]  %s27_s28, 8192, %s29_s30, [#allocation4], %s5835_s8, %s5835_s8, %s5836_s9  }
   0x8   :  { %5830 = dma.done.wait [#allocation4], 8192  }
   0x9   :  { %5831 = vsyncadd [#allocation4], 4294959104  ;;  %v4492_v1 = vld [vmem:[%s9017_s1 + $0xe0] sm:$0xf]  ;;  %v5480_v2 = vld [vmem:[%s9017_s1 + $0xec] sm:$0xf0] }
   0xa   :  { %v4620_v3 = vld [vmem:[%s9017_s1 + $0x1e0] sm:$0xf]  ;;  %v4493_v4 = vor.u32 %v5480_v2, %v4492_v1  ;;  %v5512_v5 = vld [vmem:[%s9017_s1 + $0x1ec] sm:$0xf0]  ;;  %vm1400_vm0 = vcmask 130048   ;;  %vm4301_vm13 = vcmask 130112  }
   0xb   :  { %v4748_v6 = vld [vmem:[%s9017_s1 + $0x2e0] sm:$0xf]  ;;  %v5544_v7 = vld [vmem:[%s9017_s1 + $0x2ec] sm:$0xf0]  ;;  %v4621_v8 = vor.u32 %v5512_v5, %v4620_v3  ;;  %s4368_s11 = sshll.u32 %s9023_s7, 4  ;;  %s4369_s11 = int_to_ptr.hbm [resolvable:$true] %s4368_s11 }
   0xc   :  { %v4749_v9 = vor.u32 %v5544_v7, %v4748_v6  ;;  %v4876_v10 = vld [vmem:[%s9017_s1 + $0x3e0] sm:$0xf]  ;;  %v5576_v11 = vld [vmem:[%s9017_s1 + $0x3ec] sm:$0xf0]  ;;  %1425 = vmatpush.bf16.msra.mxu0 %v4493_v4 }
   0xd   :  { %v4476_v12 = vld [vmem:[%s9017_s1 + $0xc0] sm:$0xf]  ;;  %v4877_v13 = vor.u32 %v5576_v11, %v4876_v10  ;;  %v5476_v14 = vld [vmem:[%s9017_s1 + $0xcc] sm:$0xf0]  ;;  %1474 = vmatpush.bf16.msra.mxu1 %v4621_v8 }
   0xe   :  { %v4604_v15 = vld [vmem:[%s9017_s1 + $0x1c0] sm:$0xf]  ;;  %v5508_v16 = vld [vmem:[%s9017_s1 + $0x1cc] sm:$0xf0]  ;;  %1523 = vmatpush.bf16.msra.mxu2 %v4749_v9  ;;  %v4477_v17 = vor.u32 %v5476_v14, %v4476_v12 }
   0xf   :  { %v4605_v18 = vor.u32 %v5508_v16, %v4604_v15  ;;  %v4732_v19 = vld [vmem:[%s9017_s1 + $0x2c0] sm:$0xf]  ;;  %v5540_v20 = vld [vmem:[%s9017_s1 + $0x2cc] sm:$0xf0]  ;;  %1572 = vmatpush.bf16.msra.mxu3 %v4877_v13 }
  0x10   :  { %v4860_v21 = vld [vmem:[%s9017_s1 + $0x3c0] sm:$0xf]  ;;  %v4733_v22 = vor.u32 %v5540_v20, %v4732_v19  ;;  %v5572_v23 = vld [vmem:[%s9017_s1 + $0x3cc] sm:$0xf0]  ;;  %1426 = vmatpush.bf16.msra.mxu0 %v4477_v17 }
  0x11   :  { %v4460_v24 = vld [vmem:[%s9017_s1 + $0xa0] sm:$0xf]  ;;  %v5472_v25 = vld [vmem:[%s9017_s1 + $0xac] sm:$0xf0]  ;;  %v4861_v26 = vor.u32 %v5572_v23, %v4860_v21  ;;  %1475 = vmatpush.bf16.msra.mxu1 %v4605_v18 }
  0x12   :  { %v4588_v27 = vld [vmem:[%s9017_s1 + $0x1a0] sm:$0xf]  ;;  %v5504_v28 = vld [vmem:[%s9017_s1 + $0x1ac] sm:$0xf0]  ;;  %v4461_v30 = vor.u32 %v5472_v25, %v4460_v24  ;;  %1524 = vmatpush.bf16.msra.mxu2 %v4733_v22 }
  0x13   :  { %v4716_v29 = vld [vmem:[%s9017_s1 + $0x2a0] sm:$0xf]  ;;  %v5536_v31 = vld [vmem:[%s9017_s1 + $0x2ac] sm:$0xf0]  ;;  %v4589_v34 = vor.u32 %v5504_v28, %v4588_v27  ;;  %1573 = vmatpush.bf16.msra.mxu3 %v4861_v26 }
  0x14   :  { %v4844_v32 = vld [vmem:[%s9017_s1 + $0x3a0] sm:$0xf]  ;;  %v5568_v33 = vld [vmem:[%s9017_s1 + $0x3ac] sm:$0xf0]  ;;  %v4717_v35 = vor.u32 %v5536_v31, %v4716_v29  ;;  %1427 = vmatpush.bf16.msra.mxu0 %v4461_v30  ;;  %v53_v30 = vld [vmem:[%s9016_s0 + $0x38] sm:$0xff] }
  0x15   :  { %v4444_v36 = vld [vmem:[%s9017_s1 + $0x80] sm:$0xf]  ;;  %v5468_v37 = vld [vmem:[%s9017_s1 + $0x8c] sm:$0xf0]  ;;  %v4845_v39 = vor.u32 %v5568_v33, %v4844_v32  ;;  %1476 = vmatpush.bf16.msra.mxu1 %v4589_v34  ;;  %v47_v31 = vld [vmem:[%s9016_s0 + $0x8] sm:$0xff] }
  0x16   :  { %v4572_v38 = vld [vmem:[%s9017_s1 + $0x180] sm:$0xf]  ;;  %v5500_v40 = vld [vmem:[%s9017_s1 + $0x18c] sm:$0xf0]  ;;  %v4445_v45 = vor.u32 %v5468_v37, %v4444_v36  ;;  %1525 = vmatpush.bf16.msra.mxu2 %v4717_v35  ;;  %v5478_v36 = vld [vmem:[%s9017_s1 + $0xe4] sm:$0xf] }
  0x17   :  { %v4700_v41 = vld [vmem:[%s9017_s1 + $0x280] sm:$0xf]  ;;  %v5532_v42 = vld [vmem:[%s9017_s1 + $0x28c] sm:$0xf0]  ;;  %v4573_v46 = vor.u32 %v5500_v40, %v4572_v38  ;;  %1574 = vmatpush.bf16.msra.mxu3 %v4845_v39  ;;  %v4494_v37 = vld [vmem:[%s9017_s1 + $0xf0] sm:$0xf0] }
  0x18   :  { %v4828_v43 = vld [vmem:[%s9017_s1 + $0x380] sm:$0xf]  ;;  %v5564_v44 = vld [vmem:[%s9017_s1 + $0x38c] sm:$0xf0]  ;;  %v4701_v47 = vor.u32 %v5532_v42, %v4700_v41  ;;  %1428 = vmatpush.bf16.msra.mxu0 %v4445_v45  ;;  %v55_v41 = vld [vmem:[%s9016_s0 + $0x48] sm:$0xff] }
  0x19   :  { %v4428_v48 = vld [vmem:[%s9017_s1 + $0x60] sm:$0xf]  ;;  %v5464_v49 = vld [vmem:[%s9017_s1 + $0x6c] sm:$0xf0]  ;;  %v4829_v51 = vor.u32 %v5564_v44, %v4828_v43  ;;  %1477 = vmatpush.bf16.msra.mxu1 %v4573_v46  ;;  %v49_v42 = vld [vmem:[%s9016_s0 + $0x18] sm:$0xff] }
  0x1a   :  { %v4556_v50 = vld [vmem:[%s9017_s1 + $0x160] sm:$0xf]  ;;  %v5496_v52 = vld [vmem:[%s9017_s1 + $0x16c] sm:$0xf0]  ;;  %v4429_v57 = vor.u32 %v5464_v49, %v4428_v48  ;;  %1526 = vmatpush.bf16.msra.mxu2 %v4701_v47  ;;  %v4497_v49 = vor.u32 %v5478_v36, %v4494_v37  ;;  %v83_v37 = vld [vmem:[%s9016_s0 + $0x128] sm:$0xff] }
  0x1b   :  { %v4684_v53 = vld [vmem:[%s9017_s1 + $0x260] sm:$0xf]  ;;  %v5528_v54 = vld [vmem:[%s9017_s1 + $0x26c] sm:$0xf0]  ;;  %v4557_v58 = vor.u32 %v5496_v52, %v4556_v50  ;;  %1575 = vmatpush.bf16.msra.mxu3 %v4829_v51 }
  0x1c   :  { %v4812_v55 = vld [vmem:[%s9017_s1 + $0x360] sm:$0xf]  ;;  %v5560_v56 = vld [vmem:[%s9017_s1 + $0x36c] sm:$0xf0]  ;;  %v4685_v59 = vor.u32 %v5528_v54, %v4684_v53  ;;  %1429 = vmatpush.bf16.msra.mxu0 %v4429_v57  ;;  %v5474_v54 = vld [vmem:[%s9017_s1 + $0xc4] sm:$0xf] }
  0x1d   :  { %v4412_v60 = vld [vmem:[%s9017_s1 + $0x40] sm:$0xf]  ;;  %v5460_v61 = vld [vmem:[%s9017_s1 + $0x4c] sm:$0xf0]  ;;  %v4813_v63 = vor.u32 %v5560_v56, %v4812_v55  ;;  %1478 = vmatpush.bf16.msra.mxu1 %v4557_v58  ;;  %v4478_v55 = vld [vmem:[%s9017_s1 + $0xd0] sm:$0xf0] }
  0x1e   :  { %v4540_v62 = vld [vmem:[%s9017_s1 + $0x140] sm:$0xf]  ;;  %v5492_v0 = vld [vmem:[%s9017_s1 + $0x14c] sm:$0xf0]  ;;  %v4413_v5 = vor.u32 %v5460_v61, %v4412_v60  ;;  %1527 = vmatpush.bf16.msra.mxu2 %v4685_v59  ;;  %v4481_v61 = vor.u32 %v5474_v54, %v4478_v55 }
  0x1f   :  { %v4668_v1 = vld [vmem:[%s9017_s1 + $0x240] sm:$0xf]  ;;  %v5524_v2 = vld [vmem:[%s9017_s1 + $0x24c] sm:$0xf0]  ;;  %v4541_v6 = vor.u32 %v5492_v0, %v4540_v62  ;;  %1576 = vmatpush.bf16.msra.mxu3 %v4813_v63 }
  0x20   :  { %v4796_v3 = vld [vmem:[%s9017_s1 + $0x340] sm:$0xf]  ;;  %v5556_v4 = vld [vmem:[%s9017_s1 + $0x34c] sm:$0xf0]  ;;  %v4669_v7 = vor.u32 %v5524_v2, %v4668_v1  ;;  %1430 = vmatpush.bf16.msra.mxu0 %v4413_v5  ;;  %v5470_v1 = vld [vmem:[%s9017_s1 + $0xa4] sm:$0xf] }
  0x21   :  { %v4396_v8 = vld [vmem:[%s9017_s1 + $0x20] sm:$0xf]  ;;  %v5456_v9 = vld [vmem:[%s9017_s1 + $0x2c] sm:$0xf0]  ;;  %v4797_v11 = vor.u32 %v5556_v4, %v4796_v3  ;;  %1479 = vmatpush.bf16.msra.mxu1 %v4541_v6  ;;  %v4462_v5 = vld [vmem:[%s9017_s1 + $0xb0] sm:$0xf0] }
  0x22   :  { %v4524_v10 = vld [vmem:[%s9017_s1 + $0x120] sm:$0xf]  ;;  %v5488_v12 = vld [vmem:[%s9017_s1 + $0x12c] sm:$0xf0]  ;;  %v4397_v18 = vor.u32 %v5456_v9, %v4396_v8  ;;  %1528 = vmatpush.bf16.msra.mxu2 %v4669_v7  ;;  %v4465_v6 = vor.u32 %v5470_v1, %v4462_v5 }
  0x23   :  { %v4652_v13 = vld [vmem:[%s9017_s1 + $0x220] sm:$0xf]  ;;  %v5520_v14 = vld [vmem:[%s9017_s1 + $0x22c] sm:$0xf0]  ;;  %v4525_v22 = vor.u32 %v5488_v12, %v4524_v10  ;;  %1577 = vmatpush.bf16.msra.mxu3 %v4797_v11  ;;  %v67_v12 = vld [vmem:[%s9016_s0 + $0xa8] sm:$0xff] }
  0x24   :  { %v4780_v15 = vld [vmem:[%s9017_s1 + $0x320] sm:$0xf]  ;;  %v5552_v16 = vld [vmem:[%s9017_s1 + $0x32c] sm:$0xf0]  ;;  %v4653_v23 = vor.u32 %v5520_v14, %v4652_v13  ;;  %1431 = vmatpush.bf16.msra.mxu0 %v4397_v18  ;;  %v61_v13 = vld [vmem:[%s9016_s0 + $0x78] sm:$0xff] }
  0x25   :  { %v4380_v17 = vld [vmem:[%s9017_s1] sm:$0xf]  ;;  %v5452_v19 = vld [vmem:[%s9017_s1 + $0xc] sm:$0xf0]  ;;  %v4781_v27 = vor.u32 %v5552_v16, %v4780_v15  ;;  %1480 = vmatpush.bf16.msra.mxu1 %v4525_v22  ;;  %v69_v16 = vld [vmem:[%s9016_s0 + $0xb8] sm:$0xff] }
  0x26   :  { %v4508_v20 = vld [vmem:[%s9017_s1 + $0x100] sm:$0xf]  ;;  %v5484_v21 = vld [vmem:[%s9017_s1 + $0x10c] sm:$0xf0]  ;;  %v4381_v34 = vor.u32 %v5452_v19, %v4380_v17  ;;  %1529 = vmatpush.bf16.msra.mxu2 %v4653_v23  ;;  %v63_v17 = vld [vmem:[%s9016_s0 + $0x88] sm:$0xff] }
  0x27   :  { %v4636_v24 = vld [vmem:[%s9017_s1 + $0x200] sm:$0xf]  ;;  %v5516_v25 = vld [vmem:[%s9017_s1 + $0x20c] sm:$0xf0]  ;;  %v4509_v38 = vor.u32 %v5484_v21, %v4508_v20  ;;  %1578 = vmatpush.bf16.msra.mxu3 %v4781_v27  ;;  %v4446_v27 = vld [vmem:[%s9017_s1 + $0x90] sm:$0xf0] }
  0x28   :  { %v4764_v26 = vld [vmem:[%s9017_s1 + $0x300] sm:$0xf]  ;;  %v5548_v28 = vld [vmem:[%s9017_s1 + $0x30c] sm:$0xf0]  ;;  %v4637_v39 = vor.u32 %v5516_v25, %v4636_v24  ;;  %1432 = vmatpush.bf16.msra.mxu0 %v4381_v34  ;;  %v5466_v25 = vld [vmem:[%s9017_s1 + $0x84] sm:$0xf] }
  0x29   :  { %v46_v29 = vld [vmem:[%s9016_s0] sm:$0xff]  ;;  %v5644_v33 = vld [vmem:[%s9017_s1 + $0x60c] sm:$0xf0]  ;;  %v4765_v43 = vor.u32 %v5548_v28, %v4764_v26  ;;  %1481 = vmatpush.bf16.msra.mxu1 %v4509_v38  ;;  %v75_v34 = vld [vmem:[%s9016_s0 + $0xe8] sm:$0xff] }
  0x2a   :  { %v5148_v32 = vld [vmem:[%s9017_s1 + $0x600] sm:$0xf]  ;;  %v48_v40 = vld [vmem:[%s9016_s0 + $0x10] sm:$0xff]  ;;  %v6119_v48 = vpack.c.bf16 %v53_v30, %v46_v29  ;;  %1530 = vmatpush.bf16.msra.mxu2 %v4637_v39  ;;  %v4449_v30 = vor.u32 %v5466_v25, %v4446_v27  ;;  %v77_v38 = vld [vmem:[%s9016_s0 + $0xf8] sm:$0xff] }
  0x2b   :  { %v54_v35 = vld [vmem:[%s9016_s0 + $0x40] sm:$0xff]  ;;  %v56_v44 = vld [vmem:[%s9016_s0 + $0x50] sm:$0xff]  ;;  %v5149_v45 = vor.u32 %v5644_v33, %v5148_v32  ;;  %v6129_v53 = vpack.c.bf16 %v55_v41, %v48_v40  ;;  %1579 = vmatpush.bf16.msra.mxu3 %v4765_v43  ;;  %v81_v33 = vld [vmem:[%s9016_s0 + $0x118] sm:$0xff] }
  0x2c   :  { %v5004_v46 = vld [vmem:[%s9017_s1 + $0x4e0] sm:$0xf]  ;;  %v5608_v47 = vld [vmem:[%s9017_s1 + $0x4ec] sm:$0xf0]  ;;  %9114 = vst [vmem:[#allocation9_spill] sm:$0xff] %v6119_v48  ;;  %v6127_v52 = vpack.c.bf16 %v54_v35, %v47_v31  ;;  %v6137_v56 = vpack.c.bf16 %v56_v44, %v49_v42  ;;  %1433 = vmatmul.bf16.vlgmr.msra.gmra.mxu0 %v6119_v48 }
  0x2d   :  { %v5132_v50 = vld [vmem:[%s9017_s1 + $0x5e0] sm:$0xf]  ;;  %v5640_v51 = vld [vmem:[%s9017_s1 + $0x5ec] sm:$0xf0]  ;;  %v5005_v57 = vor.u32 %v5608_v47, %v5004_v46  ;;  %1531 = vmatmul.bf16.vlgmr.msra.gmra.mxu2 %v6129_v53  ;;  %v5462_v46 = vld [vmem:[%s9017_s1 + $0x64] sm:$0xf] }
  0x2e   :  { %9115 = vst [vmem:[#allocation10_spill] sm:$0xff] %v6127_v52  ;;  %1726 = vmatpush.bf16.msrb.mxu2 %v5149_v45  ;;  %v5133_v58 = vor.u32 %v5640_v51, %v5132_v50  ;;  %v4988_v59 = vld [vmem:[%s9017_s1 + $0x4c0] sm:$0xf]  ;;  %v5604_v60 = vld [vmem:[%s9017_s1 + $0x4cc] sm:$0xf0]  ;;  %1482 = vmatmul.bf16.vlgmr.msra.gmra.mxu1 %v6127_v52 }
  0x2f   :  { %9116 = vst [vmem:[#allocation11_spill] sm:$0xff] %v6137_v56  ;;  %1768 = vmatpush.bf16.msrb.mxu3 %v4497_v49  ;;  %v5116_v62 = vld [vmem:[%s9017_s1 + $0x5c0] sm:$0xf]  ;;  %v5636_v63 = vld [vmem:[%s9017_s1 + $0x5cc] sm:$0xf0]  ;;  %1621 = vmatpush.bf16.msrb.mxu0 %v5005_v57  ;;  %v4989_v0 = vor.u32 %v5604_v60, %v4988_v59  ;;  %v89_v59 = vld [vmem:[%s9016_s0 + $0x158] sm:$0xff] }
  0x30   :  { %1580 = vmatmul.bf16.vlgmr.msra.gmra.mxu3 %v6137_v56  ;;  %1670 = vmatpush.bf16.msrb.mxu1 %v5133_v58  ;;  %v5117_v2 = vor.u32 %v5636_v63, %v5116_v62  ;;  %v4972_v3 = vld [vmem:[%s9017_s1 + $0x4a0] sm:$0xf]  ;;  %v5600_v4 = vld [vmem:[%s9017_s1 + $0x4ac] sm:$0xf0]  ;;  %v4430_v49 = vld [vmem:[%s9017_s1 + $0x70] sm:$0xf0] }
  0x31   :  { %v5100_v7 = vld [vmem:[%s9017_s1 + $0x5a0] sm:$0xf]  ;;  %v5632_v8 = vld [vmem:[%s9017_s1 + $0x5ac] sm:$0xf0]  ;;  %v4973_v9 = vor.u32 %v5600_v4, %v4972_v3  ;;  %v4433_v54 = vor.u32 %v5462_v46, %v4430_v49  ;;  %v95_v58 = vld [vmem:[%s9016_s0 + $0x188] sm:$0xff] }
  0x32   :  { %v5101_v10 = vor.u32 %v5632_v8, %v5100_v7  ;;  %v60_v11 = vld [vmem:[%s9016_s0 + $0x70] sm:$0xff]  ;;  %v62_v15 = vld [vmem:[%s9016_s0 + $0x80] sm:$0xff]  ;;  %v97_v62 = vld [vmem:[%s9016_s0 + $0x198] sm:$0xff] }
  0x33   :  { %1769 = vmatpush.bf16.msrb.mxu3 %v4481_v61  ;;  %1622 = vmatpush.bf16.msrb.mxu0 %v4989_v0  ;;  %v68_v14 = vld [vmem:[%s9016_s0 + $0xb0] sm:$0xff]  ;;  %v70_v18 = vld [vmem:[%s9016_s0 + $0xc0] sm:$0xff]  ;;  %v6197_v19 = vpack.c.bf16 %v67_v12, %v60_v11  ;;  %v6201_v21 = vpack.c.bf16 %v69_v16, %v62_v15  ;;  %v91_v63 = vld [vmem:[%s9016_s0 + $0x168] sm:$0xff] }
  0x34   :  { %1671 = vmatpush.bf16.msrb.mxu1 %v5117_v2  ;;  %v6199_v20 = vpack.c.bf16 %v68_v14, %v61_v13  ;;  %v6203_v22 = vpack.c.bf16 %v70_v18, %v63_v17  ;;  %v4956_v23 = vld [vmem:[%s9017_s1 + $0x480] sm:$0xf]  ;;  %v5596_v24 = vld [vmem:[%s9017_s1 + $0x48c] sm:$0xf0]  ;;  %v5458_v7 = vld [vmem:[%s9017_s1 + $0x44] sm:$0xf] }
  0x35   :  { %9117 = vst [vmem:[#allocation12_spill] sm:$0xff] %v6197_v19  ;;  %v4957_v26 = vor.u32 %v5596_v24, %v4956_v23  ;;  %v5084_v28 = vld [vmem:[%s9017_s1 + $0x580] sm:$0xf]  ;;  %v5628_v29 = vld [vmem:[%s9017_s1 + $0x58c] sm:$0xf0]  ;;  %v109_v15 = vld [vmem:[%s9016_s0 + $0x1f8] sm:$0xff] }
  0x36   :  { %9118 = vst [vmem:[#allocation13_spill] sm:$0xff] %v6199_v20  ;;  %v5085_v31 = vor.u32 %v5628_v29, %v5084_v28  ;;  %v74_v32 = vld [vmem:[%s9016_s0 + $0xe0] sm:$0xff]  ;;  %v76_v36 = vld [vmem:[%s9016_s0 + $0xf0] sm:$0xff]  ;;  %v103_v16 = vld [vmem:[%s9016_s0 + $0x1c8] sm:$0xff] }
  0x37   :  { %1770 = vmatpush.bf16.msrb.mxu3 %v4465_v6  ;;  %1623 = vmatpush.bf16.msrb.mxu0 %v4973_v9  ;;  %v82_v35 = vld [vmem:[%s9016_s0 + $0x120] sm:$0xff]  ;;  %v84_v39 = vld [vmem:[%s9016_s0 + $0x130] sm:$0xff]  ;;  %v6251_v40 = vpack.c.bf16 %v81_v33, %v74_v32  ;;  %v6255_v42 = vpack.c.bf16 %v83_v37, %v76_v36  ;;  %v111_v23 = vld [vmem:[%s9016_s0 + $0x208] sm:$0xff] }
  0x38   :  { %1672 = vmatpush.bf16.msrb.mxu1 %v5101_v10  ;;  %v6253_v41 = vpack.c.bf16 %v82_v35, %v75_v34  ;;  %v6257_v43 = vpack.c.bf16 %v84_v39, %v77_v38  ;;  %v4940_v44 = vld [vmem:[%s9017_s1 + $0x460] sm:$0xf]  ;;  %v5592_v45 = vld [vmem:[%s9017_s1 + $0x46c] sm:$0xf0]  ;;  %v4414_v9 = vld [vmem:[%s9017_s1 + $0x50] sm:$0xf0] }
  0x39   :  { %9119 = vst [vmem:[#allocation14_spill] sm:$0xff] %v6251_v40  ;;  %v4941_v47 = vor.u32 %v5592_v45, %v4940_v44  ;;  %v5068_v50 = vld [vmem:[%s9017_s1 + $0x560] sm:$0xf]  ;;  %v5624_v51 = vld [vmem:[%s9017_s1 + $0x56c] sm:$0xf0]  ;;  %v4417_v12 = vor.u32 %v5458_v7, %v4414_v9  ;;  %v105_v24 = vld [vmem:[%s9016_s0 + $0x1d8] sm:$0xff] }
  0x3a   :  { %9120 = vst [vmem:[#allocation15_spill] sm:$0xff] %v6253_v41  ;;  %v5069_v55 = vor.u32 %v5624_v51, %v5068_v50  ;;  %v88_v57 = vld [vmem:[%s9016_s0 + $0x150] sm:$0xff]  ;;  %v90_v61 = vld [vmem:[%s9016_s0 + $0x160] sm:$0xff]  ;;  %v123_v44 = vld [vmem:[%s9016_s0 + $0x268] sm:$0xff] }
  0x3b   :  { %1624 = vmatpush.bf16.msrb.mxu0 %v4957_v26  ;;  %1771 = vmatpush.bf16.msrb.mxu3 %v4449_v30  ;;  %v96_v60 = vld [vmem:[%s9016_s0 + $0x190] sm:$0xff]  ;;  %v98_v0 = vld [vmem:[%s9016_s0 + $0x1a0] sm:$0xff]  ;;  %v6305_v1 = vpack.c.bf16 %v95_v58, %v88_v57  ;;  %v6309_v3 = vpack.c.bf16 %v97_v62, %v90_v61  ;;  %v117_v45 = vld [vmem:[%s9016_s0 + $0x238] sm:$0xff] }
  0x3c   :  { %1438 = vmatmul.bf16.gmra.mxu0 %v6197_v19  ;;  %1673 = vmatpush.bf16.msrb.mxu1 %v5085_v31  ;;  %v6307_v2 = vpack.c.bf16 %v96_v60, %v89_v59  ;;  %v6311_v4 = vpack.c.bf16 %v98_v0, %v91_v63  ;;  %v4924_v5 = vld [vmem:[%s9017_s1 + $0x440] sm:$0xf]  ;;  %v5588_v6 = vld [vmem:[%s9017_s1 + $0x44c] sm:$0xf0]  ;;  %v5454_v32 = vld [vmem:[%s9017_s1 + $0x24] sm:$0xf] }
  0x3d   :  { %1536 = vmatmul.bf16.gmra.mxu2 %v6201_v21  ;;  %9121 = vst [vmem:[#allocation16_spill] sm:$0xff] %v6305_v1  ;;  %v4925_v8 = vor.u32 %v5588_v6, %v4924_v5  ;;  %v5052_v10 = vld [vmem:[%s9017_s1 + $0x540] sm:$0xf]  ;;  %v5620_v11 = vld [vmem:[%s9017_s1 + $0x54c] sm:$0xf0]  ;;  %v125_v49 = vld [vmem:[%s9016_s0 + $0x278] sm:$0xff] }
  0x3e   :  { %1487 = vmatmul.bf16.gmra.mxu1 %v6199_v20  ;;  %9122 = vst [vmem:[#allocation17_spill] sm:$0xff] %v6307_v2  ;;  %v5053_v13 = vor.u32 %v5620_v11, %v5052_v10  ;;  %v102_v14 = vld [vmem:[%s9016_s0 + $0x1c0] sm:$0xff]  ;;  %v104_v18 = vld [vmem:[%s9016_s0 + $0x1d0] sm:$0xff]  ;;  %v119_v50 = vld [vmem:[%s9016_s0 + $0x248] sm:$0xff] }
  0x3f   :  { %1625 = vmatpush.bf16.msrb.mxu0 %v4941_v47  ;;  %1772 = vmatpush.bf16.msrb.mxu3 %v4433_v54  ;;  %v110_v17 = vld [vmem:[%s9016_s0 + $0x200] sm:$0xff]  ;;  %v112_v25 = vld [vmem:[%s9016_s0 + $0x210] sm:$0xff]  ;;  %v6359_v26 = vpack.c.bf16 %v109_v15, %v102_v14  ;;  %v6363_v28 = vpack.c.bf16 %v111_v23, %v104_v18  ;;  %v137_v9 = vld [vmem:[%s9016_s0 + $0x2d8] sm:$0xff] }
  0x40   :  { %1585 = vmatmul.bf16.gmra.mxu3 %v6203_v22  ;;  %1674 = vmatpush.bf16.msrb.mxu1 %v5069_v55  ;;  %v6361_v27 = vpack.c.bf16 %v110_v17, %v103_v16  ;;  %v6365_v29 = vpack.c.bf16 %v112_v25, %v105_v24  ;;  %v4908_v30 = vld [vmem:[%s9017_s1 + $0x420] sm:$0xf]  ;;  %v5584_v31 = vld [vmem:[%s9017_s1 + $0x42c] sm:$0xf0]  ;;  %v4398_v34 = vld [vmem:[%s9017_s1 + $0x30] sm:$0xf0] }
  0x41   :  { %9123 = vst [vmem:[#allocation18_spill] sm:$0xff] %v6359_v26  ;;  %v4909_v33 = vor.u32 %v5584_v31, %v4908_v30  ;;  %v5036_v35 = vld [vmem:[%s9017_s1 + $0x520] sm:$0xf]  ;;  %v5616_v36 = vld [vmem:[%s9017_s1 + $0x52c] sm:$0xf0]  ;;  %v4401_v37 = vor.u32 %v5454_v32, %v4398_v34  ;;  %v131_v10 = vld [vmem:[%s9016_s0 + $0x2a8] sm:$0xff] }
  0x42   :  { %9124 = vst [vmem:[#allocation19_spill] sm:$0xff] %v6361_v27  ;;  %v5037_v38 = vor.u32 %v5616_v36, %v5036_v35  ;;  %v116_v39 = vld [vmem:[%s9016_s0 + $0x230] sm:$0xff]  ;;  %v118_v47 = vld [vmem:[%s9016_s0 + $0x240] sm:$0xff]  ;;  %v133_v14 = vld [vmem:[%s9016_s0 + $0x2b8] sm:$0xff] }
  0x43   :  { %1626 = vmatpush.bf16.msrb.mxu0 %v4925_v8  ;;  %1773 = vmatpush.bf16.msrb.mxu3 %v4417_v12  ;;  %v124_v46 = vld [vmem:[%s9016_s0 + $0x270] sm:$0xff]  ;;  %v126_v51 = vld [vmem:[%s9016_s0 + $0x280] sm:$0xff]  ;;  %v6413_v54 = vpack.c.bf16 %v123_v44, %v116_v39  ;;  %v6417_v57 = vpack.c.bf16 %v125_v49, %v118_v47 }
  0x44   :  { %1675 = vmatpush.bf16.msrb.mxu1 %v5053_v13  ;;  %v6415_v55 = vpack.c.bf16 %v124_v46, %v117_v45  ;;  %v6419_v58 = vpack.c.bf16 %v126_v51, %v119_v50  ;;  %v4892_v59 = vld [vmem:[%s9017_s1 + $0x400] sm:$0xf]  ;;  %v5580_v60 = vld [vmem:[%s9017_s1 + $0x40c] sm:$0xf0]  ;;  %v5450_v61 = vld [vmem:[%s9017_s1 + $0x4] sm:$0xf] }
  0x45   :  { %9125 = vst [vmem:[#allocation20_spill] sm:$0xff] %v6413_v54  ;;  %v4893_v62 = vor.u32 %v5580_v60, %v4892_v59  ;;  %v4382_v63 = vld [vmem:[%s9017_s1 + $0x10] sm:$0xf0]  ;;  %v5020_v0 = vld [vmem:[%s9017_s1 + $0x500] sm:$0xf]  ;;  %v139_v13 = vld [vmem:[%s9016_s0 + $0x2e8] sm:$0xff] }
  0x46   :  { %9126 = vst [vmem:[#allocation21_spill] sm:$0xff] %v6415_v55  ;;  %v5612_v5 = vld [vmem:[%s9017_s1 + $0x50c] sm:$0xf0]  ;;  %v4385_v6 = vor.u32 %v5450_v61, %v4382_v63  ;;  %v130_v8 = vld [vmem:[%s9016_s0 + $0x2a0] sm:$0xff]  ;;  %v4878_v25 = vld [vmem:[%s9017_s1 + $0x3f0] sm:$0xf0] }
  0x47   :  { %1627 = vmatpush.bf16.msrb.mxu0 %v4909_v33  ;;  %1774 = vmatpush.bf16.msrb.mxu3 %v4401_v37  ;;  %v5021_v7 = vor.u32 %v5612_v5, %v5020_v0  ;;  %v138_v11 = vld [vmem:[%s9016_s0 + $0x2e0] sm:$0xff]  ;;  %v132_v12 = vld [vmem:[%s9016_s0 + $0x2b0] sm:$0xff]  ;;  %v6467_v16 = vpack.c.bf16 %v137_v9, %v130_v8  ;;  %v151_v45 = vld [vmem:[%s9016_s0 + $0x348] sm:$0xff] }
  0x48   :  { %1676 = vmatpush.bf16.msrb.mxu1 %v5037_v38  ;;  %v140_v15 = vld [vmem:[%s9016_s0 + $0x2f0] sm:$0xff]  ;;  %v6469_v17 = vpack.c.bf16 %v138_v11, %v131_v10  ;;  %v6471_v18 = vpack.c.bf16 %v139_v13, %v132_v12  ;;  %v5574_v24 = vld [vmem:[%s9017_s1 + $0x3e4] sm:$0xf]  ;;  %v145_v46 = vld [vmem:[%s9016_s0 + $0x318] sm:$0xff] }
  0x49   :  { %9127 = vst [vmem:[#allocation22_spill] sm:$0xff] %v6467_v16  ;;  %v6473_v23 = vpack.c.bf16 %v140_v15, %v133_v14  ;;  %v5510_v30 = vld [vmem:[%s9017_s1 + $0x1e4] sm:$0xf]  ;;  %v4881_v31 = vor.u32 %v5574_v24, %v4878_v25  ;;  %v4622_v32 = vld [vmem:[%s9017_s1 + $0x1f0] sm:$0xf0]  ;;  %v153_v50 = vld [vmem:[%s9016_s0 + $0x358] sm:$0xff] }
  0x4a   :  { %9128 = vst [vmem:[#allocation23_spill] sm:$0xff] %v6469_v17  ;;  %v5606_v33 = vld [vmem:[%s9017_s1 + $0x4e4] sm:$0xf]  ;;  %v5006_v34 = vld [vmem:[%s9017_s1 + $0x4f0] sm:$0xf0]  ;;  %v4625_v35 = vor.u32 %v5510_v30, %v4622_v32  ;;  %v147_v51 = vld [vmem:[%s9016_s0 + $0x328] sm:$0xff] }
  0x4b   :  { %1628 = vmatpush.bf16.msrb.mxu0 %v4893_v62  ;;  %1775 = vmatpush.bf16.msrb.mxu3 %v4385_v6  ;;  %v5009_v36 = vor.u32 %v5606_v33, %v5006_v34  ;;  %v5542_v37 = vld [vmem:[%s9017_s1 + $0x2e4] sm:$0xf]  ;;  %v4750_v38 = vld [vmem:[%s9017_s1 + $0x2f0] sm:$0xf0]  ;;  %v410_v13 = vld [vmem:[%s9018_s2] sm:$0xf] }
  0x4c   :  { %1443 = vmatmul.bf16.gmra.mxu0 %v6251_v40  ;;  %1677 = vmatpush.bf16.msrb.mxu1 %v5021_v7  ;;  %v4753_v39 = vor.u32 %v5542_v37, %v4750_v38  ;;  %v144_v44 = vld [vmem:[%s9016_s0 + $0x310] sm:$0xff]  ;;  %v146_v49 = vld [vmem:[%s9016_s0 + $0x320] sm:$0xff]  ;;  %v57_v30 = vld [vmem:[%s9016_s0 + $0x58] sm:$0xff]  ;;  %v6575_v32 = vperm.slane %v410_v13, 0 }
  0x4d   :  { %1541 = vmatmul.bf16.gmra.mxu2 %v6255_v42  ;;  %v152_v47 = vld [vmem:[%s9016_s0 + $0x350] sm:$0xff]  ;;  %v154_v59 = vld [vmem:[%s9016_s0 + $0x360] sm:$0xff]  ;;  %v6527_v60 = vpack.c.bf16 %v151_v45, %v144_v44  ;;  %v6531_v62 = vpack.c.bf16 %v153_v50, %v146_v49 }
  0x4e   :  { %1492 = vmatmul.bf16.gmra.mxu1 %v6253_v41  ;;  %1915 = vmatpush.bf16.msra.mxu2 %v4881_v31  ;;  %v6529_v61 = vpack.c.bf16 %v152_v47, %v145_v46  ;;  %v6533_v63 = vpack.c.bf16 %v154_v59, %v147_v51  ;;  %v5570_v0 = vld [vmem:[%s9017_s1 + $0x3c4] sm:$0xf]  ;;  %v4862_v5 = vld [vmem:[%s9017_s1 + $0x3d0] sm:$0xf0]  ;;  %v51_v31 = vld [vmem:[%s9016_s0 + $0x28] sm:$0xff] }
  0x4f   :  { %1817 = vmatpush.bf16.msra.mxu0 %v4625_v35  ;;  %1964 = vmatpush.bf16.msra.mxu3 %v5009_v36  ;;  %9129 = vst [vmem:[#allocation24_spill] sm:$0xff] %v6527_v60  ;;  %v5506_v6 = vld [vmem:[%s9017_s1 + $0x1c4] sm:$0xf]  ;;  %v4865_v7 = vor.u32 %v5570_v0, %v4862_v5  ;;  %v4606_v8 = vld [vmem:[%s9017_s1 + $0x1d0] sm:$0xf0]  ;;  %v59_v35 = vld [vmem:[%s9016_s0 + $0x68] sm:$0xff] }
  0x50   :  { %1590 = vmatmul.bf16.gmra.mxu3 %v6257_v43  ;;  %1866 = vmatpush.bf16.msra.mxu1 %v4753_v39  ;;  %9130 = vst [vmem:[#allocation25_spill] sm:$0xff] %v6529_v61  ;;  %v5602_v9 = vld [vmem:[%s9017_s1 + $0x4c4] sm:$0xf]  ;;  %v4990_v10 = vld [vmem:[%s9017_s1 + $0x4d0] sm:$0xf0]  ;;  %v4609_v11 = vor.u32 %v5506_v6, %v4606_v8 }
  0x51   :  { %9131 = vst [vmem:[#allocation26_spill] sm:$0xff] %v6531_v62  ;;  %v4993_v12 = vor.u32 %v5602_v9, %v4990_v10  ;;  %v5538_v14 = vld [vmem:[%s9017_s1 + $0x2c4] sm:$0xf]  ;;  %v4734_v15 = vld [vmem:[%s9017_s1 + $0x2d0] sm:$0xf0] }
  0x52   :  { %9132 = vst [vmem:[#allocation27_spill] sm:$0xff] %v6533_v63  ;;  %1916 = vmatpush.bf16.msra.mxu2 %v4865_v7  ;;  %v4737_v24 = vor.u32 %v5538_v14, %v4734_v15  ;;  %v50_v25 = vld [vmem:[%s9016_s0 + $0x20] sm:$0xff]  ;;  %v52_v34 = vld [vmem:[%s9016_s0 + $0x30] sm:$0xff] }
  0x53   :  { %1818 = vmatpush.bf16.msra.mxu0 %v4609_v11  ;;  %1965 = vmatpush.bf16.msra.mxu3 %v4993_v12  ;;  %v58_v33 = vld [vmem:[%s9016_s0 + $0x60] sm:$0xff]  ;;  %v6586_v36 = vpack.c.bf16 %v57_v30, %v50_v25  ;;  %v6590_v39 = vpack.c.bf16 %v59_v35, %v52_v34  ;;  %v4846_v49 = vld [vmem:[%s9017_s1 + $0x3b0] sm:$0xf0]  ;;  %v65_v34 = vld [vmem:[%s9016_s0 + $0x98] sm:$0xff] }
  0x54   :  { %1867 = vmatpush.bf16.msra.mxu1 %v4737_v24  ;;  %v6588_v38 = vpack.c.bf16 %v58_v33, %v51_v31  ;;  %v5566_v47 = vld [vmem:[%s9017_s1 + $0x3a4] sm:$0xf]  ;;  %v4590_v59 = vld [vmem:[%s9017_s1 + $0x1b0] sm:$0xf0]  ;;  %v71_v33 = vld [vmem:[%s9016_s0 + $0xc8] sm:$0xff] }
  0x55   :  { %9133 = vst [vmem:[#allocation28_spill] sm:$0xff] %v6586_v36  ;;  %v5502_v50 = vld [vmem:[%s9017_s1 + $0x1a4] sm:$0xf]  ;;  %v4849_v51 = vor.u32 %v5566_v47, %v4846_v49  ;;  %v4974_v5 = vld [vmem:[%s9017_s1 + $0x4b0] sm:$0xf0] }
  0x56   :  { %9134 = vst [vmem:[#allocation29_spill] sm:$0xff] %v6588_v38  ;;  %v5598_v0 = vld [vmem:[%s9017_s1 + $0x4a4] sm:$0xf]  ;;  %v4593_v7 = vor.u32 %v5502_v50, %v4590_v59  ;;  %v4718_v24 = vld [vmem:[%s9017_s1 + $0x2b0] sm:$0xf0] }
  0x57   :  { %9135 = vst [vmem:[#allocation30_spill] sm:$0xff] %v6590_v39  ;;  %v4977_v8 = vor.u32 %v5598_v0, %v4974_v5  ;;  %1917 = vmatpush.bf16.msra.mxu2 %v4849_v51  ;;  %v5534_v15 = vld [vmem:[%s9017_s1 + $0x2a4] sm:$0xf]  ;;  %v64_v31 = vld [vmem:[%s9016_s0 + $0x90] sm:$0xff] }
  0x58   :  { %1819 = vmatpush.bf16.msra.mxu0 %v4593_v7  ;;  %v4721_v30 = vor.u32 %v5534_v15, %v4718_v24  ;;  %v72_v35 = vld [vmem:[%s9016_s0 + $0xd0] sm:$0xff] }
  0x59   :  { %1966 = vmatpush.bf16.msra.mxu3 %v4977_v8  ;;  %v6645_v51 = vpack.c.bf16 %v72_v35, %v65_v34  ;;  %v5562_v8 = vld [vmem:[%s9017_s1 + $0x384] sm:$0xf]  ;;  %v4958_v15 = vld [vmem:[%s9017_s1 + $0x490] sm:$0xf0] }
  0x5a   :  { %1868 = vmatpush.bf16.msra.mxu1 %v4721_v30 }
  0x5b   :  { %9136 = vst [vmem:[#allocation31_spill] sm:$0xff] %v6645_v51 }
  0x5c   :  { %1448 = vmatmul.bf16.gmra.mxu0 %v6305_v1 }
  0x5d   :  { %1546 = vmatmul.bf16.gmra.mxu2 %v6309_v3 }
  0x5e   :  { %1497 = vmatmul.bf16.gmra.mxu1 %v6307_v2 }
  0x60   :  { %1595 = vmatmul.bf16.gmra.mxu3 %v6311_v4 }
  0x6c   :  { %1453 = vmatmul.bf16.gmra.mxu0 %v6359_v26 }
  0x6d   :  { %1551 = vmatmul.bf16.gmra.mxu2 %v6363_v28 }
  0x6e   :  { %1502 = vmatmul.bf16.gmra.mxu1 %v6361_v27 }
  0x70   :  { %1600 = vmatmul.bf16.gmra.mxu3 %v6365_v29 }
  0x7c   :  { %1458 = vmatmul.bf16.gmra.mxu0 %v6413_v54 }
  0x7d   :  { %1556 = vmatmul.bf16.gmra.mxu2 %v6417_v57 }
  0x7e   :  { %1507 = vmatmul.bf16.gmra.mxu1 %v6415_v55 }
  0x80   :  { %1605 = vmatmul.bf16.gmra.mxu3 %v6419_v58 }
  0x8c   :  { %1463 = vmatmul.bf16.gmra.mxu0 %v6467_v16 }
  0x8d   :  { %1561 = vmatmul.bf16.gmra.mxu2 %v6471_v18 }
  0x8e   :  { %1512 = vmatmul.bf16.gmra.mxu1 %v6469_v17 }
  0x90   :  { %1610 = vmatmul.bf16.gmra.mxu3 %v6473_v23 }
  0x9c   :  { %1468 = vmatmul.bf16.gmra.mxu0 %v6527_v60 }
  0x9d   :  { %1566 = vmatmul.bf16.gmra.mxu2 %v6531_v62 }
  0x9e   :  { %1517 = vmatmul.bf16.gmra.mxu1 %v6529_v61 }
  0xa0   :  { %1615 = vmatmul.bf16.gmra.mxu3 %v6533_v63 }
  0xa9   :  { %v1434_v37 = vpop.f32.mrf.mxu0 }
  0xaa   :  { %v1435_v44 = vadd.f32 %v1434_v37, %v6575_v32  ;;  %v66_v37 = vld [vmem:[%s9016_s0 + $0xa0] sm:$0xff] }
  0xab   :  { %v1483_v45 = vpop.f32.mrf.mxu1 }
  0xac   :  { %v1484_v46 = vadd.f32 %v1483_v45, %v1435_v44  ;;  %1629 = vmatmul.bf16.vlgmr.msrb.gmra.mxu0 %v6586_v36  ;;  %v73_v44 = vld [vmem:[%s9016_s0 + $0xd8] sm:$0xff] }
  0xad   :  { %5162 = vmatmul.msk.bf16.vlgmr.msrb.gmra.mxu2 %vm1400_vm0, %v6590_v39  ;;  %v6647_v59 = vpack.c.bf16 %v73_v44, %v66_v37 }
  0xae   :  { %1678 = vmatmul.bf16.vlgmr.msrb.gmra.mxu1 %v6588_v38 }
  0xaf   :  { %9137 = vst [vmem:[#allocation32_spill] sm:$0xff] %v6647_v59 }
  0xb0   :  { %1776 = vmatmul.bf16.vlgmr.msrb.gmra.mxu3 %v6119_v48  ;;  %v1532_v6 = vpop.f32.mrf.mxu2 }
  0xb1   :  { %v1533_v9 = vadd.f32 %v1532_v6, %v1484_v46  ;;  %v1436_v11 = vpop.f32.mrf.mxu0  ;;  %v6643_v46 = vpack.c.bf16 %v71_v33, %v64_v31 }
  0xb2   :  { %v1437_v12 = vadd.f32 %v1436_v11, %v6575_v32 }
  0xb3   :  { %v1581_v10 = vpop.f32.mrf.mxu3  ;;  %v1485_v13 = vpop.f32.mrf.mxu1 }
  0xb4   :  { %v6617_v14 = vadd.f32 %v1581_v10, %v1533_v9  ;;  %v1486_v25 = vadd.f32 %v1485_v13, %v1437_v12  ;;  %v4830_v9 = vld [vmem:[%s9017_s1 + $0x390] sm:$0xf0]  ;;  %v5498_v10 = vld [vmem:[%s9017_s1 + $0x184] sm:$0xf] }
  0xb5   :  { %v4833_v11 = vor.u32 %v5562_v8, %v4830_v9  ;;  %v4574_v12 = vld [vmem:[%s9017_s1 + $0x190] sm:$0xf0]  ;;  %v5594_v13 = vld [vmem:[%s9017_s1 + $0x484] sm:$0xf] }
  0xb6   :  { %v4961_v30 = vor.u32 %v5594_v13, %v4958_v15  ;;  %v86_v8 = vld [vmem:[%s9016_s0 + $0x140] sm:$0xff]  ;;  %v80_v9 = vld [vmem:[%s9016_s0 + $0x110] sm:$0xff] }
  0xb7   :  { %1918 = vmatpush.bf16.msra.mxu2 %v4833_v11 }
  0xb8   :  { %v1534_v45 = vpop.f32.mrf.mxu2  ;;  %1967 = vmatpush.bf16.msra.mxu3 %v4961_v30 }
  0xb9   :  { %v1535_v47 = vadd.f32 %v1534_v45, %v1486_v25  ;;  %v1439_v50 = vpop.f32.mrf.mxu0  ;;  %v4577_v25 = vor.u32 %v5498_v10, %v4574_v12  ;;  %v5530_v45 = vld [vmem:[%s9017_s1 + $0x284] sm:$0xf]  ;;  %v87_v10 = vld [vmem:[%s9016_s0 + $0x148] sm:$0xff] }
  0xba   :  { %v1440_v0 = vadd.f32 %v1439_v50, %v6575_v32  ;;  %v6706_v30 = vpack.c.bf16 %v87_v10, %v80_v9 }
  0xbb   :  { %v1583_v49 = vpop.f32.mrf.mxu3  ;;  %v1488_v5 = vpop.f32.mrf.mxu1  ;;  %1820 = vmatpush.bf16.msra.mxu0 %v4577_v25 }
  0xbc   :  { %v6650_v6 = vadd.f32 %v1583_v49, %v1535_v47  ;;  %v1489_v7 = vadd.f32 %v1488_v5, %v1440_v0  ;;  %1634 = vmatmul.bf16.gmra.mxu0 %v6643_v46  ;;  %v4702_v47 = vld [vmem:[%s9017_s1 + $0x290] sm:$0xf0]  ;;  %v78_v0 = vld [vmem:[%s9016_s0 + $0x100] sm:$0xff]  ;;  %v85_v5 = vld [vmem:[%s9016_s0 + $0x138] sm:$0xff]  ;;  %9140 = vst [vmem:[#allocation35_spill] sm:$0xff] %v6706_v30 }
  0xbd   :  { %5163 = vmatmul.msk.bf16.gmra.mxu2 %vm1400_vm0, %v6647_v59  ;;  %v4705_v50 = vor.u32 %v5530_v45, %v4702_v47  ;;  %v6702_v12 = vpack.c.bf16 %v85_v5, %v78_v0  ;;  %v4814_v45 = vld [vmem:[%s9017_s1 + $0x370] sm:$0xf0]  ;;  %v5494_v47 = vld [vmem:[%s9017_s1 + $0x164] sm:$0xf] }
  0xbe   :  { %1683 = vmatmul.bf16.gmra.mxu1 %v6645_v51  ;;  %v5590_v0 = vld [vmem:[%s9017_s1 + $0x464] sm:$0xf]  ;;  %v4942_v5 = vld [vmem:[%s9017_s1 + $0x470] sm:$0xf0] }
  0xbf   :  { %1869 = vmatpush.bf16.msra.mxu1 %v4705_v50  ;;  %9138 = vst [vmem:[#allocation33_spill] sm:$0xff] %v6702_v12  ;;  %v4558_v50 = vld [vmem:[%s9017_s1 + $0x170] sm:$0xf0]  ;;  %v4945_v9 = vor.u32 %v5590_v0, %v4942_v5  ;;  %v94_v5 = vld [vmem:[%s9016_s0 + $0x180] sm:$0xff] }
  0xc0   :  { %1781 = vmatmul.bf16.gmra.mxu3 %v6197_v19  ;;  %v1537_v24 = vpop.f32.mrf.mxu2  ;;  %v100_v0 = vld [vmem:[%s9016_s0 + $0x1b0] sm:$0xff] }
  0xc1   :  { %v1538_v31 = vadd.f32 %v1537_v24, %v1489_v7  ;;  %v1441_v34 = vpop.f32.mrf.mxu0  ;;  %v79_v7 = vld [vmem:[%s9016_s0 + $0x108] sm:$0xff]  ;;  %1968 = vmatpush.bf16.msra.mxu3 %v4945_v9 }
  0xc2   :  { %v1442_v35 = vadd.f32 %v1441_v34, %v6575_v32  ;;  %v6704_v25 = vpack.c.bf16 %v86_v8, %v79_v7  ;;  %v4561_v8 = vor.u32 %v5494_v47, %v4558_v50  ;;  %v92_v47 = vld [vmem:[%s9016_s0 + $0x170] sm:$0xff]  ;;  %v93_v50 = vld [vmem:[%s9016_s0 + $0x178] sm:$0xff] }
  0xc3   :  { %v1586_v33 = vpop.f32.mrf.mxu3  ;;  %v1490_v37 = vpop.f32.mrf.mxu1 }
  0xc4   :  { %v6676_v44 = vadd.f32 %v1586_v33, %v1538_v31  ;;  %v1491_v49 = vadd.f32 %v1490_v37, %v1442_v35  ;;  %9139 = vst [vmem:[#allocation34_spill] sm:$0xff] %v6704_v25  ;;  %v5558_v37 = vld [vmem:[%s9017_s1 + $0x364] sm:$0xf]  ;;  %1821 = vmatpush.bf16.msra.mxu0 %v4561_v8 }
  0xc8   :  { %v1539_v11 = vpop.f32.mrf.mxu2 }
  0xc9   :  { %v1540_v13 = vadd.f32 %v1539_v11, %v1491_v49  ;;  %v1444_v24 = vpop.f32.mrf.mxu0  ;;  %v4817_v49 = vor.u32 %v5558_v37, %v4814_v45  ;;  %v4686_v37 = vld [vmem:[%s9017_s1 + $0x270] sm:$0xf0] }
  0xca   :  { %v1445_v31 = vadd.f32 %v1444_v24, %v6575_v32 }
  0xcb   :  { %v1588_v15 = vpop.f32.mrf.mxu3  ;;  %v1493_v33 = vpop.f32.mrf.mxu1  ;;  %1919 = vmatpush.bf16.msra.mxu2 %v4817_v49  ;;  %v99_v49 = vld [vmem:[%s9016_s0 + $0x1a8] sm:$0xff] }
  0xcc   :  { %v6709_v34 = vadd.f32 %v1588_v15, %v1540_v13  ;;  %v1494_v35 = vadd.f32 %v1493_v33, %v1445_v31  ;;  %1639 = vmatmul.bf16.gmra.mxu0 %v6702_v12  ;;  %v5526_v33 = vld [vmem:[%s9017_s1 + $0x264] sm:$0xf]  ;;  %v6761_v9 = vpack.c.bf16 %v99_v49, %v92_v47 }
  0xcd   :  { %5164 = vmatmul.msk.bf16.gmra.mxu2 %vm1400_vm0, %v6706_v30  ;;  %v5490_v47 = vld [vmem:[%s9017_s1 + $0x144] sm:$0xf] }
  0xce   :  { %1688 = vmatmul.bf16.gmra.mxu1 %v6704_v25 }
  0xd0   :  { %1786 = vmatmul.bf16.gmra.mxu3 %v6251_v40  ;;  %v1542_v7 = vpop.f32.mrf.mxu2 }
  0xd1   :  { %v1543_v10 = vadd.f32 %v1542_v7, %v1494_v35  ;;  %v1446_v13 = vpop.f32.mrf.mxu0  ;;  %v4689_v35 = vor.u32 %v5526_v33, %v4686_v37  ;;  %v101_v7 = vld [vmem:[%s9016_s0 + $0x1b8] sm:$0xff] }
  0xd2   :  { %v1447_v15 = vadd.f32 %v1446_v13, %v6575_v32 }
  0xd3   :  { %v1591_v11 = vpop.f32.mrf.mxu3  ;;  %v1495_v24 = vpop.f32.mrf.mxu1  ;;  %1870 = vmatpush.bf16.msra.mxu1 %v4689_v35  ;;  %v4798_v35 = vld [vmem:[%s9017_s1 + $0x350] sm:$0xf0] }
  0xd4   :  { %v6735_v31 = vadd.f32 %v1591_v11, %v1543_v10  ;;  %v1496_v45 = vadd.f32 %v1495_v24, %v1447_v15  ;;  %v6763_v15 = vpack.c.bf16 %v100_v0, %v93_v50  ;;  %v6765_v24 = vpack.c.bf16 %v101_v7, %v94_v5  ;;  %v4542_v50 = vld [vmem:[%s9017_s1 + $0x150] sm:$0xf0]  ;;  %v5586_v0 = vld [vmem:[%s9017_s1 + $0x444] sm:$0xf] }
  0xd5   :  { %v4926_v5 = vld [vmem:[%s9017_s1 + $0x450] sm:$0xf0] }
  0xd6   :  { %9141 = vst [vmem:[#allocation36_spill] sm:$0xff] %v6763_v15 }
  0xd7   :  { %9142 = vst [vmem:[#allocation37_spill] sm:$0xff] %v6765_v24 }
  0xd8   :  { %v1544_v8 = vpop.f32.mrf.mxu2 }
  0xd9   :  { %v1545_v10 = vadd.f32 %v1544_v8, %v1496_v45  ;;  %v1449_v13 = vpop.f32.mrf.mxu0  ;;  %v5554_v45 = vld [vmem:[%s9017_s1 + $0x344] sm:$0xf]  ;;  %v4545_v8 = vor.u32 %v5490_v47, %v4542_v50  ;;  %v4670_v47 = vld [vmem:[%s9017_s1 + $0x250] sm:$0xf0] }
  0xda   :  { %v1450_v33 = vadd.f32 %v1449_v13, %v6575_v32  ;;  %v4801_v49 = vor.u32 %v5554_v45, %v4798_v35 }
  0xdb   :  { %v1593_v11 = vpop.f32.mrf.mxu3  ;;  %v1498_v37 = vpop.f32.mrf.mxu1  ;;  %1822 = vmatpush.bf16.msra.mxu0 %v4545_v8  ;;  %v115_v8 = vld [vmem:[%s9016_s0 + $0x228] sm:$0xff] }
  0xdc   :  { %v6768_v40 = vadd.f32 %v1593_v11, %v1545_v10  ;;  %v1499_v30 = vadd.f32 %v1498_v37, %v1450_v33  ;;  %1644 = vmatmul.bf16.gmra.mxu0 %v6761_v9  ;;  %v4929_v10 = vor.u32 %v5586_v0, %v4926_v5  ;;  %1920 = vmatpush.bf16.msra.mxu2 %v4801_v49  ;;  %v106_v49 = vld [vmem:[%s9016_s0 + $0x1e0] sm:$0xff]  ;;  %v113_v0 = vld [vmem:[%s9016_s0 + $0x218] sm:$0xff]  ;;  %v107_v5 = vld [vmem:[%s9016_s0 + $0x1e8] sm:$0xff] }
  0xdd   :  { %5165 = vmatmul.msk.bf16.gmra.mxu2 %vm1400_vm0, %v6765_v24 }
  0xde   :  { %1693 = vmatmul.bf16.gmra.mxu1 %v6763_v15  ;;  %1969 = vmatpush.bf16.msra.mxu3 %v4929_v10 }
  0xe0   :  { %1791 = vmatmul.bf16.gmra.mxu3 %v6305_v1  ;;  %v1547_v7 = vpop.f32.mrf.mxu2  ;;  %v5522_v1 = vld [vmem:[%s9017_s1 + $0x244] sm:$0xf] }
  0xe1   :  { %v1548_v11 = vadd.f32 %v1547_v7, %v1499_v30  ;;  %v1451_v33 = vpop.f32.mrf.mxu0  ;;  %v4673_v30 = vor.u32 %v5522_v1, %v4670_v47  ;;  %v114_v7 = vld [vmem:[%s9016_s0 + $0x220] sm:$0xff]  ;;  %v108_v1 = vld [vmem:[%s9016_s0 + $0x1f0] sm:$0xff] }
  0xe2   :  { %v1452_v37 = vadd.f32 %v1451_v33, %v6575_v32  ;;  %v6824_v47 = vpack.c.bf16 %v115_v8, %v108_v1 }
  0xe3   :  { %v1596_v13 = vpop.f32.mrf.mxu3  ;;  %v1500_v45 = vpop.f32.mrf.mxu1  ;;  %1871 = vmatpush.bf16.msra.mxu1 %v4673_v30  ;;  %v4782_v30 = vld [vmem:[%s9017_s1 + $0x330] sm:$0xf0] }
  0xe4   :  { %v6794_v35 = vadd.f32 %v1596_v13, %v1548_v11  ;;  %v1501_v50 = vadd.f32 %v1500_v45, %v1452_v37  ;;  %v6820_v11 = vpack.c.bf16 %v113_v0, %v106_v49  ;;  %v6822_v45 = vpack.c.bf16 %v114_v7, %v107_v5  ;;  %9144 = vst [vmem:[#allocation39_spill] sm:$0xff] %v6824_v47  ;;  %v4526_v49 = vld [vmem:[%s9017_s1 + $0x130] sm:$0xf0]  ;;  %v5582_v0 = vld [vmem:[%s9017_s1 + $0x424] sm:$0xf] }
  0xe5   :  { %v4910_v5 = vld [vmem:[%s9017_s1 + $0x430] sm:$0xf0] }
  0xe6   :  { %9143 = vst [vmem:[#allocation38_spill] sm:$0xff] %v6822_v45  ;;  %v4913_v8 = vor.u32 %v5582_v0, %v4910_v5  ;;  %v127_v0 = vld [vmem:[%s9016_s0 + $0x288] sm:$0xff]  ;;  %v121_v5 = vld [vmem:[%s9016_s0 + $0x258] sm:$0xff] }
  0xe8   :  { %v1549_v10 = vpop.f32.mrf.mxu2  ;;  %1970 = vmatpush.bf16.msra.mxu3 %v4913_v8 }
  0xe9   :  { %v1550_v13 = vadd.f32 %v1549_v10, %v1501_v50  ;;  %v1454_v37 = vpop.f32.mrf.mxu0  ;;  %v5550_v50 = vld [vmem:[%s9017_s1 + $0x324] sm:$0xf] }
  0xea   :  { %v1455_v24 = vadd.f32 %v1454_v37, %v6575_v32 }
  0xeb   :  { %v1598_v33 = vpop.f32.mrf.mxu3  ;;  %v1503_v15 = vpop.f32.mrf.mxu1 }
  0xec   :  { %v6827_v25 = vadd.f32 %v1598_v33, %v1550_v13  ;;  %v1504_v19 = vadd.f32 %v1503_v15, %v1455_v24  ;;  %1649 = vmatmul.bf16.gmra.mxu0 %v6820_v11  ;;  %v5486_v15 = vld [vmem:[%s9017_s1 + $0x124] sm:$0xf]  ;;  %v4785_v24 = vor.u32 %v5550_v50, %v4782_v30 }
  0xed   :  { %5166 = vmatmul.msk.bf16.gmra.mxu2 %vm1400_vm0, %v6824_v47  ;;  %v4529_v1 = vor.u32 %v5486_v15, %v4526_v49  ;;  %v4654_v15 = vld [vmem:[%s9017_s1 + $0x230] sm:$0xf0] }
  0xee   :  { %1698 = vmatmul.bf16.gmra.mxu1 %v6822_v45  ;;  %1921 = vmatpush.bf16.msra.mxu2 %v4785_v24  ;;  %v120_v24 = vld [vmem:[%s9016_s0 + $0x250] sm:$0xff] }
  0xef   :  { %1823 = vmatpush.bf16.msra.mxu0 %v4529_v1  ;;  %v129_v1 = vld [vmem:[%s9016_s0 + $0x298] sm:$0xff] }
  0xf0   :  { %1796 = vmatmul.bf16.gmra.mxu3 %v6359_v26  ;;  %v1552_v7 = vpop.f32.mrf.mxu2  ;;  %v5518_v26 = vld [vmem:[%s9017_s1 + $0x224] sm:$0xf] }
  0xf1   :  { %v1553_v10 = vadd.f32 %v1552_v7, %v1504_v19  ;;  %v1456_v33 = vpop.f32.mrf.mxu0  ;;  %v4657_v19 = vor.u32 %v5518_v26, %v4654_v15  ;;  %v128_v7 = vld [vmem:[%s9016_s0 + $0x290] sm:$0xff]  ;;  %v122_v26 = vld [vmem:[%s9016_s0 + $0x260] sm:$0xff] }
  0xf2   :  { %v1457_v37 = vadd.f32 %v1456_v33, %v6575_v32  ;;  %v6883_v15 = vpack.c.bf16 %v129_v1, %v122_v26 }
  0xf3   :  { %v1601_v13 = vpop.f32.mrf.mxu3  ;;  %v1505_v50 = vpop.f32.mrf.mxu1  ;;  %1872 = vmatpush.bf16.msra.mxu1 %v4657_v19  ;;  %v4766_v19 = vld [vmem:[%s9017_s1 + $0x310] sm:$0xf0] }
  0xf4   :  { %v6853_v30 = vadd.f32 %v1601_v13, %v1553_v10  ;;  %v1506_v49 = vadd.f32 %v1505_v50, %v1457_v37  ;;  %v6879_v10 = vpack.c.bf16 %v127_v0, %v120_v24  ;;  %v6881_v50 = vpack.c.bf16 %v128_v7, %v121_v5  ;;  %9146 = vst [vmem:[#allocation41_spill] sm:$0xff] %v6883_v15  ;;  %v4510_v24 = vld [vmem:[%s9017_s1 + $0x110] sm:$0xf0]  ;;  %v5578_v0 = vld [vmem:[%s9017_s1 + $0x404] sm:$0xf] }
  0xf5   :  { %v4894_v5 = vld [vmem:[%s9017_s1 + $0x410] sm:$0xf0] }
  0xf6   :  { %9145 = vst [vmem:[#allocation40_spill] sm:$0xff] %v6881_v50  ;;  %v4897_v1 = vor.u32 %v5578_v0, %v4894_v5  ;;  %v141_v0 = vld [vmem:[%s9016_s0 + $0x2f8] sm:$0xff]  ;;  %v135_v5 = vld [vmem:[%s9016_s0 + $0x2c8] sm:$0xff] }
  0xf8   :  { %v1554_v8 = vpop.f32.mrf.mxu2  ;;  %1971 = vmatpush.bf16.msra.mxu3 %v4897_v1 }
  0xf9   :  { %v1555_v13 = vadd.f32 %v1554_v8, %v1506_v49  ;;  %v1459_v37 = vpop.f32.mrf.mxu0  ;;  %v5546_v49 = vld [vmem:[%s9017_s1 + $0x304] sm:$0xf] }
  0xfa   :  { %v1460_v47 = vadd.f32 %v1459_v37, %v6575_v32 }
  0xfb   :  { %v1603_v33 = vpop.f32.mrf.mxu3  ;;  %v1508_v45 = vpop.f32.mrf.mxu1 }
  0xfc   :  { %v6886_v59 = vadd.f32 %v1603_v33, %v1555_v13  ;;  %v1509_v51 = vadd.f32 %v1508_v45, %v1460_v47  ;;  %1654 = vmatmul.bf16.gmra.mxu0 %v6879_v10  ;;  %v5482_v45 = vld [vmem:[%s9017_s1 + $0x104] sm:$0xf]  ;;  %v4769_v47 = vor.u32 %v5546_v49, %v4766_v19 }
  0xfd   :  { %5167 = vmatmul.msk.bf16.gmra.mxu2 %vm1400_vm0, %v6883_v15  ;;  %v4513_v26 = vor.u32 %v5482_v45, %v4510_v24  ;;  %v4638_v45 = vld [vmem:[%s9017_s1 + $0x210] sm:$0xf0] }
  0xfe   :  { %1703 = vmatmul.bf16.gmra.mxu1 %v6881_v50  ;;  %1922 = vmatpush.bf16.msra.mxu2 %v4769_v47  ;;  %v134_v47 = vld [vmem:[%s9016_s0 + $0x2c0] sm:$0xff] }
  0xff   :  { %1824 = vmatpush.bf16.msra.mxu0 %v4513_v26  ;;  %v143_v26 = vld [vmem:[%s9016_s0 + $0x308] sm:$0xff] }
 0x100   :  { %1801 = vmatmul.bf16.gmra.mxu3 %v6413_v54  ;;  %v1557_v7 = vpop.f32.mrf.mxu2  ;;  %v5514_v54 = vld [vmem:[%s9017_s1 + $0x204] sm:$0xf] }
 0x101   :  { %v1558_v8 = vadd.f32 %v1557_v7, %v1509_v51  ;;  %v1461_v33 = vpop.f32.mrf.mxu0  ;;  %v4641_v51 = vor.u32 %v5514_v54, %v4638_v45  ;;  %v142_v7 = vld [vmem:[%s9016_s0 + $0x300] sm:$0xff]  ;;  %v136_v54 = vld [vmem:[%s9016_s0 + $0x2d0] sm:$0xff] }
 0x102   :  { %v1462_v37 = vadd.f32 %v1461_v33, %v6575_v32  ;;  %v6942_v45 = vpack.c.bf16 %v143_v26, %v136_v54 }
 0x103   :  { %v1606_v13 = vpop.f32.mrf.mxu3  ;;  %v1510_v49 = vpop.f32.mrf.mxu1  ;;  %1873 = vmatpush.bf16.msra.mxu1 %v4641_v51  ;;  %v5481_v51 = vld [vmem:[%s9017_s1 + $0xf4] sm:$0xf0] }
 0x104   :  { %v6912_v19 = vadd.f32 %v1606_v13, %v1558_v8  ;;  %v1511_v24 = vadd.f32 %v1510_v49, %v1462_v37  ;;  %v6938_v8 = vpack.c.bf16 %v141_v0, %v134_v47  ;;  %v6940_v49 = vpack.c.bf16 %v142_v7, %v135_v5  ;;  %9149 = vst [vmem:[#allocation44_spill] sm:$0xff] %v6942_v45  ;;  %v5134_v47 = vld [vmem:[%s9017_s1 + $0x5f0] sm:$0xf0]  ;;  %v4628_v0 = vld [vmem:[%s9017_s1 + $0x1e8] sm:$0xf] }
 0x105   :  { %v5513_v5 = vld [vmem:[%s9017_s1 + $0x1f4] sm:$0xf0] }
 0x106   :  { %9147 = vst [vmem:[#allocation42_spill] sm:$0xff] %v6938_v8  ;;  %v4629_v26 = vor.u32 %v5513_v5, %v4628_v0  ;;  %v156_v0 = vld [vmem:[%s9016_s0 + $0x370] sm:$0xff]  ;;  %v150_v5 = vld [vmem:[%s9016_s0 + $0x340] sm:$0xff] }
 0x107   :  { %9148 = vst [vmem:[#allocation43_spill] sm:$0xff] %v6940_v49 }
 0x108   :  { %v1559_v1 = vpop.f32.mrf.mxu2  ;;  %2160 = vmatpush.bf16.msrb.mxu3 %v4629_v26 }
 0x109   :  { %v1560_v13 = vadd.f32 %v1559_v1, %v1511_v24  ;;  %v1464_v37 = vpop.f32.mrf.mxu0  ;;  %v4500_v24 = vld [vmem:[%s9017_s1 + $0xe8] sm:$0xf] }
 0x10a   :  { %v1465_v15 = vadd.f32 %v1464_v37, %v6575_v32 }
 0x10b   :  { %v1608_v33 = vpop.f32.mrf.mxu3  ;;  %v1513_v50 = vpop.f32.mrf.mxu1 }
 0x10c   :  { %v6945_v48 = vadd.f32 %v1608_v33, %v1560_v13  ;;  %v1514_v39 = vadd.f32 %v1513_v50, %v1465_v15  ;;  %1659 = vmatmul.bf16.gmra.mxu0 %v6938_v8  ;;  %v5638_v50 = vld [vmem:[%s9017_s1 + $0x5e4] sm:$0xf]  ;;  %v4501_v15 = vor.u32 %v5481_v51, %v4500_v24 }
 0x10d   :  { %5168 = vmatmul.msk.bf16.gmra.mxu2 %vm1400_vm0, %v6942_v45  ;;  %v5137_v54 = vor.u32 %v5638_v50, %v5134_v47  ;;  %v148_v45 = vld [vmem:[%s9016_s0 + $0x330] sm:$0xff]  ;;  %v155_v50 = vld [vmem:[%s9016_s0 + $0x368] sm:$0xff] }
 0x10e   :  { %1708 = vmatmul.bf16.gmra.mxu1 %v6940_v49  ;;  %2111 = vmatpush.bf16.msrb.mxu2 %v4501_v15  ;;  %v5642_v15 = vld [vmem:[%s9017_s1 + $0x604] sm:$0xf]  ;;  %v5150_v47 = vld [vmem:[%s9017_s1 + $0x610] sm:$0xf0] }
 0x10f   :  { %2013 = vmatpush.bf16.msrb.mxu0 %v5137_v54  ;;  %v5153_v54 = vor.u32 %v5642_v15, %v5150_v47  ;;  %v4612_v15 = vld [vmem:[%s9017_s1 + $0x1c8] sm:$0xf]  ;;  %v5509_v47 = vld [vmem:[%s9017_s1 + $0x1d4] sm:$0xf0] }
 0x110   :  { %1806 = vmatmul.bf16.gmra.mxu3 %v6467_v16  ;;  %v1562_v7 = vpop.f32.mrf.mxu2 }
 0x111   :  { %v1563_v1 = vadd.f32 %v1562_v7, %v1514_v39  ;;  %v1466_v33 = vpop.f32.mrf.mxu0  ;;  %v149_v39 = vld [vmem:[%s9016_s0 + $0x338] sm:$0xff]  ;;  %2069 = vmatpush.bf16.msrb.mxu1 %v5153_v54 }
 0x112   :  { %v1467_v37 = vadd.f32 %v1466_v33, %v6575_v32  ;;  %v157_v7 = vld [vmem:[%s9016_s0 + $0x378] sm:$0xff] }
 0x113   :  { %v1611_v13 = vpop.f32.mrf.mxu3  ;;  %v1515_v24 = vpop.f32.mrf.mxu1  ;;  %v7001_v49 = vpack.c.bf16 %v157_v7, %v150_v5 }
 0x114   :  { %v6971_v51 = vadd.f32 %v1611_v13, %v1563_v1  ;;  %v1516_v16 = vadd.f32 %v1515_v24, %v1467_v37  ;;  %v6997_v1 = vpack.c.bf16 %v155_v50, %v148_v45  ;;  %v6999_v24 = vpack.c.bf16 %v156_v0, %v149_v39  ;;  %v5477_v45 = vld [vmem:[%s9017_s1 + $0xd4] sm:$0xf0]  ;;  %v5118_v39 = vld [vmem:[%s9017_s1 + $0x5d0] sm:$0xf0] }
 0x115   :  { %9152 = vst [vmem:[#allocation47_spill] sm:$0xff] %v7001_v49 }
 0x116   :  { %9150 = vst [vmem:[#allocation45_spill] sm:$0xff] %v6997_v1 }
 0x117   :  { %9151 = vst [vmem:[#allocation46_spill] sm:$0xff] %v6999_v24 }
 0x118   :  { %v1564_v26 = vpop.f32.mrf.mxu2 }
 0x119   :  { %v1565_v13 = vadd.f32 %v1564_v26, %v1516_v16  ;;  %v1469_v37 = vpop.f32.mrf.mxu0  ;;  %v4484_v16 = vld [vmem:[%s9017_s1 + $0xc8] sm:$0xf]  ;;  %v4613_v26 = vor.u32 %v5509_v47, %v4612_v15 }
 0x11a   :  { %v1470_v38 = vadd.f32 %v1469_v37, %v6575_v32  ;;  %v4485_v50 = vor.u32 %v5477_v45, %v4484_v16 }
 0x11b   :  { %v1613_v33 = vpop.f32.mrf.mxu3  ;;  %v1518_v63 = vpop.f32.mrf.mxu1  ;;  %2161 = vmatpush.bf16.msrb.mxu3 %v4613_v26 }
 0x11c   :  { %v7004_v62 = vadd.f32 %v1613_v33, %v1565_v13  ;;  %v1519_v61 = vadd.f32 %v1518_v63, %v1470_v38  ;;  %1664 = vmatmul.bf16.gmra.mxu0 %v6997_v1  ;;  %v5634_v63 = vld [vmem:[%s9017_s1 + $0x5c4] sm:$0xf]  ;;  %2112 = vmatpush.bf16.msrb.mxu2 %v4485_v50  ;;  %v5505_v50 = vld [vmem:[%s9017_s1 + $0x1b4] sm:$0xf0] }
 0x11d   :  { %5169 = vmatmul.msk.bf16.gmra.mxu2 %vm1400_vm0, %v7001_v49  ;;  %v5121_v54 = vor.u32 %v5634_v63, %v5118_v39 }
 0x11e   :  { %1713 = vmatmul.bf16.gmra.mxu1 %v6999_v24 }
 0x11f   :  { %2014 = vmatpush.bf16.msrb.mxu0 %v5121_v54 }
 0x120   :  { %1811 = vmatmul.bf16.gmra.mxu3 %v6527_v60  ;;  %v1567_v38 = vpop.f32.mrf.mxu2 }
 0x121   :  { %v1568_v0 = vadd.f32 %v1567_v38, %v1519_v61  ;;  %v1471_v7 = vpop.f32.mrf.mxu0 }
 0x122   :  { %v1472_v13 = vadd.f32 %v1471_v7, %v6575_v32  ;;  %v4468_v32 = vld [vmem:[%s9017_s1 + $0xa8] sm:$0xf] }
 0x123   :  { %v1616_v5 = vpop.f32.mrf.mxu3  ;;  %v1520_v33 = vpop.f32.mrf.mxu1 }
 0x124   :  { %v7030_v37 = vadd.f32 %v1616_v5, %v1568_v0  ;;  %v1521_v16 = vadd.f32 %v1520_v33, %v1472_v13 }
 0x128   :  { %v1569_v45 = vpop.f32.mrf.mxu2 }
 0x129   :  { %v1570_v60 = vadd.f32 %v1569_v45, %v1521_v16  ;;  %v1630_v24 = vpop.f32.mrf.mxu0 }
 0x12a   :  { %v1631_v1 = vadd.f32 %v1630_v24, %v6617_v14  ;;  %v5473_v14 = vld [vmem:[%s9017_s1 + $0xb4] sm:$0xf0]  ;;  %v4596_v24 = vld [vmem:[%s9017_s1 + $0x1a8] sm:$0xf] }
 0x12b   :  { %v1618_v49 = vpop.f32.mrf.mxu3  ;;  %v1679_v61 = vpop.f32.mrf.mxu1  ;;  %v4597_v47 = vor.u32 %v5505_v50, %v4596_v24  ;;  %v5626_v50 = vld [vmem:[%s9017_s1 + $0x584] sm:$0xf] }
 0x12c   :  { %v7033_v38 = vadd.f32 %v1618_v49, %v1570_v60  ;;  %v1680_v63 = vadd.f32 %v1679_v61, %v1631_v1  ;;  %1825 = vmatmul.bf16.vlgmr.msra.gmra.mxu0 %v6127_v52  ;;  %v5630_v60 = vld [vmem:[%s9017_s1 + $0x5a4] sm:$0xf]  ;;  %v4469_v49 = vor.u32 %v5473_v14, %v4468_v32  ;;  %v5102_v1 = vld [vmem:[%s9017_s1 + $0x5b0] sm:$0xf0] }
 0x12d   :  { %1923 = vmatmul.bf16.vlgmr.msra.gmra.mxu2 %v6137_v56  ;;  %v5105_v15 = vor.u32 %v5630_v60, %v5102_v1  ;;  %2162 = vmatpush.bf16.msrb.mxu3 %v4597_v47  ;;  %v5086_v47 = vld [vmem:[%s9017_s1 + $0x590] sm:$0xf0] }
 0x12e   :  { %1874 = vmatmul.bf16.vlgmr.msra.gmra.mxu1 %v6129_v53  ;;  %2113 = vmatpush.bf16.msrb.mxu2 %v4469_v49 }
 0x12f   :  { %2015 = vmatpush.bf16.msrb.mxu0 %v5105_v15 }
 0x130   :  { %1972 = vmatmul.bf16.vlgmr.msra.gmra.mxu3 %v6586_v36  ;;  %v1728_v39 = vpop.f32.mrf.mxu2 }
 0x131   :  { %v1729_v0 = vadd.f32 %v1728_v39, %v1680_v63  ;;  %v1632_v7 = vpop.f32.mrf.mxu0 }
 0x132   :  { %v1633_v54 = vadd.f32 %v1632_v7, %v6650_v6  ;;  %v4452_v6 = vld [vmem:[%s9017_s1 + $0x88] sm:$0xf]  ;;  %v5501_v7 = vld [vmem:[%s9017_s1 + $0x194] sm:$0xf0] }
 0x133   :  { %v7057_v5 = vpop.f32.mrf.mxu3  ;;  %v1681_v26 = vpop.f32.mrf.mxu1  ;;  %v2797_v16 = vmul.f32 0.2, %v1729_v0 }
 0x134   :  { %v1682_v13 = vadd.f32 %v1681_v26, %v1633_v54  ;;  %v5089_v26 = vor.u32 %v5626_v50, %v5086_v47 }
 0x135   :  { %v2861_v49 = vmax.f32 %v1729_v0, %v2797_v16  ;;  %v4580_v0 = vld [vmem:[%s9017_s1 + $0x188] sm:$0xf] }
 0x136   :  { %2016 = vmatpush.bf16.msrb.mxu0 %v5089_v26 }
 0x138   :  { %v1730_v33 = vpop.f32.mrf.mxu2 }
 0x139   :  { %v1731_v45 = vadd.f32 %v1730_v33, %v1682_v13  ;;  %v1635_v32 = vpop.f32.mrf.mxu0  ;;  %v4581_v13 = vor.u32 %v5501_v7, %v4580_v0 }
 0x13a   :  { %v1636_v14 = vadd.f32 %v1635_v32, %v6676_v44  ;;  %v5469_v44 = vld [vmem:[%s9017_s1 + $0x94] sm:$0xf0] }
 0x13b   :  { %v7060_v61 = vpop.f32.mrf.mxu3  ;;  %v1684_v60 = vpop.f32.mrf.mxu1  ;;  %v2801_v63 = vmul.f32 0.2, %v1731_v45  ;;  %v4453_v15 = vor.u32 %v5469_v44, %v4452_v6  ;;  %2163 = vmatpush.bf16.msrb.mxu3 %v4581_v13  ;;  %v5070_v13 = vld [vmem:[%s9017_s1 + $0x570] sm:$0xf0] }
 0x13c   :  { %v1685_v1 = vadd.f32 %v1684_v60, %v1636_v14  ;;  %1830 = vmatmul.bf16.gmra.mxu0 %v6199_v20 }
 0x13d   :  { %v2865_v24 = vmax.f32 %v1731_v45, %v2801_v63  ;;  %1928 = vmatmul.bf16.gmra.mxu2 %v6203_v22 }
 0x13e   :  { %1879 = vmatmul.bf16.gmra.mxu1 %v6201_v21  ;;  %2114 = vmatpush.bf16.msrb.mxu2 %v4453_v15 }
 0x13f   :  { %v7076_v39 = vpack.c.bf16 %v2865_v24, %v2861_v49 }
 0x140   :  { %1977 = vmatmul.bf16.gmra.mxu3 %v6643_v46  ;;  %v1733_v54 = vpop.f32.mrf.mxu2 }
 0x141   :  { %9153 = vst [vmem:[#allocation48_spill] sm:$0xff] %v7076_v39  ;;  %v1734_v33 = vadd.f32 %v1733_v54, %v1685_v1  ;;  %v1637_v45 = vpop.f32.mrf.mxu0  ;;  %v5622_v54 = vld [vmem:[%s9017_s1 + $0x564] sm:$0xf] }
 0x142   :  { %v1638_v32 = vadd.f32 %v1637_v45, %v6709_v34  ;;  %v4436_v34 = vld [vmem:[%s9017_s1 + $0x68] sm:$0xf]  ;;  %v5497_v45 = vld [vmem:[%s9017_s1 + $0x174] sm:$0xf0] }
 0x143   :  { %v7087_v16 = vpop.f32.mrf.mxu3  ;;  %v1686_v14 = vpop.f32.mrf.mxu1  ;;  %v2805_v49 = vmul.f32 0.2, %v1734_v33 }
 0x144   :  { %v1687_v60 = vadd.f32 %v1686_v14, %v1638_v32 }
 0x145   :  { %v2869_v15 = vmax.f32 %v1734_v33, %v2805_v49  ;;  %v4564_v33 = vld [vmem:[%s9017_s1 + $0x168] sm:$0xf] }
 0x148   :  { %v1735_v63 = vpop.f32.mrf.mxu2 }
 0x149   :  { %v1736_v24 = vadd.f32 %v1735_v63, %v1687_v60  ;;  %v1640_v44 = vpop.f32.mrf.mxu0  ;;  %v5073_v60 = vor.u32 %v5622_v54, %v5070_v13  ;;  %v4565_v63 = vor.u32 %v5497_v45, %v4564_v33  ;;  %v5618_v45 = vld [vmem:[%s9017_s1 + $0x544] sm:$0xf] }
 0x14a   :  { %v1641_v50 = vadd.f32 %v1640_v44, %v6735_v31  ;;  %v5465_v31 = vld [vmem:[%s9017_s1 + $0x74] sm:$0xf0] }
 0x14b   :  { %v7090_v6 = vpop.f32.mrf.mxu3  ;;  %v1689_v47 = vpop.f32.mrf.mxu1  ;;  %v2809_v1 = vmul.f32 0.2, %v1736_v24  ;;  %v4437_v26 = vor.u32 %v5465_v31, %v4436_v34  ;;  %2017 = vmatpush.bf16.msrb.mxu0 %v5073_v60  ;;  %2164 = vmatpush.bf16.msrb.mxu3 %v4565_v63  ;;  %v4548_v60 = vld [vmem:[%s9017_s1 + $0x148] sm:$0xf]  ;;  %v5493_v63 = vld [vmem:[%s9017_s1 + $0x154] sm:$0xf0] }
 0x14c   :  { %v1690_v0 = vadd.f32 %v1689_v47, %v1641_v50  ;;  %1835 = vmatmul.bf16.gmra.mxu0 %v6253_v41 }
 0x14d   :  { %v2873_v7 = vmax.f32 %v1736_v24, %v2809_v1  ;;  %1933 = vmatmul.bf16.gmra.mxu2 %v6257_v43 }
 0x14e   :  { %1884 = vmatmul.bf16.gmra.mxu1 %v6255_v42  ;;  %2115 = vmatpush.bf16.msrb.mxu2 %v4437_v26 }
 0x14f   :  { %v7115_v32 = vpack.c.bf16 %v2873_v7, %v2869_v15 }
 0x150   :  { %1982 = vmatmul.bf16.gmra.mxu3 %v6702_v12  ;;  %v1738_v14 = vpop.f32.mrf.mxu2 }
 0x151   :  { %9154 = vst [vmem:[#allocation49_spill] sm:$0xff] %v7115_v32  ;;  %v1739_v49 = vadd.f32 %v1738_v14, %v1690_v0  ;;  %v1642_v44 = vpop.f32.mrf.mxu0 }
 0x152   :  { %v1643_v50 = vadd.f32 %v1642_v44, %v6768_v40  ;;  %v4420_v40 = vld [vmem:[%s9017_s1 + $0x48] sm:$0xf] }
 0x153   :  { %v7117_v24 = vpop.f32.mrf.mxu3  ;;  %v1691_v47 = vpop.f32.mrf.mxu1  ;;  %v2813_v31 = vmul.f32 0.2, %v1739_v49 }
 0x154   :  { %v1692_v1 = vadd.f32 %v1691_v47, %v1643_v50  ;;  %v4549_v47 = vor.u32 %v5493_v63, %v4548_v60  ;;  %v5614_v63 = vld [vmem:[%s9017_s1 + $0x524] sm:$0xf] }
 0x155   :  { %v2877_v26 = vmax.f32 %v1739_v49, %v2813_v31 }
 0x156   :  { %2165 = vmatpush.bf16.msrb.mxu3 %v4549_v47  ;;  %v4532_v47 = vld [vmem:[%s9017_s1 + $0x128] sm:$0xf] }
 0x158   :  { %v1740_v34 = vpop.f32.mrf.mxu2 }
 0x159   :  { %v1741_v39 = vadd.f32 %v1740_v34, %v1692_v1  ;;  %v1645_v15 = vpop.f32.mrf.mxu0 }
 0x15a   :  { %v1646_v7 = vadd.f32 %v1645_v15, %v6794_v35  ;;  %v5461_v35 = vld [vmem:[%s9017_s1 + $0x54] sm:$0xf0] }
 0x15b   :  { %v7120_v12 = vpop.f32.mrf.mxu3  ;;  %v1694_v54 = vpop.f32.mrf.mxu1  ;;  %v2817_v0 = vmul.f32 0.2, %v1741_v39  ;;  %v4421_v14 = vor.u32 %v5461_v35, %v4420_v40 }
 0x15c   :  { %v1695_v13 = vadd.f32 %v1694_v54, %v1646_v7  ;;  %1840 = vmatmul.bf16.gmra.mxu0 %v6307_v2 }
 0x15d   :  { %v2881_v33 = vmax.f32 %v1741_v39, %v2817_v0  ;;  %1938 = vmatmul.bf16.gmra.mxu2 %v6311_v4  ;;  %v5054_v39 = vld [vmem:[%s9017_s1 + $0x550] sm:$0xf0] }
 0x15e   :  { %1889 = vmatmul.bf16.gmra.mxu1 %v6309_v3  ;;  %v5057_v50 = vor.u32 %v5618_v45, %v5054_v39  ;;  %2116 = vmatpush.bf16.msrb.mxu2 %v4421_v14 }
 0x15f   :  { %v7145_v49 = vpack.c.bf16 %v2881_v33, %v2877_v26 }
 0x160   :  { %1987 = vmatmul.bf16.gmra.mxu3 %v6761_v9  ;;  %v1743_v44 = vpop.f32.mrf.mxu2  ;;  %2018 = vmatpush.bf16.msrb.mxu0 %v5057_v50  ;;  %v5038_v50 = vld [vmem:[%s9017_s1 + $0x530] sm:$0xf0] }
 0x161   :  { %9155 = vst [vmem:[#allocation50_spill] sm:$0xff] %v7145_v49  ;;  %v1744_v1 = vadd.f32 %v1743_v44, %v1695_v13  ;;  %v1647_v31 = vpop.f32.mrf.mxu0 }
 0x162   :  { %v1648_v15 = vadd.f32 %v1647_v31, %v6827_v25  ;;  %v4404_v25 = vld [vmem:[%s9017_s1 + $0x28] sm:$0xf] }
 0x163   :  { %v7147_v34 = vpop.f32.mrf.mxu3  ;;  %v1696_v7 = vpop.f32.mrf.mxu1  ;;  %v2821_v40 = vmul.f32 0.2, %v1744_v1 }
 0x164   :  { %v1697_v54 = vadd.f32 %v1696_v7, %v1648_v15  ;;  %v5041_v7 = vor.u32 %v5614_v63, %v5038_v50 }
 0x165   :  { %v2885_v14 = vmax.f32 %v1744_v1, %v2821_v40  ;;  %v5489_v1 = vld [vmem:[%s9017_s1 + $0x134] sm:$0xf0] }
 0x166   :  { %2019 = vmatpush.bf16.msrb.mxu0 %v5041_v7  ;;  %v5022_v7 = vld [vmem:[%s9017_s1 + $0x510] sm:$0xf0] }
 0x168   :  { %v1745_v0 = vpop.f32.mrf.mxu2 }
 0x169   :  { %v1746_v35 = vadd.f32 %v1745_v0, %v1697_v54  ;;  %v1650_v26 = vpop.f32.mrf.mxu0  ;;  %v4533_v54 = vor.u32 %v5489_v1, %v4532_v47  ;;  %v5610_v1 = vld [vmem:[%s9017_s1 + $0x504] sm:$0xf] }
 0x16a   :  { %v1651_v33 = vadd.f32 %v1650_v26, %v6853_v30  ;;  %v5457_v30 = vld [vmem:[%s9017_s1 + $0x34] sm:$0xf0] }
 0x16b   :  { %v7150_v32 = vpop.f32.mrf.mxu3  ;;  %v1699_v45 = vpop.f32.mrf.mxu1  ;;  %v2825_v13 = vmul.f32 0.2, %v1746_v35  ;;  %v4405_v44 = vor.u32 %v5457_v30, %v4404_v25  ;;  %2166 = vmatpush.bf16.msrb.mxu3 %v4533_v54  ;;  %v4516_v54 = vld [vmem:[%s9017_s1 + $0x108] sm:$0xf] }
 0x16c   :  { %v1700_v39 = vadd.f32 %v1699_v45, %v1651_v33  ;;  %1845 = vmatmul.bf16.gmra.mxu0 %v6361_v27 }
 0x16d   :  { %v2889_v60 = vmax.f32 %v1746_v35, %v2825_v13  ;;  %1943 = vmatmul.bf16.gmra.mxu2 %v6365_v29 }
 0x16e   :  { %1894 = vmatmul.bf16.gmra.mxu1 %v6363_v28  ;;  %2117 = vmatpush.bf16.msrb.mxu2 %v4405_v44 }
 0x16f   :  { %v7175_v31 = vpack.c.bf16 %v2889_v60, %v2885_v14 }
 0x170   :  { %1992 = vmatmul.bf16.gmra.mxu3 %v6820_v11  ;;  %v1748_v15 = vpop.f32.mrf.mxu2 }
 0x171   :  { %9156 = vst [vmem:[#allocation51_spill] sm:$0xff] %v7175_v31  ;;  %v1749_v0 = vadd.f32 %v1748_v15, %v1700_v39  ;;  %v1652_v35 = vpop.f32.mrf.mxu0 }
 0x172   :  { %v1653_v26 = vadd.f32 %v1652_v35, %v6886_v59  ;;  %v4388_v59 = vld [vmem:[%s9017_s1 + $0x8] sm:$0xf] }
 0x173   :  { %v7177_v40 = vpop.f32.mrf.mxu3  ;;  %v1701_v33 = vpop.f32.mrf.mxu1  ;;  %v2829_v25 = vmul.f32 0.2, %v1749_v0 }
 0x174   :  { %v1702_v45 = vadd.f32 %v1701_v33, %v1653_v26  ;;  %v5025_v33 = vor.u32 %v5610_v1, %v5022_v7 }
 0x175   :  { %v2893_v44 = vmax.f32 %v1749_v0, %v2829_v25  ;;  %v5485_v0 = vld [vmem:[%s9017_s1 + $0x114] sm:$0xf0] }
 0x176   :  { %2020 = vmatpush.bf16.msrb.mxu0 %v5025_v33  ;;  %v5545_v33 = vld [vmem:[%s9017_s1 + $0x2f4] sm:$0xf0] }
 0x178   :  { %v1750_v13 = vpop.f32.mrf.mxu2 }
 0x179   :  { %v1751_v30 = vadd.f32 %v1750_v13, %v1702_v45  ;;  %v1655_v14 = vpop.f32.mrf.mxu0  ;;  %v4517_v45 = vor.u32 %v5485_v0, %v4516_v54  ;;  %v4756_v0 = vld [vmem:[%s9017_s1 + $0x2e8] sm:$0xf] }
 0x17a   :  { %v1656_v60 = vadd.f32 %v1655_v14, %v6912_v19  ;;  %v5453_v19 = vld [vmem:[%s9017_s1 + $0x14] sm:$0xf0] }
 0x17b   :  { %v7180_v49 = vpop.f32.mrf.mxu3  ;;  %v1704_v63 = vpop.f32.mrf.mxu1  ;;  %v2833_v39 = vmul.f32 0.2, %v1751_v30  ;;  %v4389_v15 = vor.u32 %v5453_v19, %v4388_v59  ;;  %2167 = vmatpush.bf16.msrb.mxu3 %v4517_v45  ;;  %v5140_v45 = vld [vmem:[%s9017_s1 + $0x5e8] sm:$0xf] }
 0x17c   :  { %v1705_v50 = vadd.f32 %v1704_v63, %v1656_v60  ;;  %1850 = vmatmul.bf16.gmra.mxu0 %v6415_v55 }
 0x17d   :  { %v2897_v47 = vmax.f32 %v1751_v30, %v2833_v39  ;;  %1948 = vmatmul.bf16.gmra.mxu2 %v6419_v58 }
 0x17e   :  { %1899 = vmatmul.bf16.gmra.mxu1 %v6417_v57  ;;  %2118 = vmatpush.bf16.msrb.mxu2 %v4389_v15 }
 0x17f   :  { %v7205_v35 = vpack.c.bf16 %v2897_v47, %v2893_v44 }
 0x180   :  { %1997 = vmatmul.bf16.gmra.mxu3 %v6879_v10  ;;  %v1753_v26 = vpop.f32.mrf.mxu2 }
 0x181   :  { %9157 = vst [vmem:[#allocation52_spill] sm:$0xff] %v7205_v35  ;;  %v1754_v13 = vadd.f32 %v1753_v26, %v1705_v50  ;;  %v1657_v30 = vpop.f32.mrf.mxu0  ;;  %v4868_v35 = vld [vmem:[%s9017_s1 + $0x3c8] sm:$0xf] }
 0x182   :  { %v1658_v14 = vadd.f32 %v1657_v30, %v6945_v48  ;;  %v5012_v48 = vld [vmem:[%s9017_s1 + $0x4e8] sm:$0xf] }
 0x183   :  { %v7207_v25 = vpop.f32.mrf.mxu3  ;;  %v1706_v60 = vpop.f32.mrf.mxu1  ;;  %v2837_v59 = vmul.f32 0.2, %v1754_v13 }
 0x184   :  { %v1707_v63 = vadd.f32 %v1706_v60, %v1658_v14  ;;  %v4757_v60 = vor.u32 %v5545_v33, %v4756_v0 }
 0x185   :  { %v2901_v15 = vmax.f32 %v1754_v13, %v2837_v59  ;;  %v5641_v13 = vld [vmem:[%s9017_s1 + $0x5f4] sm:$0xf0] }
 0x186   :  { %2209 = vmatpush.bf16.msra.mxu0 %v4757_v60 }
 0x188   :  { %v1755_v39 = vpop.f32.mrf.mxu2 }
 0x189   :  { %v1756_v19 = vadd.f32 %v1755_v39, %v1707_v63  ;;  %v1660_v44 = vpop.f32.mrf.mxu0  ;;  %v5141_v63 = vor.u32 %v5641_v13, %v5140_v45 }
 0x18a   :  { %v1661_v47 = vadd.f32 %v1660_v44, %v6971_v51  ;;  %v5609_v51 = vld [vmem:[%s9017_s1 + $0x4f4] sm:$0xf0] }
 0x18b   :  { %v7210_v31 = vpop.f32.mrf.mxu3  ;;  %v1709_v1 = vpop.f32.mrf.mxu1  ;;  %v2841_v50 = vmul.f32 0.2, %v1756_v19  ;;  %v5013_v26 = vor.u32 %v5609_v51, %v5012_v48  ;;  %2356 = vmatpush.bf16.msra.mxu3 %v5141_v63 }
 0x18c   :  { %v1710_v7 = vadd.f32 %v1709_v1, %v1661_v47  ;;  %1855 = vmatmul.bf16.gmra.mxu0 %v6469_v17  ;;  %v4884_v1 = vld [vmem:[%s9017_s1 + $0x3e8] sm:$0xf] }
 0x18d   :  { %v2905_v54 = vmax.f32 %v1756_v19, %v2841_v50  ;;  %1953 = vmatmul.bf16.gmra.mxu2 %v6473_v23  ;;  %v5577_v50 = vld [vmem:[%s9017_s1 + $0x3f4] sm:$0xf0] }
 0x18e   :  { %1904 = vmatmul.bf16.gmra.mxu1 %v6471_v18  ;;  %2307 = vmatpush.bf16.msra.mxu2 %v5013_v26 }
 0x18f   :  { %v7235_v30 = vpack.c.bf16 %v2905_v54, %v2901_v15  ;;  %v4885_v54 = vor.u32 %v5577_v50, %v4884_v1  ;;  %v4996_v1 = vld [vmem:[%s9017_s1 + $0x4c8] sm:$0xf] }
 0x190   :  { %2002 = vmatmul.bf16.gmra.mxu3 %v6938_v8  ;;  %v1758_v14 = vpop.f32.mrf.mxu2  ;;  %v4740_v50 = vld [vmem:[%s9017_s1 + $0x2c8] sm:$0xf] }
 0x191   :  { %9158 = vst [vmem:[#allocation53_spill] sm:$0xff] %v7235_v30  ;;  %v1759_v39 = vadd.f32 %v1758_v14, %v1710_v7  ;;  %v1662_v19 = vpop.f32.mrf.mxu0  ;;  %2258 = vmatpush.bf16.msra.mxu1 %v4885_v54  ;;  %v9159_v14 = vld [vmem:[#allocation25_spill] sm:$0xff] }
 0x192   :  { %v1663_v44 = vadd.f32 %v1662_v19, %v7004_v62  ;;  %v9160_v19 = vld [vmem:[#allocation26_spill] sm:$0xff] }
 0x193   :  { %v7237_v59 = vpop.f32.mrf.mxu3  ;;  %v1711_v47 = vpop.f32.mrf.mxu1  ;;  %v2845_v48 = vmul.f32 0.2, %v1759_v39  ;;  %v5124_v54 = vld [vmem:[%s9017_s1 + $0x5c8] sm:$0xf] }
 0x194   :  { %v1712_v15 = vadd.f32 %v1711_v47, %v1663_v44  ;;  %v9161_v44 = vld [vmem:[#allocation27_spill] sm:$0xff]  ;;  %v9162_v47 = vld [vmem:[#allocation45_spill] sm:$0xff] }
 0x195   :  { %v2909_v60 = vmax.f32 %v1759_v39, %v2845_v48 }
 0x198   :  { %v1760_v7 = vpop.f32.mrf.mxu2 }
 0x199   :  { %v1761_v51 = vadd.f32 %v1760_v7, %v1712_v15  ;;  %v1665_v62 = vpop.f32.mrf.mxu0  ;;  %v5541_v15 = vld [vmem:[%s9017_s1 + $0x2d4] sm:$0xf0] }
 0x19a   :  { %v1666_v26 = vadd.f32 %v1665_v62, %v7030_v37  ;;  %v5605_v37 = vld [vmem:[%s9017_s1 + $0x4d4] sm:$0xf0]  ;;  %v4741_v62 = vor.u32 %v5541_v15, %v4740_v50 }
 0x19b   :  { %v7246_v0 = vpop.f32.mrf.mxu3  ;;  %v1714_v33 = vpop.f32.mrf.mxu1  ;;  %v2849_v45 = vmul.f32 0.2, %v1761_v51  ;;  %v4997_v39 = vor.u32 %v5605_v37, %v4996_v1  ;;  %v5637_v7 = vld [vmem:[%s9017_s1 + $0x5d4] sm:$0xf0] }
 0x19c   :  { %v1715_v13 = vadd.f32 %v1714_v33, %v1666_v26  ;;  %1860 = vmatmul.bf16.gmra.mxu0 %v9159_v14  ;;  %v5125_v26 = vor.u32 %v5637_v7, %v5124_v54 }
 0x19d   :  { %v2913_v63 = vmax.f32 %v1761_v51, %v2849_v45  ;;  %1958 = vmatmul.bf16.gmra.mxu2 %v9161_v44  ;;  %2210 = vmatpush.bf16.msra.mxu0 %v4741_v62  ;;  %v9164_v44 = vld [vmem:[#allocation29_spill] sm:$0xff] }
 0x19e   :  { %1909 = vmatmul.bf16.gmra.mxu1 %v9160_v19  ;;  %2308 = vmatpush.bf16.msra.mxu2 %v4997_v39 }
 0x19f   :  { %v7271_v48 = vpack.c.bf16 %v2913_v63, %v2909_v60  ;;  %2357 = vmatpush.bf16.msra.mxu3 %v5125_v26  ;;  %v5573_v60 = vld [vmem:[%s9017_s1 + $0x3d4] sm:$0xf0] }
 0x1a0   :  { %2007 = vmatmul.bf16.gmra.mxu3 %v9162_v47  ;;  %v1763_v51 = vpop.f32.mrf.mxu2  ;;  %v4869_v50 = vor.u32 %v5573_v60, %v4868_v35  ;;  %v9166_v35 = vld [vmem:[#allocation9_spill] sm:$0xff]  ;;  %v5537_v60 = vld [vmem:[%s9017_s1 + $0x2b4] sm:$0xf0] }
 0x1a1   :  { %9163 = vst [vmem:[#allocation54_spill] sm:$0xff] %v7271_v48  ;;  %v1764_v33 = vadd.f32 %v1763_v51, %v1715_v13  ;;  %v1667_v1 = vpop.f32.mrf.mxu0  ;;  %v7285_v13 = vld [vmem:[%s9018_s2] sm:$0xf] }
 0x1a2   :  { %v1668_v37 = vadd.f32 %v1667_v1, %v7033_v38  ;;  %v7288_v63 = vperm.slane %v7285_v13, 1  ;;  %2259 = vmatpush.bf16.msra.mxu1 %v4869_v50  ;;  %v5633_v50 = vld [vmem:[%s9017_s1 + $0x5b4] sm:$0xf0] }
 0x1a3   :  { %v7273_v45 = vpop.f32.mrf.mxu3  ;;  %v1716_v30 = vpop.f32.mrf.mxu1  ;;  %v2853_v54 = vmul.f32 0.2, %v1764_v33 }
 0x1a4   :  { %v1717_v38 = vadd.f32 %v1716_v30, %v1668_v37  ;;  %v1778_v39 = vadd.f32 %v7057_v5, %v7288_v63  ;;  %v9165_v30 = vld [vmem:[#allocation30_spill] sm:$0xff]  ;;  %v5601_v37 = vld [vmem:[%s9017_s1 + $0x4b4] sm:$0xf0] }
 0x1a5   :  { %v2917_v19 = vmax.f32 %v1764_v33, %v2853_v54  ;;  %v4980_v5 = vld [vmem:[%s9017_s1 + $0x4a8] sm:$0xf] }
 0x1a6   :  { %v4724_v33 = vld [vmem:[%s9017_s1 + $0x2a8] sm:$0xf] }
 0x1a8   :  { %v1765_v15 = vpop.f32.mrf.mxu2 }
 0x1a9   :  { %v1766_v7 = vadd.f32 %v1765_v15, %v1717_v38  ;;  %v1826_v62 = vpop.f32.mrf.mxu0  ;;  %v5108_v38 = vld [vmem:[%s9017_s1 + $0x5a8] sm:$0xf]  ;;  %v1780_v15 = vadd.f32 %v7060_v61, %v7288_v63  ;;  %v5569_v61 = vld [vmem:[%s9017_s1 + $0x3b4] sm:$0xf0] }
 0x1aa   :  { %v1827_v26 = vadd.f32 %v1826_v62, %v1778_v39  ;;  %v5109_v62 = vor.u32 %v5633_v50, %v5108_v38 }
 0x1ab   :  { %v7292_v51 = vpop.f32.mrf.mxu3  ;;  %v1875_v1 = vpop.f32.mrf.mxu1  ;;  %v2857_v48 = vmul.f32 0.2, %v1766_v7 }
 0x1ac   :  { %v1876_v47 = vadd.f32 %v1875_v1, %v1827_v26  ;;  %2021 = vmatmul.bf16.vlgmr.msrb.gmra.mxu0 %v9164_v44  ;;  %2358 = vmatpush.bf16.msra.mxu3 %v5109_v62 }
 0x1ad   :  { %v2921_v8 = vmax.f32 %v1766_v7, %v2857_v48  ;;  %2119 = vmatmul.bf16.vlgmr.msrb.gmra.mxu2 %v9166_v35  ;;  %v4981_v48 = vor.u32 %v5601_v37, %v4980_v5  ;;  %v4725_v7 = vor.u32 %v5537_v60, %v4724_v33 }
 0x1ae   :  { %5170 = vmatmul.msk.bf16.vlgmr.msrb.gmra.mxu1 %vm1400_vm0, %v9165_v30 }
 0x1af   :  { %v7317_v39 = vpack.c.bf16 %v2921_v8, %v2917_v19  ;;  %2309 = vmatpush.bf16.msra.mxu2 %v4981_v48  ;;  %2211 = vmatpush.bf16.msra.mxu0 %v4725_v7  ;;  %v4852_v8 = vld [vmem:[%s9017_s1 + $0x3a8] sm:$0xf] }
 0x1b0   :  { %2168 = vmatmul.bf16.vlgmr.msrb.gmra.mxu3 %v6127_v52  ;;  %v1924_v54 = vpop.f32.mrf.mxu2  ;;  %v4853_v33 = vor.u32 %v5569_v61, %v4852_v8  ;;  %v5533_v61 = vld [vmem:[%s9017_s1 + $0x294] sm:$0xf0] }
 0x1b1   :  { %9167 = vst [vmem:[#allocation30_spill] sm:$0xff] %v7317_v39  ;;  %v1925_v26 = vadd.f32 %v1924_v54, %v1876_v47  ;;  %v1828_v5 = vpop.f32.mrf.mxu0  ;;  %v1783_v47 = vadd.f32 %v7087_v16, %v7288_v63  ;;  %v4964_v16 = vld [vmem:[%s9017_s1 + $0x488] sm:$0xf] }
 0x1b2   :  { %v1829_v37 = vadd.f32 %v1828_v5, %v1780_v15  ;;  %2260 = vmatpush.bf16.msra.mxu1 %v4853_v33  ;;  %v5597_v5 = vld [vmem:[%s9017_s1 + $0x494] sm:$0xf0] }
 0x1b3   :  { %v1973_v1 = vpop.f32.mrf.mxu3  ;;  %v1877_v52 = vpop.f32.mrf.mxu1  ;;  %v4965_v8 = vor.u32 %v5597_v5, %v4964_v16  ;;  %v5629_v33 = vld [vmem:[%s9017_s1 + $0x594] sm:$0xf0] }
 0x1b4   :  { %v7321_v35 = vadd.f32 %v1973_v1, %v1925_v26  ;;  %v1878_v19 = vadd.f32 %v1877_v52, %v1829_v37  ;;  %v9168_v26 = vld [vmem:[#allocation31_spill] sm:$0xff]  ;;  %v9169_v1 = vld [vmem:[#allocation32_spill] sm:$0xff]  ;;  %v4708_v37 = vld [vmem:[%s9017_s1 + $0x288] sm:$0xf] }
 0x1b5   :  { %v9170_v52 = vld [vmem:[#allocation12_spill] sm:$0xff]  ;;  %2310 = vmatpush.bf16.msra.mxu2 %v4965_v8 }
 0x1b8   :  { %v1926_v48 = vpop.f32.mrf.mxu2 }
 0x1b9   :  { %v1927_v60 = vadd.f32 %v1926_v48, %v1878_v19  ;;  %v1831_v50 = vpop.f32.mrf.mxu0  ;;  %v5092_v19 = vld [vmem:[%s9017_s1 + $0x588] sm:$0xf] }
 0x1ba   :  { %v1832_v15 = vadd.f32 %v1831_v50, %v1783_v47  ;;  %v1785_v47 = vadd.f32 %v7090_v6, %v7288_v63  ;;  %v5565_v6 = vld [vmem:[%s9017_s1 + $0x394] sm:$0xf0] }
 0x1bb   :  { %v1975_v38 = vpop.f32.mrf.mxu3  ;;  %v1880_v54 = vpop.f32.mrf.mxu1 }
 0x1bc   :  { %v7331_v7 = vadd.f32 %v1975_v38, %v1927_v60  ;;  %v1881_v62 = vadd.f32 %v1880_v54, %v1832_v15  ;;  %2026 = vmatmul.bf16.gmra.mxu0 %v9168_v26  ;;  %v4709_v60 = vor.u32 %v5533_v61, %v4708_v37  ;;  %v5093_v38 = vor.u32 %v5629_v33, %v5092_v19 }
 0x1bd   :  { %2124 = vmatmul.bf16.gmra.mxu2 %v9170_v52  ;;  %v9186_v52 = vld [vmem:[#allocation46_spill] sm:$0xff] }
 0x1be   :  { %5171 = vmatmul.msk.bf16.gmra.mxu1 %vm1400_vm0, %v9169_v1  ;;  %2212 = vmatpush.bf16.msra.mxu0 %v4709_v60  ;;  %v9187_v1 = vld [vmem:[#allocation47_spill] sm:$0xff] }
 0x1bf   :  { %2359 = vmatpush.bf16.msra.mxu3 %v5093_v38 }
 0x1c0   :  { %2173 = vmatmul.bf16.gmra.mxu3 %v6199_v20  ;;  %v1929_v48 = vpop.f32.mrf.mxu2  ;;  %v4836_v20 = vld [vmem:[%s9017_s1 + $0x388] sm:$0xf] }
 0x1c1   :  { %v1930_v50 = vadd.f32 %v1929_v48, %v1881_v62  ;;  %v1833_v54 = vpop.f32.mrf.mxu0  ;;  %v4837_v61 = vor.u32 %v5565_v6, %v4836_v20  ;;  %v1788_v62 = vadd.f32 %v7117_v24, %v7288_v63  ;;  %v4948_v20 = vld [vmem:[%s9017_s1 + $0x468] sm:$0xf]  ;;  %v5593_v24 = vld [vmem:[%s9017_s1 + $0x474] sm:$0xf0] }
 0x1c2   :  { %v1834_v16 = vadd.f32 %v1833_v54, %v1785_v47  ;;  %v9172_v54 = vld [vmem:[#allocation35_spill] sm:$0xff]  ;;  %v4949_v6 = vor.u32 %v5593_v24, %v4948_v20 }
 0x1c3   :  { %v1978_v15 = vpop.f32.mrf.mxu3  ;;  %v1882_v5 = vpop.f32.mrf.mxu1  ;;  %2261 = vmatpush.bf16.msra.mxu1 %v4837_v61  ;;  %v5076_v61 = vld [vmem:[%s9017_s1 + $0x568] sm:$0xf] }
 0x1c4   :  { %v7358_v39 = vadd.f32 %v1978_v15, %v1930_v50  ;;  %v1883_v37 = vadd.f32 %v1882_v5, %v1834_v16  ;;  %v9171_v15 = vld [vmem:[#allocation34_spill] sm:$0xff]  ;;  %2311 = vmatpush.bf16.msra.mxu2 %v4949_v6 }
 0x1c5   :  { %v9173_v16 = vld [vmem:[#allocation14_spill] sm:$0xff] }
 0x1c6   :  { %v4692_v5 = vld [vmem:[%s9017_s1 + $0x268] sm:$0xf] }
 0x1c8   :  { %v1931_v8 = vpop.f32.mrf.mxu2 }
 0x1c9   :  { %v1932_v19 = vadd.f32 %v1931_v8, %v1883_v37  ;;  %v1836_v47 = vpop.f32.mrf.mxu0  ;;  %v5529_v37 = vld [vmem:[%s9017_s1 + $0x274] sm:$0xf0]  ;;  %v1790_v8 = vadd.f32 %v7120_v12, %v7288_v63 }
 0x1ca   :  { %v1837_v48 = vadd.f32 %v1836_v47, %v1788_v62  ;;  %v5625_v62 = vld [vmem:[%s9017_s1 + $0x574] sm:$0xf0] }
 0x1cb   :  { %v1980_v33 = vpop.f32.mrf.mxu3  ;;  %v1885_v60 = vpop.f32.mrf.mxu1  ;;  %v5077_v47 = vor.u32 %v5625_v62, %v5076_v61  ;;  %v5561_v12 = vld [vmem:[%s9017_s1 + $0x374] sm:$0xf0] }
 0x1cc   :  { %v7368_v38 = vadd.f32 %v1980_v33, %v1932_v19  ;;  %v1886_v50 = vadd.f32 %v1885_v60, %v1837_v48  ;;  %2031 = vmatmul.bf16.gmra.mxu0 %v9171_v15  ;;  %v4693_v33 = vor.u32 %v5529_v37, %v4692_v5 }
 0x1cd   :  { %2129 = vmatmul.bf16.gmra.mxu2 %v9173_v16  ;;  %2360 = vmatpush.bf16.msra.mxu3 %v5077_v47 }
 0x1ce   :  { %5172 = vmatmul.msk.bf16.gmra.mxu1 %vm1400_vm0, %v9172_v54  ;;  %2213 = vmatpush.bf16.msra.mxu0 %v4693_v33  ;;  %v4820_v54 = vld [vmem:[%s9017_s1 + $0x368] sm:$0xf] }
 0x1cf   :  { %v4821_v37 = vor.u32 %v5561_v12, %v4820_v54  ;;  %v5589_v54 = vld [vmem:[%s9017_s1 + $0x454] sm:$0xf0] }
 0x1d0   :  { %2178 = vmatmul.bf16.gmra.mxu3 %v6253_v41  ;;  %v1934_v19 = vpop.f32.mrf.mxu2 }
 0x1d1   :  { %v1935_v48 = vadd.f32 %v1934_v19, %v1886_v50  ;;  %v1838_v20 = vpop.f32.mrf.mxu0  ;;  %2262 = vmatpush.bf16.msra.mxu1 %v4821_v37  ;;  %v1793_v50 = vadd.f32 %v7147_v34, %v7288_v63  ;;  %v4932_v34 = vld [vmem:[%s9017_s1 + $0x448] sm:$0xf] }
 0x1d2   :  { %v1839_v24 = vadd.f32 %v1838_v20, %v1790_v8  ;;  %v9175_v20 = vld [vmem:[#allocation37_spill] sm:$0xff]  ;;  %v4933_v12 = vor.u32 %v5589_v54, %v4932_v34 }
 0x1d3   :  { %v1983_v60 = vpop.f32.mrf.mxu3  ;;  %v1887_v41 = vpop.f32.mrf.mxu1  ;;  %v5060_v37 = vld [vmem:[%s9017_s1 + $0x548] sm:$0xf] }
 0x1d4   :  { %v7395_v16 = vadd.f32 %v1983_v60, %v1935_v48  ;;  %v1888_v5 = vadd.f32 %v1887_v41, %v1839_v24  ;;  %v9174_v60 = vld [vmem:[#allocation36_spill] sm:$0xff]  ;;  %v4676_v24 = vld [vmem:[%s9017_s1 + $0x248] sm:$0xf]  ;;  %2312 = vmatpush.bf16.msra.mxu2 %v4933_v12 }
 0x1d5   :  { %v9176_v41 = vld [vmem:[#allocation16_spill] sm:$0xff] }
 0x1d8   :  { %v1936_v6 = vpop.f32.mrf.mxu2 }
 0x1d9   :  { %v1937_v61 = vadd.f32 %v1936_v6, %v1888_v5  ;;  %v1841_v8 = vpop.f32.mrf.mxu0  ;;  %v5525_v5 = vld [vmem:[%s9017_s1 + $0x254] sm:$0xf0]  ;;  %v1795_v6 = vadd.f32 %v7150_v32, %v7288_v63 }
 0x1da   :  { %v1842_v19 = vadd.f32 %v1841_v8, %v1793_v50  ;;  %v5621_v50 = vld [vmem:[%s9017_s1 + $0x554] sm:$0xf0] }
 0x1db   :  { %v1985_v62 = vpop.f32.mrf.mxu3  ;;  %v1890_v33 = vpop.f32.mrf.mxu1  ;;  %v5061_v8 = vor.u32 %v5621_v50, %v5060_v37  ;;  %v5557_v32 = vld [vmem:[%s9017_s1 + $0x354] sm:$0xf0] }
 0x1dc   :  { %v7405_v47 = vadd.f32 %v1985_v62, %v1937_v61  ;;  %v1891_v48 = vadd.f32 %v1890_v33, %v1842_v19  ;;  %2036 = vmatmul.bf16.gmra.mxu0 %v9174_v60  ;;  %v4677_v62 = vor.u32 %v5525_v5, %v4676_v24 }
 0x1dd   :  { %2134 = vmatmul.bf16.gmra.mxu2 %v9176_v41  ;;  %2361 = vmatpush.bf16.msra.mxu3 %v5061_v8 }
 0x1de   :  { %5173 = vmatmul.msk.bf16.gmra.mxu1 %vm1400_vm0, %v9175_v20  ;;  %2214 = vmatpush.bf16.msra.mxu0 %v4677_v62  ;;  %v4804_v20 = vld [vmem:[%s9017_s1 + $0x348] sm:$0xf] }
 0x1df   :  { %v4805_v5 = vor.u32 %v5557_v32, %v4804_v20  ;;  %v5585_v20 = vld [vmem:[%s9017_s1 + $0x434] sm:$0xf0] }
 0x1e0   :  { %2183 = vmatmul.bf16.gmra.mxu3 %v6307_v2  ;;  %v1939_v61 = vpop.f32.mrf.mxu2 }
 0x1e1   :  { %v1940_v19 = vadd.f32 %v1939_v61, %v1891_v48  ;;  %v1843_v34 = vpop.f32.mrf.mxu0  ;;  %2263 = vmatpush.bf16.msra.mxu1 %v4805_v5  ;;  %v1798_v48 = vadd.f32 %v7177_v40, %v7288_v63  ;;  %v4916_v40 = vld [vmem:[%s9017_s1 + $0x428] sm:$0xf] }
 0x1e2   :  { %v1844_v54 = vadd.f32 %v1843_v34, %v1795_v6  ;;  %v9178_v34 = vld [vmem:[#allocation39_spill] sm:$0xff]  ;;  %v4917_v32 = vor.u32 %v5585_v20, %v4916_v40  ;;  %v5044_v5 = vld [vmem:[%s9017_s1 + $0x528] sm:$0xf] }
 0x1e3   :  { %v1988_v33 = vpop.f32.mrf.mxu3  ;;  %v1892_v2 = vpop.f32.mrf.mxu1 }
 0x1e4   :  { %v7432_v41 = vadd.f32 %v1988_v33, %v1940_v19  ;;  %v1893_v24 = vadd.f32 %v1892_v2, %v1844_v54  ;;  %v9177_v33 = vld [vmem:[#allocation38_spill] sm:$0xff]  ;;  %2313 = vmatpush.bf16.msra.mxu2 %v4917_v32 }
 0x1e5   :  { %v9179_v2 = vld [vmem:[#allocation18_spill] sm:$0xff] }
 0x1e6   :  { %v4660_v54 = vld [vmem:[%s9017_s1 + $0x228] sm:$0xf] }
 0x1e8   :  { %v1941_v12 = vpop.f32.mrf.mxu2 }
 0x1e9   :  { %v1942_v37 = vadd.f32 %v1941_v12, %v1893_v24  ;;  %v1846_v6 = vpop.f32.mrf.mxu0  ;;  %v5521_v24 = vld [vmem:[%s9017_s1 + $0x234] sm:$0xf0]  ;;  %v1800_v12 = vadd.f32 %v7180_v49, %v7288_v63 }
 0x1ea   :  { %v1847_v61 = vadd.f32 %v1846_v6, %v1798_v48  ;;  %v5617_v48 = vld [vmem:[%s9017_s1 + $0x534] sm:$0xf0] }
 0x1eb   :  { %v1990_v50 = vpop.f32.mrf.mxu3  ;;  %v1895_v62 = vpop.f32.mrf.mxu1  ;;  %v5045_v6 = vor.u32 %v5617_v48, %v5044_v5  ;;  %v5553_v49 = vld [vmem:[%s9017_s1 + $0x334] sm:$0xf0] }
 0x1ec   :  { %v7442_v8 = vadd.f32 %v1990_v50, %v1942_v37  ;;  %v1896_v19 = vadd.f32 %v1895_v62, %v1847_v61  ;;  %2041 = vmatmul.bf16.gmra.mxu0 %v9177_v33  ;;  %v4661_v50 = vor.u32 %v5521_v24, %v4660_v54 }
 0x1ed   :  { %2139 = vmatmul.bf16.gmra.mxu2 %v9179_v2  ;;  %2362 = vmatpush.bf16.msra.mxu3 %v5045_v6 }
 0x1ee   :  { %5174 = vmatmul.msk.bf16.gmra.mxu1 %vm1400_vm0, %v9178_v34  ;;  %2215 = vmatpush.bf16.msra.mxu0 %v4661_v50  ;;  %v4788_v34 = vld [vmem:[%s9017_s1 + $0x328] sm:$0xf] }
 0x1ef   :  { %v4789_v24 = vor.u32 %v5553_v49, %v4788_v34  ;;  %v5581_v34 = vld [vmem:[%s9017_s1 + $0x414] sm:$0xf0] }
 0x1f0   :  { %2188 = vmatmul.bf16.gmra.mxu3 %v6361_v27  ;;  %v1944_v37 = vpop.f32.mrf.mxu2 }
 0x1f1   :  { %v1945_v61 = vadd.f32 %v1944_v37, %v1896_v19  ;;  %v1848_v40 = vpop.f32.mrf.mxu0  ;;  %2264 = vmatpush.bf16.msra.mxu1 %v4789_v24  ;;  %v1803_v19 = vadd.f32 %v7207_v25, %v7288_v63  ;;  %v4900_v25 = vld [vmem:[%s9017_s1 + $0x408] sm:$0xf] }
 0x1f2   :  { %v1849_v20 = vadd.f32 %v1848_v40, %v1800_v12  ;;  %v9181_v40 = vld [vmem:[#allocation41_spill] sm:$0xff]  ;;  %v4901_v49 = vor.u32 %v5581_v34, %v4900_v25 }
 0x1f3   :  { %v1993_v62 = vpop.f32.mrf.mxu3  ;;  %v1897_v27 = vpop.f32.mrf.mxu1  ;;  %v5028_v24 = vld [vmem:[%s9017_s1 + $0x508] sm:$0xf] }
 0x1f4   :  { %v7469_v2 = vadd.f32 %v1993_v62, %v1945_v61  ;;  %v1898_v54 = vadd.f32 %v1897_v27, %v1849_v20  ;;  %v9180_v62 = vld [vmem:[#allocation40_spill] sm:$0xff]  ;;  %v4644_v20 = vld [vmem:[%s9017_s1 + $0x208] sm:$0xf]  ;;  %2314 = vmatpush.bf16.msra.mxu2 %v4901_v49 }
 0x1f5   :  { %v9182_v27 = vld [vmem:[#allocation20_spill] sm:$0xff] }
 0x1f8   :  { %v1946_v32 = vpop.f32.mrf.mxu2 }
 0x1f9   :  { %v1947_v5 = vadd.f32 %v1946_v32, %v1898_v54  ;;  %v1851_v12 = vpop.f32.mrf.mxu0  ;;  %v5517_v54 = vld [vmem:[%s9017_s1 + $0x214] sm:$0xf0]  ;;  %v1805_v32 = vadd.f32 %v7210_v31, %v7288_v63 }
 0x1fa   :  { %v1852_v37 = vadd.f32 %v1851_v12, %v1803_v19  ;;  %v5613_v19 = vld [vmem:[%s9017_s1 + $0x514] sm:$0xf0] }
 0x1fb   :  { %v1995_v48 = vpop.f32.mrf.mxu3  ;;  %v1900_v50 = vpop.f32.mrf.mxu1  ;;  %v5029_v12 = vor.u32 %v5613_v19, %v5028_v24  ;;  %v5549_v31 = vld [vmem:[%s9017_s1 + $0x314] sm:$0xf0] }
 0x1fc   :  { %v7479_v6 = vadd.f32 %v1995_v48, %v1947_v5  ;;  %v1901_v61 = vadd.f32 %v1900_v50, %v1852_v37  ;;  %2046 = vmatmul.bf16.gmra.mxu0 %v9180_v62  ;;  %v4645_v48 = vor.u32 %v5517_v54, %v4644_v20 }
 0x1fd   :  { %2144 = vmatmul.bf16.gmra.mxu2 %v9182_v27  ;;  %2363 = vmatpush.bf16.msra.mxu3 %v5029_v12 }
 0x1fe   :  { %5175 = vmatmul.msk.bf16.gmra.mxu1 %vm1400_vm0, %v9181_v40  ;;  %2216 = vmatpush.bf16.msra.mxu0 %v4645_v48  ;;  %v4772_v40 = vld [vmem:[%s9017_s1 + $0x308] sm:$0xf] }
 0x1ff   :  { %v4773_v54 = vor.u32 %v5549_v31, %v4772_v40  ;;  %v4630_v31 = vld [vmem:[%s9017_s1 + $0x1f8] sm:$0xf0] }
 0x200   :  { %2193 = vmatmul.bf16.gmra.mxu3 %v6415_v55  ;;  %v1949_v5 = vpop.f32.mrf.mxu2 }
 0x201   :  { %v1950_v37 = vadd.f32 %v1949_v5, %v1901_v61  ;;  %v1853_v25 = vpop.f32.mrf.mxu0  ;;  %2265 = vmatpush.bf16.msra.mxu1 %v4773_v54  ;;  %v1808_v61 = vadd.f32 %v7237_v59, %v7288_v63  ;;  %v1810_v59 = vadd.f32 %v7246_v0, %v7288_v63  ;;  %v5645_v0 = vld [vmem:[%s9017_s1 + $0x614] sm:$0xf0] }
 0x202   :  { %v1854_v34 = vadd.f32 %v1853_v25, %v1805_v32  ;;  %v9184_v25 = vld [vmem:[#allocation44_spill] sm:$0xff] }
 0x203   :  { %v1998_v50 = vpop.f32.mrf.mxu3  ;;  %v1902_v55 = vpop.f32.mrf.mxu1 }
 0x204   :  { %v7506_v27 = vadd.f32 %v1998_v50, %v1950_v37  ;;  %v1903_v20 = vadd.f32 %v1902_v55, %v1854_v34  ;;  %v9183_v50 = vld [vmem:[#allocation43_spill] sm:$0xff]  ;;  %v9185_v55 = vld [vmem:[#allocation22_spill] sm:$0xff] }
 0x205   :  { %v5511_v34 = vld [vmem:[%s9017_s1 + $0x1ec] sm:$0xf] }
 0x208   :  { %v1951_v49 = vpop.f32.mrf.mxu2 }
 0x209   :  { %v1952_v24 = vadd.f32 %v1951_v49, %v1903_v20  ;;  %v1856_v32 = vpop.f32.mrf.mxu0  ;;  %v5156_v20 = vld [vmem:[%s9017_s1 + $0x608] sm:$0xf] }
 0x20a   :  { %v1857_v5 = vadd.f32 %v1856_v32, %v1808_v61  ;;  %v4758_v32 = vld [vmem:[%s9017_s1 + $0x2f8] sm:$0xf0] }
 0x20b   :  { %v2000_v19 = vpop.f32.mrf.mxu3  ;;  %v1905_v48 = vpop.f32.mrf.mxu1 }
 0x20c   :  { %v7516_v12 = vadd.f32 %v2000_v19, %v1952_v24  ;;  %v1906_v37 = vadd.f32 %v1905_v48, %v1857_v5  ;;  %2051 = vmatmul.bf16.gmra.mxu0 %v9183_v50  ;;  %v4633_v24 = vor.u32 %v5511_v34, %v4630_v31  ;;  %v5543_v19 = vld [vmem:[%s9017_s1 + $0x2ec] sm:$0xf]  ;;  %v4502_v34 = vld [vmem:[%s9017_s1 + $0xf8] sm:$0xf0] }
 0x20d   :  { %2149 = vmatmul.bf16.gmra.mxu2 %v9185_v55  ;;  %v4761_v55 = vor.u32 %v5543_v19, %v4758_v32 }
 0x20e   :  { %5176 = vmatmul.msk.bf16.gmra.mxu1 %vm1400_vm0, %v9184_v25  ;;  %2503 = vmatpush.bf16.msrb.mxu2 %v4633_v24 }
 0x20f   :  { %2552 = vmatpush.bf16.msrb.mxu3 %v4761_v55  ;;  %v5507_v55 = vld [vmem:[%s9017_s1 + $0x1cc] sm:$0xf] }
 0x210   :  { %2198 = vmatmul.bf16.gmra.mxu3 %v6469_v17  ;;  %v1954_v40 = vpop.f32.mrf.mxu2  ;;  %v5157_v17 = vor.u32 %v5645_v0, %v5156_v20 }
 0x211   :  { %v1955_v54 = vadd.f32 %v1954_v40, %v1906_v37  ;;  %v1858_v49 = vpop.f32.mrf.mxu0  ;;  %v5479_v40 = vld [vmem:[%s9017_s1 + $0xec] sm:$0xf] }
 0x212   :  { %v1859_v5 = vadd.f32 %v1858_v49, %v1810_v59  ;;  %2412 = vmatpush.bf16.msrb.mxu0 %v5157_v17  ;;  %v4505_v25 = vor.u32 %v5479_v40, %v4502_v34  ;;  %v1813_v59 = vadd.f32 %v7273_v45, %v7288_v63  ;;  %v9188_v17 = vld [vmem:[#allocation24_spill] sm:$0xff]  ;;  %v1815_v45 = vadd.f32 %v7292_v51, %v7288_v63 }
 0x213   :  { %v2003_v61 = vpop.f32.mrf.mxu3  ;;  %v1907_v48 = vpop.f32.mrf.mxu1  ;;  %v4742_v63 = vld [vmem:[%s9017_s1 + $0x2d8] sm:$0xf0] }
 0x214   :  { %v7543_v37 = vadd.f32 %v2003_v61, %v1955_v54  ;;  %v1908_v31 = vadd.f32 %v1907_v48, %v1859_v5  ;;  %2454 = vmatpush.bf16.msrb.mxu1 %v4505_v25  ;;  %v4614_v5 = vld [vmem:[%s9017_s1 + $0x1d8] sm:$0xf0]  ;;  %v5539_v48 = vld [vmem:[%s9017_s1 + $0x2cc] sm:$0xf] }
 0x218   :  { %v1956_v20 = vpop.f32.mrf.mxu2 }
 0x219   :  { %v1957_v54 = vadd.f32 %v1956_v20, %v1908_v31  ;;  %v1861_v49 = vpop.f32.mrf.mxu0 }
 0x21a   :  { %v1862_v24 = vadd.f32 %v1861_v49, %v1813_v59  ;;  %v4617_v59 = vor.u32 %v5507_v55, %v4614_v5  ;;  %v5475_v49 = vld [vmem:[%s9017_s1 + $0xcc] sm:$0xf] }
 0x21b   :  { %v2005_v61 = vpop.f32.mrf.mxu3  ;;  %v1910_v0 = vpop.f32.mrf.mxu1 }
 0x21c   :  { %v7553_v19 = vadd.f32 %v2005_v61, %v1957_v54  ;;  %v1911_v32 = vadd.f32 %v1910_v0, %v1862_v24  ;;  %2056 = vmatmul.bf16.gmra.mxu0 %v9186_v52  ;;  %v4745_v54 = vor.u32 %v5539_v48, %v4742_v63  ;;  %2504 = vmatpush.bf16.msrb.mxu2 %v4617_v59  ;;  %v4486_v24 = vld [vmem:[%s9017_s1 + $0xd8] sm:$0xf0]  ;;  %v7589_v59 = vperm.slane %v7285_v13, 2 }
 0x21d   :  { %2154 = vmatmul.bf16.gmra.mxu2 %v9188_v17 }
 0x21e   :  { %5177 = vmatmul.msk.bf16.gmra.mxu1 %vm1400_vm0, %v9187_v1  ;;  %2553 = vmatpush.bf16.msrb.mxu3 %v4745_v54 }
 0x220   :  { %2203 = vmatmul.bf16.gmra.mxu3 %v9159_v14  ;;  %v1959_v25 = vpop.f32.mrf.mxu2 }
 0x221   :  { %v1960_v40 = vadd.f32 %v1959_v25, %v1911_v32  ;;  %v1863_v31 = vpop.f32.mrf.mxu0  ;;  %v4489_v32 = vor.u32 %v5475_v49, %v4486_v24 }
 0x222   :  { %v1864_v51 = vadd.f32 %v1863_v31, %v1815_v45 }
 0x223   :  { %v2008_v34 = vpop.f32.mrf.mxu3  ;;  %v1912_v20 = vpop.f32.mrf.mxu1  ;;  %2455 = vmatpush.bf16.msrb.mxu1 %v4489_v32 }
 0x224   :  { %v7574_v61 = vadd.f32 %v2008_v34, %v1960_v40  ;;  %v1913_v0 = vadd.f32 %v1912_v20, %v1864_v51  ;;  %v4598_v51 = vld [vmem:[%s9017_s1 + $0x1b8] sm:$0xf0]  ;;  %v5535_v20 = vld [vmem:[%s9017_s1 + $0x2ac] sm:$0xf] }
 0x228   :  { %v1961_v25 = vpop.f32.mrf.mxu2 }
 0x229   :  { %v1962_v55 = vadd.f32 %v1961_v25, %v1913_v0  ;;  %v2022_v5 = vpop.f32.mrf.mxu0  ;;  %v4726_v0 = vld [vmem:[%s9017_s1 + $0x2b8] sm:$0xf0] }
 0x22a   :  { %v2023_v48 = vadd.f32 %v2022_v5, %v7321_v35  ;;  %v5503_v35 = vld [vmem:[%s9017_s1 + $0x1ac] sm:$0xf] }
 0x22b   :  { %v2010_v45 = vpop.f32.mrf.mxu3  ;;  %v2071_v40 = vpop.f32.mrf.mxu1  ;;  %v4601_v24 = vor.u32 %v5503_v35, %v4598_v51  ;;  %v5471_v5 = vld [vmem:[%s9017_s1 + $0xac] sm:$0xf] }
 0x22c   :  { %v7583_v34 = vadd.f32 %v2010_v45, %v1962_v55  ;;  %v2072_v31 = vadd.f32 %v2071_v40, %v2023_v48  ;;  %2217 = vmatmul.bf16.vlgmr.msra.gmra.mxu0 %v6129_v53  ;;  %v4729_v55 = vor.u32 %v5535_v20, %v4726_v0  ;;  %v4470_v48 = vld [vmem:[%s9017_s1 + $0xb8] sm:$0xf0] }
 0x22d   :  { %2315 = vmatmul.bf16.vlgmr.msra.gmra.mxu2 %v6586_v36  ;;  %v4473_v35 = vor.u32 %v5471_v5, %v4470_v48  ;;  %v4710_v48 = vld [vmem:[%s9017_s1 + $0x298] sm:$0xf0] }
 0x22e   :  { %2266 = vmatmul.bf16.vlgmr.msra.gmra.mxu1 %v6137_v56  ;;  %2505 = vmatpush.bf16.msrb.mxu2 %v4601_v24  ;;  %v2798_v40 = vmul.f32 0.2, %v2072_v31 }
 0x22f   :  { %2554 = vmatpush.bf16.msrb.mxu3 %v4729_v55  ;;  %2456 = vmatpush.bf16.msrb.mxu1 %v4473_v35 }
 0x230   :  { %2364 = vmatmul.bf16.vlgmr.msra.gmra.mxu3 %v9164_v44  ;;  %v2120_v63 = vpop.f32.mrf.mxu2 }
 0x231   :  { %v2121_v54 = vadd.f32 %v2120_v63, %v7589_v59  ;;  %v2024_v13 = vpop.f32.mrf.mxu0 }
 0x232   :  { %v2025_v32 = vadd.f32 %v2024_v13, %v7331_v7  ;;  %v2862_v7 = vmax.f32 %v2072_v31, %v2798_v40 }
 0x233   :  { %v2169_v49 = vpop.f32.mrf.mxu3  ;;  %v2073_v25 = vpop.f32.mrf.mxu1 }
 0x234   :  { %v7606_v45 = vadd.f32 %v2169_v49, %v2121_v54  ;;  %v2074_v63 = vadd.f32 %v2073_v25, %v2025_v32  ;;  %v5499_v32 = vld [vmem:[%s9017_s1 + $0x18c] sm:$0xf] }
 0x236   :  { %v2802_v51 = vmul.f32 0.2, %v2074_v63 }
 0x238   :  { %v2866_v13 = vmax.f32 %v2074_v63, %v2802_v51  ;;  %v2122_v20 = vpop.f32.mrf.mxu2 }
 0x239   :  { %v2123_v54 = vadd.f32 %v2122_v20, %v7589_v59  ;;  %v2027_v24 = vpop.f32.mrf.mxu0 }
 0x23a   :  { %v7615_v0 = vpack.c.bf16 %v2866_v13, %v2862_v7  ;;  %v2028_v44 = vadd.f32 %v2027_v24, %v7358_v39  ;;  %v4582_v39 = vld [vmem:[%s9017_s1 + $0x198] sm:$0xf0]  ;;  %v5467_v7 = vld [vmem:[%s9017_s1 + $0x8c] sm:$0xf] }
 0x23b   :  { %v2171_v49 = vpop.f32.mrf.mxu3  ;;  %v2076_v36 = vpop.f32.mrf.mxu1  ;;  %v4585_v5 = vor.u32 %v5499_v32, %v4582_v39  ;;  %v4454_v13 = vld [vmem:[%s9017_s1 + $0x98] sm:$0xf0] }
 0x23c   :  { %9189 = vst [vmem:[#allocation31_spill] sm:$0xff] %v7615_v0  ;;  %v7618_v56 = vadd.f32 %v2171_v49, %v2123_v54  ;;  %v2077_v14 = vadd.f32 %v2076_v36, %v2028_v44  ;;  %2222 = vmatmul.bf16.gmra.mxu0 %v6201_v21  ;;  %v5531_v36 = vld [vmem:[%s9017_s1 + $0x28c] sm:$0xf]  ;;  %v4457_v49 = vor.u32 %v5467_v7, %v4454_v13 }
 0x23d   :  { %2320 = vmatmul.bf16.gmra.mxu2 %v6643_v46  ;;  %v4713_v35 = vor.u32 %v5531_v36, %v4710_v48 }
 0x23e   :  { %2271 = vmatmul.bf16.gmra.mxu1 %v6203_v22  ;;  %2506 = vmatpush.bf16.msrb.mxu2 %v4585_v5  ;;  %v2806_v20 = vmul.f32 0.2, %v2077_v14 }
 0x23f   :  { %2555 = vmatpush.bf16.msrb.mxu3 %v4713_v35  ;;  %2457 = vmatpush.bf16.msrb.mxu1 %v4457_v49  ;;  %v5527_v35 = vld [vmem:[%s9017_s1 + $0x26c] sm:$0xf]  ;;  %v4694_v49 = vld [vmem:[%s9017_s1 + $0x278] sm:$0xf0] }
 0x240   :  { %2369 = vmatmul.bf16.gmra.mxu3 %v9168_v26  ;;  %v2125_v31 = vpop.f32.mrf.mxu2 }
 0x241   :  { %v2126_v44 = vadd.f32 %v2125_v31, %v7589_v59  ;;  %v2029_v55 = vpop.f32.mrf.mxu0 }
 0x242   :  { %v2030_v40 = vadd.f32 %v2029_v55, %v7368_v38  ;;  %v2870_v38 = vmax.f32 %v2077_v14, %v2806_v20 }
 0x243   :  { %v2174_v25 = vpop.f32.mrf.mxu3  ;;  %v2078_v63 = vpop.f32.mrf.mxu1 }
 0x244   :  { %v7638_v51 = vadd.f32 %v2174_v25, %v2126_v44  ;;  %v2079_v54 = vadd.f32 %v2078_v63, %v2030_v40  ;;  %v9191_v40 = vld [vmem:[#allocation33_spill] sm:$0xff]  ;;  %v5495_v63 = vld [vmem:[%s9017_s1 + $0x16c] sm:$0xf] }
 0x246   :  { %v2810_v24 = vmul.f32 0.2, %v2079_v54 }
 0x248   :  { %v2874_v31 = vmax.f32 %v2079_v54, %v2810_v24  ;;  %v2127_v32 = vpop.f32.mrf.mxu2 }
 0x249   :  { %v2128_v39 = vadd.f32 %v2127_v32, %v7589_v59  ;;  %v2032_v44 = vpop.f32.mrf.mxu0 }
 0x24a   :  { %v2033_v25 = vadd.f32 %v2032_v44, %v7395_v16  ;;  %v7648_v5 = vpack.c.bf16 %v2874_v31, %v2870_v38  ;;  %v4566_v16 = vld [vmem:[%s9017_s1 + $0x178] sm:$0xf0]  ;;  %v4697_v31 = vor.u32 %v5527_v35, %v4694_v49 }
 0x24b   :  { %v2176_v36 = vpop.f32.mrf.mxu3  ;;  %v2081_v55 = vpop.f32.mrf.mxu1  ;;  %v4569_v54 = vor.u32 %v5495_v63, %v4566_v16 }
 0x24c   :  { %9190 = vst [vmem:[#allocation36_spill] sm:$0xff] %v7648_v5  ;;  %v7650_v48 = vadd.f32 %v2176_v36, %v2128_v39  ;;  %v2082_v0 = vadd.f32 %v2081_v55, %v2033_v25  ;;  %2227 = vmatmul.bf16.gmra.mxu0 %v6255_v42  ;;  %v5463_v39 = vld [vmem:[%s9017_s1 + $0x6c] sm:$0xf]  ;;  %v4438_v36 = vld [vmem:[%s9017_s1 + $0x78] sm:$0xf0]  ;;  %2556 = vmatpush.bf16.msrb.mxu3 %v4697_v31 }
 0x24d   :  { %2325 = vmatmul.bf16.gmra.mxu2 %v9191_v40  ;;  %v4441_v55 = vor.u32 %v5463_v39, %v4438_v36 }
 0x24e   :  { %2276 = vmatmul.bf16.gmra.mxu1 %v6257_v43  ;;  %2507 = vmatpush.bf16.msrb.mxu2 %v4569_v54  ;;  %v2814_v44 = vmul.f32 0.2, %v2082_v0 }
 0x24f   :  { %2458 = vmatpush.bf16.msrb.mxu1 %v4441_v55 }
 0x250   :  { %2374 = vmatmul.bf16.gmra.mxu3 %v9171_v15  ;;  %v2130_v14 = vpop.f32.mrf.mxu2 }
 0x251   :  { %v2131_v7 = vadd.f32 %v2130_v14, %v7589_v59  ;;  %v2034_v20 = vpop.f32.mrf.mxu0 }
 0x252   :  { %v2035_v24 = vadd.f32 %v2034_v20, %v7405_v47  ;;  %v2878_v47 = vmax.f32 %v2082_v0, %v2814_v44 }
 0x253   :  { %v2179_v13 = vpop.f32.mrf.mxu3  ;;  %v2083_v38 = vpop.f32.mrf.mxu1 }
 0x254   :  { %v7670_v32 = vadd.f32 %v2179_v13, %v2131_v7  ;;  %v2084_v25 = vadd.f32 %v2083_v38, %v2035_v24  ;;  %v5491_v24 = vld [vmem:[%s9017_s1 + $0x14c] sm:$0xf] }
 0x255   :  { %v5523_v38 = vld [vmem:[%s9017_s1 + $0x24c] sm:$0xf] }
 0x256   :  { %v2818_v14 = vmul.f32 0.2, %v2084_v25 }
 0x258   :  { %v2882_v63 = vmax.f32 %v2084_v25, %v2818_v14  ;;  %v2132_v16 = vpop.f32.mrf.mxu2  ;;  %v4678_v25 = vld [vmem:[%s9017_s1 + $0x258] sm:$0xf0] }
 0x259   :  { %v2133_v35 = vadd.f32 %v2132_v16, %v7589_v59  ;;  %v2037_v13 = vpop.f32.mrf.mxu0  ;;  %v5459_v16 = vld [vmem:[%s9017_s1 + $0x4c] sm:$0xf] }
 0x25a   :  { %v2038_v20 = vadd.f32 %v2037_v13, %v7432_v41  ;;  %v7680_v49 = vpack.c.bf16 %v2882_v63, %v2878_v47  ;;  %v4550_v41 = vld [vmem:[%s9017_s1 + $0x158] sm:$0xf0]  ;;  %v4681_v47 = vor.u32 %v5523_v38, %v4678_v25 }
 0x25b   :  { %v2181_v7 = vpop.f32.mrf.mxu3  ;;  %v2086_v54 = vpop.f32.mrf.mxu1  ;;  %v4553_v44 = vor.u32 %v5491_v24, %v4550_v41 }
 0x25c   :  { %9192 = vst [vmem:[#allocation38_spill] sm:$0xff] %v7680_v49  ;;  %v7682_v5 = vadd.f32 %v2181_v7, %v2133_v35  ;;  %v2087_v15 = vadd.f32 %v2086_v54, %v2038_v20  ;;  %2232 = vmatmul.bf16.gmra.mxu0 %v6309_v3  ;;  %v4422_v35 = vld [vmem:[%s9017_s1 + $0x58] sm:$0xf0]  ;;  %2557 = vmatpush.bf16.msrb.mxu3 %v4681_v47 }
 0x25d   :  { %2330 = vmatmul.bf16.gmra.mxu2 %v6761_v9  ;;  %v4425_v20 = vor.u32 %v5459_v16, %v4422_v35 }
 0x25e   :  { %2281 = vmatmul.bf16.gmra.mxu1 %v6311_v4  ;;  %2508 = vmatpush.bf16.msrb.mxu2 %v4553_v44  ;;  %v2822_v7 = vmul.f32 0.2, %v2087_v15 }
 0x25f   :  { %2459 = vmatpush.bf16.msrb.mxu1 %v4425_v20 }
 0x260   :  { %2379 = vmatmul.bf16.gmra.mxu3 %v9174_v60  ;;  %v2135_v0 = vpop.f32.mrf.mxu2 }
 0x261   :  { %v2136_v31 = vadd.f32 %v2135_v0, %v7589_v59  ;;  %v2039_v36 = vpop.f32.mrf.mxu0 }
 0x262   :  { %v2040_v55 = vadd.f32 %v2039_v36, %v7442_v8  ;;  %v2886_v8 = vmax.f32 %v2087_v15, %v2822_v7 }
 0x263   :  { %v2184_v39 = vpop.f32.mrf.mxu3  ;;  %v2088_v14 = vpop.f32.mrf.mxu1 }
 0x264   :  { %v7702_v63 = vadd.f32 %v2184_v39, %v2136_v31  ;;  %v2089_v13 = vadd.f32 %v2088_v14, %v2040_v55  ;;  %v5487_v55 = vld [vmem:[%s9017_s1 + $0x12c] sm:$0xf] }
 0x265   :  { %v5519_v14 = vld [vmem:[%s9017_s1 + $0x22c] sm:$0xf] }
 0x266   :  { %v2826_v54 = vmul.f32 0.2, %v2089_v13 }
 0x268   :  { %v2890_v0 = vmax.f32 %v2089_v13, %v2826_v54  ;;  %v2137_v24 = vpop.f32.mrf.mxu2  ;;  %v4662_v13 = vld [vmem:[%s9017_s1 + $0x238] sm:$0xf0] }
 0x269   :  { %v2138_v41 = vadd.f32 %v2137_v24, %v7589_v59  ;;  %v2042_v31 = vpop.f32.mrf.mxu0  ;;  %v5455_v24 = vld [vmem:[%s9017_s1 + $0x2c] sm:$0xf] }
 0x26a   :  { %v2043_v39 = vadd.f32 %v2042_v31, %v7469_v2  ;;  %v7712_v44 = vpack.c.bf16 %v2890_v0, %v2886_v8  ;;  %v4534_v2 = vld [vmem:[%s9017_s1 + $0x138] sm:$0xf0]  ;;  %v4665_v8 = vor.u32 %v5519_v14, %v4662_v13 }
 0x26b   :  { %v2186_v38 = vpop.f32.mrf.mxu3  ;;  %v2091_v36 = vpop.f32.mrf.mxu1  ;;  %v4537_v7 = vor.u32 %v5487_v55, %v4534_v2 }
 0x26c   :  { %9193 = vst [vmem:[#allocation40_spill] sm:$0xff] %v7712_v44  ;;  %v7714_v25 = vadd.f32 %v2186_v38, %v2138_v41  ;;  %v2092_v49 = vadd.f32 %v2091_v36, %v2043_v39  ;;  %2237 = vmatmul.bf16.gmra.mxu0 %v6363_v28  ;;  %v4406_v41 = vld [vmem:[%s9017_s1 + $0x38] sm:$0xf0]  ;;  %2558 = vmatpush.bf16.msrb.mxu3 %v4665_v8 }
 0x26d   :  { %2335 = vmatmul.bf16.gmra.mxu2 %v6820_v11  ;;  %v4409_v39 = vor.u32 %v5455_v24, %v4406_v41 }
 0x26e   :  { %2286 = vmatmul.bf16.gmra.mxu1 %v6365_v29  ;;  %2509 = vmatpush.bf16.msrb.mxu2 %v4537_v7  ;;  %v2830_v38 = vmul.f32 0.2, %v2092_v49 }
 0x26f   :  { %2460 = vmatpush.bf16.msrb.mxu1 %v4409_v39 }
 0x270   :  { %2384 = vmatmul.bf16.gmra.mxu3 %v9177_v33  ;;  %v2140_v15 = vpop.f32.mrf.mxu2 }
 0x271   :  { %v2141_v47 = vadd.f32 %v2140_v15, %v7589_v59  ;;  %v2044_v35 = vpop.f32.mrf.mxu0 }
 0x272   :  { %v2045_v20 = vadd.f32 %v2044_v35, %v7479_v6  ;;  %v2894_v6 = vmax.f32 %v2092_v49, %v2830_v38 }
 0x273   :  { %v2189_v16 = vpop.f32.mrf.mxu3  ;;  %v2093_v54 = vpop.f32.mrf.mxu1 }
 0x274   :  { %v7734_v0 = vadd.f32 %v2189_v16, %v2141_v47  ;;  %v2094_v31 = vadd.f32 %v2093_v54, %v2045_v20  ;;  %v5483_v20 = vld [vmem:[%s9017_s1 + $0x10c] sm:$0xf] }
 0x275   :  { %v5515_v54 = vld [vmem:[%s9017_s1 + $0x20c] sm:$0xf] }
 0x276   :  { %v2834_v36 = vmul.f32 0.2, %v2094_v31 }
 0x278   :  { %v2898_v15 = vmax.f32 %v2094_v31, %v2834_v36  ;;  %v2142_v55 = vpop.f32.mrf.mxu2  ;;  %v4646_v31 = vld [vmem:[%s9017_s1 + $0x218] sm:$0xf0] }
 0x279   :  { %v2143_v2 = vadd.f32 %v2142_v55, %v7589_v59  ;;  %v2047_v47 = vpop.f32.mrf.mxu0  ;;  %v5451_v55 = vld [vmem:[%s9017_s1 + $0xc] sm:$0xf] }
 0x27a   :  { %v2048_v16 = vadd.f32 %v2047_v47, %v7506_v27  ;;  %v7744_v7 = vpack.c.bf16 %v2898_v15, %v2894_v6  ;;  %v4518_v27 = vld [vmem:[%s9017_s1 + $0x118] sm:$0xf0]  ;;  %v4649_v6 = vor.u32 %v5515_v54, %v4646_v31 }
 0x27b   :  { %v2191_v14 = vpop.f32.mrf.mxu3  ;;  %v2096_v35 = vpop.f32.mrf.mxu1  ;;  %v4521_v38 = vor.u32 %v5483_v20, %v4518_v27 }
 0x27c   :  { %9194 = vst [vmem:[#allocation47_spill] sm:$0xff] %v7744_v7  ;;  %v7746_v13 = vadd.f32 %v2191_v14, %v2143_v2  ;;  %v2097_v44 = vadd.f32 %v2096_v35, %v2048_v16  ;;  %2242 = vmatmul.bf16.gmra.mxu0 %v6417_v57  ;;  %v4390_v2 = vld [vmem:[%s9017_s1 + $0x18] sm:$0xf0]  ;;  %2559 = vmatpush.bf16.msrb.mxu3 %v4649_v6  ;;  %v5575_v6 = vld [vmem:[%s9017_s1 + $0x3ec] sm:$0xf] }
 0x27d   :  { %2340 = vmatmul.bf16.gmra.mxu2 %v6879_v10  ;;  %v4393_v16 = vor.u32 %v5451_v55, %v4390_v2  ;;  %v4886_v55 = vld [vmem:[%s9017_s1 + $0x3f8] sm:$0xf0]  ;;  %v5643_v2 = vld [vmem:[%s9017_s1 + $0x60c] sm:$0xf] }
 0x27e   :  { %2291 = vmatmul.bf16.gmra.mxu1 %v6419_v58  ;;  %2510 = vmatpush.bf16.msrb.mxu2 %v4521_v38  ;;  %v2838_v14 = vmul.f32 0.2, %v2097_v44 }
 0x27f   :  { %2461 = vmatpush.bf16.msrb.mxu1 %v4393_v16  ;;  %v5158_v16 = vld [vmem:[%s9017_s1 + $0x618] sm:$0xf0] }
 0x280   :  { %2389 = vmatmul.bf16.gmra.mxu3 %v9180_v62  ;;  %v2145_v49 = vpop.f32.mrf.mxu2 }
 0x281   :  { %v2146_v8 = vadd.f32 %v2145_v49, %v7589_v59  ;;  %v2049_v41 = vpop.f32.mrf.mxu0 }
 0x282   :  { %v2050_v39 = vadd.f32 %v2049_v41, %v7516_v12  ;;  %v2902_v12 = vmax.f32 %v2097_v44, %v2838_v14  ;;  %v5639_v44 = vld [vmem:[%s9017_s1 + $0x5ec] sm:$0xf] }
 0x283   :  { %v2194_v24 = vpop.f32.mrf.mxu3  ;;  %v2098_v36 = vpop.f32.mrf.mxu1 }
 0x284   :  { %v7766_v15 = vadd.f32 %v2194_v24, %v2146_v8  ;;  %v2099_v47 = vadd.f32 %v2098_v36, %v2050_v39  ;;  %v9196_v39 = vld [vmem:[#allocation42_spill] sm:$0xff] }
 0x286   :  { %v2842_v35 = vmul.f32 0.2, %v2099_v47 }
 0x288   :  { %v2906_v49 = vmax.f32 %v2099_v47, %v2842_v35  ;;  %v2147_v20 = vpop.f32.mrf.mxu2  ;;  %v4889_v47 = vor.u32 %v5575_v6, %v4886_v55 }
 0x289   :  { %v2148_v27 = vadd.f32 %v2147_v20, %v7589_v59  ;;  %v2052_v8 = vpop.f32.mrf.mxu0  ;;  %v5161_v20 = vor.u32 %v5643_v2, %v5158_v16 }
 0x28a   :  { %v2053_v24 = vadd.f32 %v2052_v8, %v7543_v37  ;;  %v7776_v38 = vpack.c.bf16 %v2906_v49, %v2902_v12  ;;  %v5142_v37 = vld [vmem:[%s9017_s1 + $0x5f8] sm:$0xf0]  ;;  %2601 = vmatpush.bf16.msra.mxu0 %v4889_v47 }
 0x28b   :  { %v2196_v54 = vpop.f32.mrf.mxu3  ;;  %v2101_v41 = vpop.f32.mrf.mxu1  ;;  %v5145_v36 = vor.u32 %v5639_v44, %v5142_v37  ;;  %2755 = vmatpush.bf16.msra.mxu3 %v5161_v20 }
 0x28c   :  { %9195 = vst [vmem:[#allocation24_spill] sm:$0xff] %v7776_v38  ;;  %v7778_v31 = vadd.f32 %v2196_v54, %v2148_v27  ;;  %v2102_v7 = vadd.f32 %v2101_v41, %v2053_v24  ;;  %2247 = vmatmul.bf16.gmra.mxu0 %v6471_v18  ;;  %v5607_v24 = vld [vmem:[%s9017_s1 + $0x4ec] sm:$0xf]  ;;  %v5014_v41 = vld [vmem:[%s9017_s1 + $0x4f8] sm:$0xf0] }
 0x28d   :  { %2345 = vmatmul.bf16.gmra.mxu2 %v9196_v39  ;;  %v5017_v6 = vor.u32 %v5607_v24, %v5014_v41  ;;  %v5571_v41 = vld [vmem:[%s9017_s1 + $0x3cc] sm:$0xf] }
 0x28e   :  { %2296 = vmatmul.bf16.gmra.mxu1 %v6473_v23  ;;  %2699 = vmatpush.bf16.msra.mxu2 %v5145_v36  ;;  %v2846_v44 = vmul.f32 0.2, %v2102_v7 }
 0x28f   :  { %2650 = vmatpush.bf16.msra.mxu1 %v5017_v6 }
 0x290   :  { %2394 = vmatmul.bf16.gmra.mxu3 %v9183_v50  ;;  %v2150_v14 = vpop.f32.mrf.mxu2  ;;  %v2910_v55 = vmax.f32 %v2102_v7, %v2846_v44  ;;  %v9198_v50 = vld [vmem:[#allocation26_spill] sm:$0xff]  ;;  %v4870_v44 = vld [vmem:[%s9017_s1 + $0x3d8] sm:$0xf0] }
 0x291   :  { %v2151_v35 = vadd.f32 %v2150_v14, %v7589_v59  ;;  %v2054_v49 = vpop.f32.mrf.mxu0  ;;  %v5635_v7 = vld [vmem:[%s9017_s1 + $0x5cc] sm:$0xf]  ;;  %v4873_v6 = vor.u32 %v5571_v41, %v4870_v44 }
 0x292   :  { %v2055_v27 = vadd.f32 %v2054_v49, %v7553_v19 }
 0x293   :  { %v2199_v12 = vpop.f32.mrf.mxu3  ;;  %v2103_v54 = vpop.f32.mrf.mxu1  ;;  %2602 = vmatpush.bf16.msra.mxu0 %v4873_v6 }
 0x294   :  { %v7804_v8 = vadd.f32 %v2199_v12, %v2151_v35  ;;  %v2104_v37 = vadd.f32 %v2103_v54, %v2055_v27  ;;  %v9199_v27 = vld [vmem:[#allocation27_spill] sm:$0xff]  ;;  %v9200_v54 = vld [vmem:[#allocation45_spill] sm:$0xff] }
 0x296   :  { %v2850_v36 = vmul.f32 0.2, %v2104_v37 }
 0x298   :  { %v2914_v19 = vmax.f32 %v2104_v37, %v2850_v36  ;;  %v2152_v2 = vpop.f32.mrf.mxu2 }
 0x299   :  { %v2153_v14 = vadd.f32 %v2152_v2, %v7589_v59  ;;  %v2057_v16 = vpop.f32.mrf.mxu0 }
 0x29a   :  { %v2058_v35 = vadd.f32 %v2057_v16, %v7574_v61  ;;  %v7814_v49 = vpack.c.bf16 %v2914_v19, %v2910_v55  ;;  %v5126_v61 = vld [vmem:[%s9017_s1 + $0x5d8] sm:$0xf0]  ;;  %v5603_v16 = vld [vmem:[%s9017_s1 + $0x4cc] sm:$0xf] }
 0x29b   :  { %v2201_v47 = vpop.f32.mrf.mxu3  ;;  %v2106_v12 = vpop.f32.mrf.mxu1  ;;  %v5129_v24 = vor.u32 %v5635_v7, %v5126_v61 }
 0x29c   :  { %9197 = vst [vmem:[#allocation33_spill] sm:$0xff] %v7814_v49  ;;  %v7816_v20 = vadd.f32 %v2201_v47, %v2153_v14  ;;  %v2107_v38 = vadd.f32 %v2106_v12, %v2058_v35  ;;  %2252 = vmatmul.bf16.gmra.mxu0 %v9198_v50  ;;  %v4998_v35 = vld [vmem:[%s9017_s1 + $0x4d8] sm:$0xf0] }
 0x29d   :  { %2350 = vmatmul.bf16.gmra.mxu2 %v9200_v54  ;;  %v5001_v61 = vor.u32 %v5603_v16, %v4998_v35  ;;  %v4854_v35 = vld [vmem:[%s9017_s1 + $0x3b8] sm:$0xf0] }
 0x29e   :  { %2301 = vmatmul.bf16.gmra.mxu1 %v9199_v27  ;;  %2700 = vmatpush.bf16.msra.mxu2 %v5129_v24  ;;  %v2854_v12 = vmul.f32 0.2, %v2107_v38 }
 0x29f   :  { %2651 = vmatpush.bf16.msra.mxu1 %v5001_v61 }
 0x2a0   :  { %2399 = vmatmul.bf16.gmra.mxu3 %v9186_v52  ;;  %v2155_v37 = vpop.f32.mrf.mxu2  ;;  %v2918_v24 = vmax.f32 %v2107_v38, %v2854_v12  ;;  %v9203_v38 = vld [vmem:[#allocation10_spill] sm:$0xff] }
 0x2a1   :  { %v2156_v36 = vadd.f32 %v2155_v37, %v7589_v59  ;;  %v2059_v19 = vpop.f32.mrf.mxu0 }
 0x2a2   :  { %v2060_v2 = vadd.f32 %v2059_v19, %v7583_v34 }
 0x2a3   :  { %v2204_v55 = vpop.f32.mrf.mxu3  ;;  %v2108_v14 = vpop.f32.mrf.mxu1 }
 0x2a4   :  { %v7836_v47 = vadd.f32 %v2204_v55, %v2156_v36  ;;  %v2109_v7 = vadd.f32 %v2108_v14, %v2060_v2  ;;  %v9202_v2 = vld [vmem:[#allocation9_spill] sm:$0xff]  ;;  %v5567_v14 = vld [vmem:[%s9017_s1 + $0x3ac] sm:$0xf] }
 0x2a6   :  { %v2858_v41 = vmul.f32 0.2, %v2109_v7 }
 0x2a8   :  { %v2922_v44 = vmax.f32 %v2109_v7, %v2858_v41  ;;  %v2157_v34 = vpop.f32.mrf.mxu2  ;;  %v4857_v7 = vor.u32 %v5567_v14, %v4854_v35  ;;  %v9205_v35 = vld [vmem:[#allocation12_spill] sm:$0xff] }
 0x2a9   :  { %v2158_v37 = vadd.f32 %v2157_v34, %v7589_v59  ;;  %v2218_v36 = vpop.f32.mrf.mxu0  ;;  %v5631_v59 = vld [vmem:[%s9017_s1 + $0x5ac] sm:$0xf] }
 0x2aa   :  { %v2219_v55 = vadd.f32 %v2218_v36, %v7606_v45  ;;  %v7846_v49 = vpack.c.bf16 %v2922_v44, %v2918_v24  ;;  %v5110_v45 = vld [vmem:[%s9017_s1 + $0x5b8] sm:$0xf0]  ;;  %2603 = vmatpush.bf16.msra.mxu0 %v4857_v7  ;;  %v5627_v7 = vld [vmem:[%s9017_s1 + $0x58c] sm:$0xf] }
 0x2ab   :  { %v2206_v6 = vpop.f32.mrf.mxu3  ;;  %v2267_v19 = vpop.f32.mrf.mxu1  ;;  %v5113_v16 = vor.u32 %v5631_v59, %v5110_v45 }
 0x2ac   :  { %9201 = vst [vmem:[#allocation42_spill] sm:$0xff] %v7846_v49  ;;  %v7848_v52 = vadd.f32 %v2206_v6, %v2158_v37  ;;  %v2268_v54 = vadd.f32 %v2267_v19, %v2219_v55  ;;  %5178 = vmatmul.msk.bf16.vlgmr.msrb.gmra.mxu0 %vm1400_vm0, %v9165_v30  ;;  %v5599_v37 = vld [vmem:[%s9017_s1 + $0x4ac] sm:$0xf]  ;;  %v4982_v6 = vld [vmem:[%s9017_s1 + $0x4b8] sm:$0xf0] }
 0x2ad   :  { %2511 = vmatmul.bf16.vlgmr.msrb.gmra.mxu2 %v9203_v38  ;;  %v4985_v55 = vor.u32 %v5599_v37, %v4982_v6 }
 0x2ae   :  { %2462 = vmatmul.bf16.vlgmr.msrb.gmra.mxu1 %v9202_v2  ;;  %2701 = vmatpush.bf16.msra.mxu2 %v5113_v16  ;;  %v9204_v16 = vld [vmem:[#allocation32_spill] sm:$0xff] }
 0x2af   :  { %2652 = vmatpush.bf16.msra.mxu1 %v4985_v55 }
 0x2b0   :  { %2560 = vmatmul.bf16.vlgmr.msrb.gmra.mxu3 %v6129_v53  ;;  %v2316_v12 = vpop.f32.mrf.mxu2 }
 0x2b1   :  { %v2317_v53 = vadd.f32 %v2316_v12, %v2268_v54  ;;  %v2220_v41 = vpop.f32.mrf.mxu0  ;;  %v9206_v12 = vld [vmem:[#allocation13_spill] sm:$0xff] }
 0x2b2   :  { %v2221_v24 = vadd.f32 %v2220_v41, %v7618_v56  ;;  %v4838_v41 = vld [vmem:[%s9017_s1 + $0x398] sm:$0xf0] }
 0x2b3   :  { %v2365_v61 = vpop.f32.mrf.mxu3  ;;  %v2269_v44 = vpop.f32.mrf.mxu1 }
 0x2b4   :  { %v7868_v34 = vadd.f32 %v2365_v61, %v2317_v53  ;;  %v2270_v36 = vadd.f32 %v2269_v44, %v2221_v24  ;;  %v5563_v53 = vld [vmem:[%s9017_s1 + $0x38c] sm:$0xf] }
 0x2b5   :  { %v4841_v44 = vor.u32 %v5563_v53, %v4838_v41  ;;  %v9208_v41 = vld [vmem:[#allocation14_spill] sm:$0xff] }
 0x2b7   :  { %2604 = vmatpush.bf16.msra.mxu0 %v4841_v44  ;;  %v5623_v44 = vld [vmem:[%s9017_s1 + $0x56c] sm:$0xf] }
 0x2b8   :  { %v2318_v54 = vpop.f32.mrf.mxu2 }
 0x2b9   :  { %v2319_v19 = vadd.f32 %v2318_v54, %v2270_v36  ;;  %v2223_v38 = vpop.f32.mrf.mxu0 }
 0x2ba   :  { %v2224_v56 = vadd.f32 %v2223_v38, %v7638_v51  ;;  %v5094_v51 = vld [vmem:[%s9017_s1 + $0x598] sm:$0xf0] }
 0x2bb   :  { %v2367_v2 = vpop.f32.mrf.mxu3  ;;  %v2272_v59 = vpop.f32.mrf.mxu1  ;;  %v5097_v61 = vor.u32 %v5627_v7, %v5094_v51 }
 0x2bc   :  { %v7877_v45 = vadd.f32 %v2367_v2, %v2319_v19  ;;  %v2273_v14 = vadd.f32 %v2272_v59, %v2224_v56  ;;  %5179 = vmatmul.msk.bf16.gmra.mxu0 %vm1400_vm0, %v9204_v16  ;;  %v5595_v19 = vld [vmem:[%s9017_s1 + $0x48c] sm:$0xf]  ;;  %v4966_v2 = vld [vmem:[%s9017_s1 + $0x498] sm:$0xf0] }
 0x2bd   :  { %2516 = vmatmul.bf16.gmra.mxu2 %v9206_v12  ;;  %v4969_v56 = vor.u32 %v5595_v19, %v4966_v2 }
 0x2be   :  { %2467 = vmatmul.bf16.gmra.mxu1 %v9205_v35  ;;  %2702 = vmatpush.bf16.msra.mxu2 %v5097_v61  ;;  %v9207_v61 = vld [vmem:[#allocation35_spill] sm:$0xff] }
 0x2bf   :  { %2653 = vmatpush.bf16.msra.mxu1 %v4969_v56 }
 0x2c0   :  { %2565 = vmatmul.bf16.gmra.mxu3 %v6201_v21  ;;  %v2321_v24 = vpop.f32.mrf.mxu2 }
 0x2c1   :  { %v2322_v21 = vadd.f32 %v2321_v24, %v2273_v14  ;;  %v2225_v6 = vpop.f32.mrf.mxu0  ;;  %v9209_v24 = vld [vmem:[#allocation15_spill] sm:$0xff] }
 0x2c2   :  { %v2226_v36 = vadd.f32 %v2225_v6, %v7650_v48  ;;  %v4822_v6 = vld [vmem:[%s9017_s1 + $0x378] sm:$0xf0] }
 0x2c3   :  { %v2370_v37 = vpop.f32.mrf.mxu3  ;;  %v2274_v55 = vpop.f32.mrf.mxu1 }
 0x2c4   :  { %v7897_v54 = vadd.f32 %v2370_v37, %v2322_v21  ;;  %v2275_v38 = vadd.f32 %v2274_v55, %v2226_v36  ;;  %v5559_v21 = vld [vmem:[%s9017_s1 + $0x36c] sm:$0xf] }
 0x2c5   :  { %v4825_v55 = vor.u32 %v5559_v21, %v4822_v6  ;;  %v9211_v6 = vld [vmem:[#allocation16_spill] sm:$0xff] }
 0x2c7   :  { %2605 = vmatpush.bf16.msra.mxu0 %v4825_v55  ;;  %v5619_v55 = vld [vmem:[%s9017_s1 + $0x54c] sm:$0xf] }
 0x2c8   :  { %v2323_v59 = vpop.f32.mrf.mxu2 }
 0x2c9   :  { %v2324_v14 = vadd.f32 %v2323_v59, %v2275_v38  ;;  %v2228_v12 = vpop.f32.mrf.mxu0 }
 0x2ca   :  { %v2229_v48 = vadd.f32 %v2228_v12, %v7670_v32  ;;  %v5078_v32 = vld [vmem:[%s9017_s1 + $0x578] sm:$0xf0] }
 0x2cb   :  { %v2372_v35 = vpop.f32.mrf.mxu3  ;;  %v2277_v7 = vpop.f32.mrf.mxu1  ;;  %v5081_v37 = vor.u32 %v5623_v44, %v5078_v32 }
 0x2cc   :  { %v7906_v51 = vadd.f32 %v2372_v35, %v2324_v14  ;;  %v2278_v53 = vadd.f32 %v2277_v7, %v2229_v48  ;;  %5180 = vmatmul.msk.bf16.gmra.mxu0 %vm1400_vm0, %v9207_v61  ;;  %v5591_v14 = vld [vmem:[%s9017_s1 + $0x46c] sm:$0xf]  ;;  %v4950_v35 = vld [vmem:[%s9017_s1 + $0x478] sm:$0xf0] }
 0x2cd   :  { %2521 = vmatmul.bf16.gmra.mxu2 %v9209_v24  ;;  %v4953_v48 = vor.u32 %v5591_v14, %v4950_v35 }
 0x2ce   :  { %2472 = vmatmul.bf16.gmra.mxu1 %v9208_v41  ;;  %2703 = vmatpush.bf16.msra.mxu2 %v5081_v37  ;;  %v9210_v37 = vld [vmem:[#allocation37_spill] sm:$0xff] }
 0x2cf   :  { %2654 = vmatpush.bf16.msra.mxu1 %v4953_v48 }
 0x2d0   :  { %2570 = vmatmul.bf16.gmra.mxu3 %v6255_v42  ;;  %v2326_v36 = vpop.f32.mrf.mxu2 }
 0x2d1   :  { %v2327_v42 = vadd.f32 %v2326_v36, %v2278_v53  ;;  %v2230_v2 = vpop.f32.mrf.mxu0  ;;  %v9212_v36 = vld [vmem:[#allocation17_spill] sm:$0xff] }
 0x2d2   :  { %v2231_v38 = vadd.f32 %v2230_v2, %v7682_v5  ;;  %v4806_v2 = vld [vmem:[%s9017_s1 + $0x358] sm:$0xf0] }
 0x2d3   :  { %v2375_v19 = vpop.f32.mrf.mxu3  ;;  %v2279_v56 = vpop.f32.mrf.mxu1 }
 0x2d4   :  { %v7926_v59 = vadd.f32 %v2375_v19, %v2327_v42  ;;  %v2280_v12 = vadd.f32 %v2279_v56, %v2231_v38  ;;  %v5555_v42 = vld [vmem:[%s9017_s1 + $0x34c] sm:$0xf] }
 0x2d5   :  { %v4809_v56 = vor.u32 %v5555_v42, %v4806_v2  ;;  %v9214_v2 = vld [vmem:[#allocation18_spill] sm:$0xff] }
 0x2d7   :  { %2606 = vmatpush.bf16.msra.mxu0 %v4809_v56  ;;  %v5615_v56 = vld [vmem:[%s9017_s1 + $0x52c] sm:$0xf] }
 0x2d8   :  { %v2328_v7 = vpop.f32.mrf.mxu2 }
 0x2d9   :  { %v2329_v53 = vadd.f32 %v2328_v7, %v2280_v12  ;;  %v2233_v24 = vpop.f32.mrf.mxu0 }
 0x2da   :  { %v2234_v5 = vadd.f32 %v2233_v24, %v7702_v63  ;;  %v5062_v63 = vld [vmem:[%s9017_s1 + $0x558] sm:$0xf0] }
 0x2db   :  { %v2377_v41 = vpop.f32.mrf.mxu3  ;;  %v2282_v44 = vpop.f32.mrf.mxu1  ;;  %v5065_v19 = vor.u32 %v5619_v55, %v5062_v63 }
 0x2dc   :  { %v7935_v32 = vadd.f32 %v2377_v41, %v2329_v53  ;;  %v2283_v21 = vadd.f32 %v2282_v44, %v2234_v5  ;;  %5181 = vmatmul.msk.bf16.gmra.mxu0 %vm1400_vm0, %v9210_v37  ;;  %v5587_v53 = vld [vmem:[%s9017_s1 + $0x44c] sm:$0xf]  ;;  %v4934_v41 = vld [vmem:[%s9017_s1 + $0x458] sm:$0xf0] }
 0x2dd   :  { %2526 = vmatmul.bf16.gmra.mxu2 %v9212_v36  ;;  %v4937_v5 = vor.u32 %v5587_v53, %v4934_v41 }
 0x2de   :  { %2477 = vmatmul.bf16.gmra.mxu1 %v9211_v6  ;;  %2704 = vmatpush.bf16.msra.mxu2 %v5065_v19  ;;  %v9213_v19 = vld [vmem:[#allocation39_spill] sm:$0xff] }
 0x2df   :  { %2655 = vmatpush.bf16.msra.mxu1 %v4937_v5 }
 0x2e0   :  { %2575 = vmatmul.bf16.gmra.mxu3 %v6309_v3  ;;  %v2331_v38 = vpop.f32.mrf.mxu2 }
 0x2e1   :  { %v2332_v3 = vadd.f32 %v2331_v38, %v2283_v21  ;;  %v2235_v35 = vpop.f32.mrf.mxu0  ;;  %v9215_v38 = vld [vmem:[#allocation19_spill] sm:$0xff] }
 0x2e2   :  { %v2236_v12 = vadd.f32 %v2235_v35, %v7714_v25  ;;  %v4790_v35 = vld [vmem:[%s9017_s1 + $0x338] sm:$0xf0] }
 0x2e3   :  { %v2380_v14 = vpop.f32.mrf.mxu3  ;;  %v2284_v48 = vpop.f32.mrf.mxu1 }
 0x2e4   :  { %v7955_v7 = vadd.f32 %v2380_v14, %v2332_v3  ;;  %v2285_v24 = vadd.f32 %v2284_v48, %v2236_v12  ;;  %v5551_v3 = vld [vmem:[%s9017_s1 + $0x32c] sm:$0xf] }
 0x2e5   :  { %v4793_v48 = vor.u32 %v5551_v3, %v4790_v35  ;;  %v9217_v35 = vld [vmem:[#allocation20_spill] sm:$0xff] }
 0x2e7   :  { %2607 = vmatpush.bf16.msra.mxu0 %v4793_v48  ;;  %v5611_v48 = vld [vmem:[%s9017_s1 + $0x50c] sm:$0xf] }
 0x2e8   :  { %v2333_v44 = vpop.f32.mrf.mxu2 }
 0x2e9   :  { %v2334_v21 = vadd.f32 %v2333_v44, %v2285_v24  ;;  %v2238_v36 = vpop.f32.mrf.mxu0 }
 0x2ea   :  { %v2239_v25 = vadd.f32 %v2238_v36, %v7734_v0  ;;  %v5046_v0 = vld [vmem:[%s9017_s1 + $0x538] sm:$0xf0] }
 0x2eb   :  { %v2382_v6 = vpop.f32.mrf.mxu3  ;;  %v2287_v55 = vpop.f32.mrf.mxu1  ;;  %v5049_v14 = vor.u32 %v5615_v56, %v5046_v0 }
 0x2ec   :  { %v7964_v63 = vadd.f32 %v2382_v6, %v2334_v21  ;;  %v2288_v42 = vadd.f32 %v2287_v55, %v2239_v25  ;;  %5182 = vmatmul.msk.bf16.gmra.mxu0 %vm1400_vm0, %v9213_v19  ;;  %v5583_v21 = vld [vmem:[%s9017_s1 + $0x42c] sm:$0xf]  ;;  %v4918_v6 = vld [vmem:[%s9017_s1 + $0x438] sm:$0xf0] }
 0x2ed   :  { %2531 = vmatmul.bf16.gmra.mxu2 %v9215_v38  ;;  %v4921_v25 = vor.u32 %v5583_v21, %v4918_v6 }
 0x2ee   :  { %2482 = vmatmul.bf16.gmra.mxu1 %v9214_v2  ;;  %2705 = vmatpush.bf16.msra.mxu2 %v5049_v14  ;;  %v9216_v14 = vld [vmem:[#allocation41_spill] sm:$0xff] }
 0x2ef   :  { %2656 = vmatpush.bf16.msra.mxu1 %v4921_v25 }
 0x2f0   :  { %2580 = vmatmul.bf16.gmra.mxu3 %v6363_v28  ;;  %v2336_v12 = vpop.f32.mrf.mxu2 }
 0x2f1   :  { %v2337_v28 = vadd.f32 %v2336_v12, %v2288_v42  ;;  %v2240_v41 = vpop.f32.mrf.mxu0  ;;  %v9218_v12 = vld [vmem:[#allocation21_spill] sm:$0xff] }
 0x2f2   :  { %v2241_v24 = vadd.f32 %v2240_v41, %v7746_v13  ;;  %v4774_v41 = vld [vmem:[%s9017_s1 + $0x318] sm:$0xf0] }
 0x2f3   :  { %v2385_v53 = vpop.f32.mrf.mxu3  ;;  %v2289_v5 = vpop.f32.mrf.mxu1 }
 0x2f4   :  { %v7984_v44 = vadd.f32 %v2385_v53, %v2337_v28  ;;  %v2290_v36 = vadd.f32 %v2289_v5, %v2241_v24  ;;  %v5547_v28 = vld [vmem:[%s9017_s1 + $0x30c] sm:$0xf] }
 0x2f5   :  { %v4777_v5 = vor.u32 %v5547_v28, %v4774_v41  ;;  %v9220_v41 = vld [vmem:[#allocation22_spill] sm:$0xff] }
 0x2f7   :  { %2608 = vmatpush.bf16.msra.mxu0 %v4777_v5 }
 0x2f8   :  { %v2338_v55 = vpop.f32.mrf.mxu2 }
 0x2f9   :  { %v2339_v42 = vadd.f32 %v2338_v55, %v2290_v36  ;;  %v2243_v38 = vpop.f32.mrf.mxu0 }
 0x2fa   :  { %v2244_v13 = vadd.f32 %v2243_v38, %v7766_v15  ;;  %v5030_v15 = vld [vmem:[%s9017_s1 + $0x518] sm:$0xf0] }
 0x2fb   :  { %v2387_v2 = vpop.f32.mrf.mxu3  ;;  %v2292_v56 = vpop.f32.mrf.mxu1  ;;  %v5033_v53 = vor.u32 %v5611_v48, %v5030_v15 }
 0x2fc   :  { %v7993_v0 = vadd.f32 %v2387_v2, %v2339_v42  ;;  %v2293_v3 = vadd.f32 %v2292_v56, %v2244_v13  ;;  %5183 = vmatmul.msk.bf16.gmra.mxu0 %vm1400_vm0, %v9216_v14  ;;  %v5579_v42 = vld [vmem:[%s9017_s1 + $0x40c] sm:$0xf]  ;;  %v4902_v2 = vld [vmem:[%s9017_s1 + $0x418] sm:$0xf0] }
 0x2fd   :  { %2536 = vmatmul.bf16.gmra.mxu2 %v9218_v12  ;;  %v4905_v13 = vor.u32 %v5579_v42, %v4902_v2 }
 0x2fe   :  { %2487 = vmatmul.bf16.gmra.mxu1 %v9217_v35  ;;  %2706 = vmatpush.bf16.msra.mxu2 %v5033_v53  ;;  %v9219_v53 = vld [vmem:[#allocation44_spill] sm:$0xff] }
 0x2ff   :  { %2657 = vmatpush.bf16.msra.mxu1 %v4905_v13 }
 0x300   :  { %2585 = vmatmul.bf16.gmra.mxu3 %v6417_v57  ;;  %v2341_v24 = vpop.f32.mrf.mxu2 }
 0x301   :  { %v2342_v57 = vadd.f32 %v2341_v24, %v2293_v3  ;;  %v2245_v6 = vpop.f32.mrf.mxu0  ;;  %v9221_v24 = vld [vmem:[#allocation23_spill] sm:$0xff] }
 0x302   :  { %v2246_v36 = vadd.f32 %v2245_v6, %v7778_v31 }
 0x303   :  { %v2390_v21 = vpop.f32.mrf.mxu3  ;;  %v2294_v25 = vpop.f32.mrf.mxu1 }
 0x304   :  { %v8013_v55 = vadd.f32 %v2390_v21, %v2342_v57  ;;  %v2295_v38 = vadd.f32 %v2294_v25, %v2246_v36 }
 0x308   :  { %v2343_v56 = vpop.f32.mrf.mxu2 }
 0x309   :  { %v2344_v3 = vadd.f32 %v2343_v56, %v2295_v38  ;;  %v2248_v12 = vpop.f32.mrf.mxu0 }
 0x30a   :  { %v2249_v31 = vadd.f32 %v2248_v12, %v7804_v8 }
 0x30b   :  { %v2392_v35 = vpop.f32.mrf.mxu3  ;;  %v2297_v48 = vpop.f32.mrf.mxu1 }
 0x30c   :  { %v8022_v15 = vadd.f32 %v2392_v35, %v2344_v3  ;;  %v2298_v28 = vadd.f32 %v2297_v48, %v2249_v31  ;;  %5184 = vmatmul.msk.bf16.gmra.mxu0 %vm1400_vm0, %v9219_v53 }
 0x30d   :  { %2541 = vmatmul.bf16.gmra.mxu2 %v9221_v24 }
 0x30e   :  { %2492 = vmatmul.bf16.gmra.mxu1 %v9220_v41 }
 0x310   :  { %2590 = vmatmul.bf16.gmra.mxu3 %v6471_v18  ;;  %v2346_v5 = vpop.f32.mrf.mxu2 }
 0x311   :  { %v2347_v57 = vadd.f32 %v2346_v5, %v2298_v28  ;;  %v2250_v6 = vpop.f32.mrf.mxu0 }
 0x312   :  { %v2251_v36 = vadd.f32 %v2250_v6, %v7816_v20  ;;  %v9222_v20 = vld [vmem:[#allocation25_spill] sm:$0xff] }
 0x313   :  { %v2395_v21 = vpop.f32.mrf.mxu3  ;;  %v2299_v8 = vpop.f32.mrf.mxu1 }
 0x314   :  { %v8030_v25 = vadd.f32 %v2395_v21, %v2347_v57  ;;  %v2300_v42 = vadd.f32 %v2299_v8, %v2251_v36  ;;  %v5380_v57 = vld [vmem:[#allocation3 + $0x170] sm:$0xf]  ;;  %v5693_v21 = vld [vmem:[#allocation3 + $0x174] sm:$0xf0] }
 0x315   :  { %v5381_v36 = vor.u32 %v5693_v21, %v5380_v57  ;;  %v5252_v8 = vld [vmem:[#allocation3 + $0x70] sm:$0xf]  ;;  %v9224_v21 = vld [vmem:[#allocation28_spill] sm:$0xff] }
 0x317   :  { %3445 = vmatpush.bf16.msrb.mxu2 %v5381_v36 }
 0x318   :  { %v2348_v2 = vpop.f32.mrf.mxu2 }
 0x319   :  { %v2349_v38 = vadd.f32 %v2348_v2, %v2300_v42  ;;  %v2253_v56 = vpop.f32.mrf.mxu0  ;;  %v5444_v42 = vld [vmem:[#allocation3 + $0x1f0] sm:$0xf] }
 0x31a   :  { %v2254_v3 = vadd.f32 %v2253_v56, %v7836_v47 }
 0x31b   :  { %v2397_v13 = vpop.f32.mrf.mxu3  ;;  %v2302_v35 = vpop.f32.mrf.mxu1 }
 0x31c   :  { %v8033_v12 = vadd.f32 %v2397_v13, %v2349_v38  ;;  %v2303_v18 = vadd.f32 %v2302_v35, %v2254_v3  ;;  %5185 = vmatmul.msk.bf16.gmra.mxu0 %vm1400_vm0, %v9187_v1  ;;  %v5709_v38 = vld [vmem:[#allocation3 + $0x1f4] sm:$0xf0] }
 0x31d   :  { %2546 = vmatmul.bf16.gmra.mxu2 %v9222_v20  ;;  %v5677_v13 = vld [vmem:[#allocation3 + $0xf4] sm:$0xf0]  ;;  %v5445_v3 = vor.u32 %v5709_v38, %v5444_v42 }
 0x31e   :  { %2497 = vmatmul.bf16.gmra.mxu1 %v9188_v17  ;;  %v5661_v17 = vld [vmem:[#allocation3 + $0x74] sm:$0xf0] }
 0x31f   :  { %v5253_v2 = vor.u32 %v5661_v17, %v5252_v8  ;;  %3494 = vmatpush.bf16.msrb.mxu3 %v5445_v3 }
 0x320   :  { %2595 = vmatmul.bf16.gmra.mxu3 %v9198_v50  ;;  %v2351_v31 = vpop.f32.mrf.mxu2  ;;  %v5316_v50 = vld [vmem:[#allocation3 + $0xf0] sm:$0xf] }
 0x321   :  { %v2352_v48 = vadd.f32 %v2351_v31, %v2303_v18  ;;  %v2255_v41 = vpop.f32.mrf.mxu0  ;;  %v5317_v35 = vor.u32 %v5677_v13, %v5316_v50  ;;  %v5781_v31 = vld [vmem:[%s9018_s2] sm:$0xf]  ;;  %3347 = vmatpush.bf16.msrb.mxu0 %v5253_v2 }
 0x322   :  { %v2256_v24 = vadd.f32 %v2255_v41, %v7848_v52  ;;  %v5372_v13 = vld [vmem:[#allocation3 + $0x160] sm:$0xf] }
 0x323   :  { %v2400_v28 = vpop.f32.mrf.mxu3  ;;  %v2304_v47 = vpop.f32.mrf.mxu1  ;;  %3396 = vmatpush.bf16.msrb.mxu1 %v5317_v35 }
 0x324   :  { %v8041_v5 = vadd.f32 %v2400_v28, %v2352_v48  ;;  %v2305_v6 = vadd.f32 %v2304_v47, %v2256_v24  ;;  %v8046_v48 = vperm.slane %v5781_v31, 3  ;;  %v9223_v47 = vld [vmem:[#allocation11_spill] sm:$0xff]  ;;  %v5659_v31 = vld [vmem:[#allocation3 + $0x64] sm:$0xf0] }
 0x328   :  { %v2353_v56 = vpop.f32.mrf.mxu2 }
 0x329   :  { %v2354_v18 = vadd.f32 %v2353_v56, %v2305_v6  ;;  %v2414_v20 = vpop.f32.mrf.mxu0  ;;  %v9225_v6 = vld [vmem:[#allocation29_spill] sm:$0xff] }
 0x32a   :  { %v2415_v28 = vadd.f32 %v2414_v20, %v7868_v34  ;;  %v5691_v56 = vld [vmem:[#allocation3 + $0x164] sm:$0xf0]  ;;  %v5244_v20 = vld [vmem:[#allocation3 + $0x60] sm:$0xf] }
 0x32b   :  { %v2402_v52 = vpop.f32.mrf.mxu3  ;;  %v2463_v41 = vpop.f32.mrf.mxu1  ;;  %v5373_v35 = vor.u32 %v5691_v56, %v5372_v13 }
 0x32c   :  { %v8049_v24 = vadd.f32 %v2402_v52, %v2354_v18  ;;  %2609 = vmatmul.bf16.vlgmr.msra.gmra.mxu0 %v9223_v47  ;;  %v2464_v57 = vadd.f32 %v2463_v41, %v8046_v48  ;;  %v2799_v42 = vmul.f32 0.2, %v2415_v28  ;;  %v5245_v47 = vor.u32 %v5659_v31, %v5244_v20  ;;  %v5689_v31 = vld [vmem:[#allocation3 + $0x154] sm:$0xf0] }
 0x32d   :  { %2707 = vmatmul.bf16.vlgmr.msra.gmra.mxu2 %v9225_v6  ;;  %v5675_v6 = vld [vmem:[#allocation3 + $0xe4] sm:$0xf0] }
 0x32e   :  { %2658 = vmatmul.bf16.vlgmr.msra.gmra.mxu1 %v9224_v21  ;;  %v2863_v18 = vmax.f32 %v2415_v28, %v2799_v42  ;;  %3446 = vmatpush.bf16.msrb.mxu2 %v5373_v35  ;;  %v5308_v21 = vld [vmem:[#allocation3 + $0xe0] sm:$0xf] }
 0x32f   :  { %3348 = vmatpush.bf16.msrb.mxu0 %v5245_v47 }
 0x330   :  { %5186 = vmatmul.msk.bf16.vlgmr.msra.gmra.mxu3 %vm1400_vm0, %v9165_v30  ;;  %v2512_v36 = vpop.f32.mrf.mxu2  ;;  %v5436_v30 = vld [vmem:[#allocation3 + $0x1e0] sm:$0xf] }
 0x331   :  { %v2513_v8 = vadd.f32 %v2512_v36, %v2464_v57  ;;  %v2416_v34 = vpop.f32.mrf.mxu0  ;;  %v5707_v57 = vld [vmem:[#allocation3 + $0x1e4] sm:$0xf0] }
 0x332   :  { %v2417_v2 = vadd.f32 %v2416_v34, %v7877_v45 }
 0x333   :  { %v2561_v17 = vpop.f32.mrf.mxu3  ;;  %v2465_v38 = vpop.f32.mrf.mxu1 }
 0x334   :  { %v8058_v50 = vadd.f32 %v2561_v17, %v2513_v8  ;;  %v2803_v3 = vmul.f32 0.2, %v2417_v2  ;;  %v2466_v41 = vadd.f32 %v2465_v38, %v8046_v48  ;;  %v5437_v8 = vor.u32 %v5707_v57, %v5436_v30  ;;  %v5657_v57 = vld [vmem:[#allocation3 + $0x54] sm:$0xf0] }
 0x335   :  { %v5309_v17 = vor.u32 %v5675_v6, %v5308_v21 }
 0x336   :  { %v2867_v52 = vmax.f32 %v2417_v2, %v2803_v3  ;;  %3495 = vmatpush.bf16.msrb.mxu3 %v5437_v8  ;;  %v5300_v8 = vld [vmem:[#allocation3 + $0xd0] sm:$0xf] }
 0x337   :  { %3397 = vmatpush.bf16.msrb.mxu1 %v5309_v17  ;;  %v5673_v17 = vld [vmem:[#allocation3 + $0xd4] sm:$0xf0] }
 0x338   :  { %v8061_v45 = vpack.c.bf16 %v2867_v52, %v2863_v18  ;;  %v2514_v36 = vpop.f32.mrf.mxu2 }
 0x339   :  { %v2515_v34 = vadd.f32 %v2514_v36, %v2466_v41  ;;  %v2419_v13 = vpop.f32.mrf.mxu0  ;;  %v5705_v36 = vld [vmem:[#allocation3 + $0x1d4] sm:$0xf0] }
 0x33a   :  { %v2420_v28 = vadd.f32 %v2419_v13, %v7897_v54  ;;  %v5301_v13 = vor.u32 %v5673_v17, %v5300_v8 }
 0x33b   :  { %v2563_v49 = vpop.f32.mrf.mxu3  ;;  %v2468_v42 = vpop.f32.mrf.mxu1 }
 0x33c   :  { %v8064_v2 = vadd.f32 %v2563_v49, %v2515_v34  ;;  %2614 = vmatmul.bf16.gmra.mxu0 %v6203_v22  ;;  %v2469_v38 = vadd.f32 %v2468_v42, %v8046_v48  ;;  %v2807_v18 = vmul.f32 0.2, %v2420_v28  ;;  %v5364_v22 = vld [vmem:[#allocation3 + $0x150] sm:$0xf]  ;;  %3398 = vmatpush.bf16.msrb.mxu1 %v5301_v13  ;;  %v5671_v13 = vld [vmem:[#allocation3 + $0xc4] sm:$0xf0] }
 0x33d   :  { %2712 = vmatmul.bf16.gmra.mxu2 %v9168_v26  ;;  %v5365_v41 = vor.u32 %v5689_v31, %v5364_v22  ;;  %v5236_v26 = vld [vmem:[#allocation3 + $0x50] sm:$0xf] }
 0x33e   :  { %2663 = vmatmul.bf16.gmra.mxu1 %v6643_v46  ;;  %v2871_v46 = vmax.f32 %v2420_v28, %v2807_v18  ;;  %v5237_v6 = vor.u32 %v5657_v57, %v5236_v26  ;;  %v5687_v26 = vld [vmem:[#allocation3 + $0x144] sm:$0xf0] }
 0x33f   :  { %3447 = vmatpush.bf16.msrb.mxu2 %v5365_v41 }
 0x340   :  { %5187 = vmatmul.msk.bf16.gmra.mxu3 %vm1400_vm0, %v9204_v16  ;;  %v2517_v56 = vpop.f32.mrf.mxu2  ;;  %v5428_v16 = vld [vmem:[#allocation3 + $0x1d0] sm:$0xf]  ;;  %3349 = vmatpush.bf16.msrb.mxu0 %v5237_v6  ;;  %v5228_v6 = vld [vmem:[#allocation3 + $0x40] sm:$0xf] }
 0x341   :  { %v2518_v3 = vadd.f32 %v2517_v56, %v2469_v38  ;;  %v2421_v54 = vpop.f32.mrf.mxu0  ;;  %v5429_v34 = vor.u32 %v5705_v36, %v5428_v16  ;;  %v5655_v36 = vld [vmem:[#allocation3 + $0x44] sm:$0xf0] }
 0x342   :  { %v2422_v52 = vadd.f32 %v2421_v54, %v7906_v51  ;;  %v5229_v17 = vor.u32 %v5655_v36, %v5228_v6  ;;  %v5653_v36 = vld [vmem:[#allocation3 + $0x34] sm:$0xf0] }
 0x343   :  { %v2566_v35 = vpop.f32.mrf.mxu3  ;;  %v2470_v49 = vpop.f32.mrf.mxu1  ;;  %3496 = vmatpush.bf16.msrb.mxu3 %v5429_v34  ;;  %v5292_v34 = vld [vmem:[#allocation3 + $0xc0] sm:$0xf] }
 0x344   :  { %v8073_v20 = vadd.f32 %v2566_v35, %v2518_v3  ;;  %v2811_v30 = vmul.f32 0.2, %v2422_v52  ;;  %v2471_v21 = vadd.f32 %v2470_v49, %v8046_v48  ;;  %3350 = vmatpush.bf16.msrb.mxu0 %v5229_v17  ;;  %v5701_v17 = vld [vmem:[#allocation3 + $0x1b4] sm:$0xf0] }
 0x346   :  { %v2875_v47 = vmax.f32 %v2422_v52, %v2811_v30  ;;  %v9226_v52 = vld [vmem:[#allocation34_spill] sm:$0xff] }
 0x348   :  { %v2519_v51 = vpop.f32.mrf.mxu2  ;;  %v8076_v42 = vpack.c.bf16 %v2875_v47, %v2871_v46 }
 0x349   :  { %v2520_v38 = vadd.f32 %v2519_v51, %v2471_v21  ;;  %v2424_v3 = vpop.f32.mrf.mxu0  ;;  %v5703_v51 = vld [vmem:[#allocation3 + $0x1c4] sm:$0xf0] }
 0x34a   :  { %v2425_v28 = vadd.f32 %v2424_v3, %v7926_v59 }
 0x34b   :  { %v2568_v56 = vpop.f32.mrf.mxu3  ;;  %v2473_v35 = vpop.f32.mrf.mxu1 }
 0x34c   :  { %v8079_v54 = vadd.f32 %v2568_v56, %v2520_v38  ;;  %2619 = vmatmul.bf16.gmra.mxu0 %v6257_v43  ;;  %v2474_v18 = vadd.f32 %v2473_v35, %v8046_v48  ;;  %v2815_v30 = vmul.f32 0.2, %v2425_v28  ;;  %v5356_v43 = vld [vmem:[#allocation3 + $0x140] sm:$0xf]  ;;  %v5293_v56 = vor.u32 %v5671_v13, %v5292_v34  ;;  %v5669_v34 = vld [vmem:[#allocation3 + $0xb4] sm:$0xf0] }
 0x34d   :  { %2717 = vmatmul.bf16.gmra.mxu2 %v9226_v52  ;;  %v5357_v16 = vor.u32 %v5687_v26, %v5356_v43 }
 0x34e   :  { %2668 = vmatmul.bf16.gmra.mxu1 %v9191_v40  ;;  %v2879_v40 = vmax.f32 %v2425_v28, %v2815_v30 }
 0x34f   :  { %3448 = vmatpush.bf16.msrb.mxu2 %v5357_v16  ;;  %3399 = vmatpush.bf16.msrb.mxu1 %v5293_v56  ;;  %v5685_v16 = vld [vmem:[#allocation3 + $0x134] sm:$0xf0] }
 0x350   :  { %5188 = vmatmul.msk.bf16.gmra.mxu3 %vm1400_vm0, %v9207_v61  ;;  %v2522_v49 = vpop.f32.mrf.mxu2  ;;  %v5420_v61 = vld [vmem:[#allocation3 + $0x1c0] sm:$0xf] }
 0x351   :  { %v2523_v22 = vadd.f32 %v2522_v49, %v2474_v18  ;;  %v2426_v59 = vpop.f32.mrf.mxu0  ;;  %v5421_v38 = vor.u32 %v5703_v51, %v5420_v61  ;;  %v5284_v51 = vld [vmem:[#allocation3 + $0xb0] sm:$0xf] }
 0x352   :  { %v2427_v41 = vadd.f32 %v2426_v59, %v7935_v32 }
 0x353   :  { %v2571_v31 = vpop.f32.mrf.mxu3  ;;  %v2475_v46 = vpop.f32.mrf.mxu1  ;;  %3497 = vmatpush.bf16.msrb.mxu3 %v5421_v38 }
 0x354   :  { %v8088_v47 = vadd.f32 %v2571_v31, %v2523_v22  ;;  %v2819_v57 = vmul.f32 0.2, %v2427_v41  ;;  %v2476_v8 = vadd.f32 %v2475_v46, %v8046_v48 }
 0x356   :  { %v2883_v21 = vmax.f32 %v2427_v41, %v2819_v57 }
 0x358   :  { %v2524_v32 = vpop.f32.mrf.mxu2  ;;  %v8091_v3 = vpack.c.bf16 %v2883_v21, %v2879_v40 }
 0x359   :  { %v2525_v35 = vadd.f32 %v2524_v32, %v2476_v8  ;;  %v2429_v52 = vpop.f32.mrf.mxu0  ;;  %v5285_v32 = vor.u32 %v5669_v34, %v5284_v51 }
 0x35a   :  { %v2430_v28 = vadd.f32 %v2429_v52, %v7955_v7 }
 0x35b   :  { %v2573_v18 = vpop.f32.mrf.mxu3  ;;  %v2478_v49 = vpop.f32.mrf.mxu1  ;;  %3400 = vmatpush.bf16.msrb.mxu1 %v5285_v32 }
 0x35c   :  { %v8094_v22 = vadd.f32 %v2573_v18, %v2525_v35  ;;  %2624 = vmatmul.bf16.gmra.mxu0 %v6311_v4  ;;  %v2479_v31 = vadd.f32 %v2478_v49, %v8046_v48  ;;  %v2823_v46 = vmul.f32 0.2, %v2430_v28  ;;  %v5348_v4 = vld [vmem:[#allocation3 + $0x130] sm:$0xf] }
 0x35d   :  { %2722 = vmatmul.bf16.gmra.mxu2 %v9174_v60  ;;  %v5349_v21 = vor.u32 %v5685_v16, %v5348_v4  ;;  %v5220_v60 = vld [vmem:[#allocation3 + $0x30] sm:$0xf]  ;;  %v5683_v4 = vld [vmem:[#allocation3 + $0x124] sm:$0xf0] }
 0x35e   :  { %2673 = vmatmul.bf16.gmra.mxu1 %v6761_v9  ;;  %v2887_v9 = vmax.f32 %v2430_v28, %v2823_v46  ;;  %v5221_v8 = vor.u32 %v5653_v36, %v5220_v60  ;;  %v5699_v36 = vld [vmem:[#allocation3 + $0x1a4] sm:$0xf0] }
 0x35f   :  { %3449 = vmatpush.bf16.msrb.mxu2 %v5349_v21 }
 0x360   :  { %5189 = vmatmul.msk.bf16.gmra.mxu3 %vm1400_vm0, %v9210_v37  ;;  %v2527_v59 = vpop.f32.mrf.mxu2  ;;  %v5412_v37 = vld [vmem:[#allocation3 + $0x1b0] sm:$0xf]  ;;  %3351 = vmatpush.bf16.msrb.mxu0 %v5221_v8 }
 0x361   :  { %v2528_v30 = vadd.f32 %v2527_v59, %v2479_v31  ;;  %v2431_v7 = vpop.f32.mrf.mxu0  ;;  %v5413_v13 = vor.u32 %v5701_v17, %v5412_v37  ;;  %v5276_v37 = vld [vmem:[#allocation3 + $0xa0] sm:$0xf] }
 0x362   :  { %v2432_v43 = vadd.f32 %v2431_v7, %v7964_v63 }
 0x363   :  { %v2576_v41 = vpop.f32.mrf.mxu3  ;;  %v2480_v26 = vpop.f32.mrf.mxu1  ;;  %3498 = vmatpush.bf16.msrb.mxu3 %v5413_v13 }
 0x364   :  { %v8103_v57 = vadd.f32 %v2576_v41, %v2528_v30  ;;  %v2827_v40 = vmul.f32 0.2, %v2432_v43  ;;  %v2481_v61 = vadd.f32 %v2480_v26, %v8046_v48 }
 0x366   :  { %v2891_v6 = vmax.f32 %v2432_v43, %v2827_v40 }
 0x368   :  { %v2529_v63 = vpop.f32.mrf.mxu2  ;;  %v8106_v38 = vpack.c.bf16 %v2891_v6, %v2887_v9  ;;  %v5651_v9 = vld [vmem:[#allocation3 + $0x24] sm:$0xf0] }
 0x369   :  { %v2530_v56 = vadd.f32 %v2529_v63, %v2481_v61  ;;  %v2434_v18 = vpop.f32.mrf.mxu0  ;;  %v5667_v61 = vld [vmem:[#allocation3 + $0xa4] sm:$0xf0] }
 0x36a   :  { %v2435_v52 = vadd.f32 %v2434_v18, %v7984_v44  ;;  %v5277_v17 = vor.u32 %v5667_v61, %v5276_v37 }
 0x36b   :  { %v2578_v35 = vpop.f32.mrf.mxu3  ;;  %v2483_v28 = vpop.f32.mrf.mxu1 }
 0x36c   :  { %v8109_v49 = vadd.f32 %v2578_v35, %v2530_v56  ;;  %2629 = vmatmul.bf16.gmra.mxu0 %v6365_v29  ;;  %v2484_v31 = vadd.f32 %v2483_v28, %v8046_v48  ;;  %v2831_v7 = vmul.f32 0.2, %v2435_v52  ;;  %v5340_v29 = vld [vmem:[#allocation3 + $0x120] sm:$0xf]  ;;  %3401 = vmatpush.bf16.msrb.mxu1 %v5277_v17  ;;  %v5663_v17 = vld [vmem:[#allocation3 + $0x84] sm:$0xf0] }
 0x36d   :  { %2727 = vmatmul.bf16.gmra.mxu2 %v9177_v33  ;;  %v5341_v40 = vor.u32 %v5683_v4, %v5340_v29  ;;  %v5212_v33 = vld [vmem:[#allocation3 + $0x20] sm:$0xf]  ;;  %v5268_v29 = vld [vmem:[#allocation3 + $0x90] sm:$0xf]  ;;  %v5665_v4 = vld [vmem:[#allocation3 + $0x94] sm:$0xf0] }
 0x36e   :  { %2678 = vmatmul.bf16.gmra.mxu1 %v6820_v11  ;;  %v2895_v11 = vmax.f32 %v2435_v52, %v2831_v7  ;;  %v5213_v60 = vor.u32 %v5651_v9, %v5212_v33 }
 0x36f   :  { %3450 = vmatpush.bf16.msrb.mxu2 %v5341_v40  ;;  %v5396_v40 = vld [vmem:[#allocation3 + $0x190] sm:$0xf] }
 0x370   :  { %5190 = vmatmul.msk.bf16.gmra.mxu3 %vm1400_vm0, %v9213_v19  ;;  %v2532_v59 = vpop.f32.mrf.mxu2  ;;  %v5404_v19 = vld [vmem:[#allocation3 + $0x1a0] sm:$0xf]  ;;  %3352 = vmatpush.bf16.msrb.mxu0 %v5213_v60 }
 0x371   :  { %v2533_v30 = vadd.f32 %v2532_v59, %v2484_v31  ;;  %v2436_v44 = vpop.f32.mrf.mxu0  ;;  %v5405_v8 = vor.u32 %v5699_v36, %v5404_v19  ;;  %v5196_v19 = vld [vmem:[#allocation3] sm:$0xf] }
 0x372   :  { %v2437_v46 = vadd.f32 %v2436_v44, %v7993_v0  ;;  %v5681_v44 = vld [vmem:[#allocation3 + $0x114] sm:$0xf0]  ;;  %v5260_v60 = vld [vmem:[#allocation3 + $0x80] sm:$0xf] }
 0x373   :  { %v2581_v41 = vpop.f32.mrf.mxu3  ;;  %v2485_v43 = vpop.f32.mrf.mxu1  ;;  %3499 = vmatpush.bf16.msrb.mxu3 %v5405_v8 }
 0x374   :  { %v8118_v26 = vadd.f32 %v2581_v41, %v2533_v30  ;;  %v2835_v16 = vmul.f32 0.2, %v2437_v46  ;;  %v2486_v6 = vadd.f32 %v2485_v43, %v8046_v48  ;;  %v5649_v43 = vld [vmem:[#allocation3 + $0x14] sm:$0xf0] }
 0x376   :  { %v2899_v21 = vmax.f32 %v2437_v46, %v2835_v16 }
 0x378   :  { %v2534_v0 = vpop.f32.mrf.mxu2  ;;  %v8121_v51 = vpack.c.bf16 %v2899_v21, %v2895_v11  ;;  %v5697_v11 = vld [vmem:[#allocation3 + $0x194] sm:$0xf0]  ;;  %v5269_v21 = vor.u32 %v5665_v4, %v5268_v29  ;;  %v5695_v29 = vld [vmem:[#allocation3 + $0x184] sm:$0xf0] }
 0x379   :  { %v8123_v34 = vadd.f32 %v2534_v0, %v2486_v6  ;;  %v2439_v13 = vpop.f32.mrf.mxu0  ;;  %v5397_v33 = vor.u32 %v5697_v11, %v5396_v40  ;;  %v5647_v6 = vld [vmem:[#allocation3 + $0x4] sm:$0xf0] }
 0x37a   :  { %v2440_v32 = vadd.f32 %v2439_v13, %v8013_v55  ;;  %3402 = vmatpush.bf16.msrb.mxu1 %v5269_v21  ;;  %v5197_v8 = vor.u32 %v5647_v6, %v5196_v19  ;;  %v5324_v13 = vld [vmem:[#allocation3 + $0x100] sm:$0xf] }
 0x37b   :  { %v8125_v63 = vpop.f32.mrf.mxu3  ;;  %v2488_v56 = vpop.f32.mrf.mxu1  ;;  %3500 = vmatpush.bf16.msrb.mxu3 %v5397_v33  ;;  %v9228_v33 = vld [vmem:[#allocation45_spill] sm:$0xff] }
 0x37c   :  { %2634 = vmatmul.bf16.gmra.mxu0 %v6419_v58  ;;  %v2489_v35 = vadd.f32 %v2488_v56, %v8046_v48  ;;  %v2839_v59 = vmul.f32 0.2, %v2440_v32  ;;  %v5332_v58 = vld [vmem:[#allocation3 + $0x110] sm:$0xf] }
 0x37d   :  { %2732 = vmatmul.bf16.gmra.mxu2 %v9180_v62  ;;  %v5333_v46 = vor.u32 %v5681_v44, %v5332_v58 }
 0x37e   :  { %2683 = vmatmul.bf16.gmra.mxu1 %v6879_v10  ;;  %v5204_v10 = vld [vmem:[#allocation3 + $0x10] sm:$0xf] }
 0x37f   :  { %v5205_v62 = vor.u32 %v5649_v43, %v5204_v10  ;;  %3451 = vmatpush.bf16.msrb.mxu2 %v5333_v46 }
 0x380   :  { %5191 = vmatmul.msk.bf16.gmra.mxu3 %vm1400_vm0, %v9216_v14  ;;  %v2537_v18 = vpop.f32.mrf.mxu2  ;;  %v2903_v14 = vmax.f32 %v2440_v32, %v2839_v59  ;;  %v5679_v32 = vld [vmem:[#allocation3 + $0x104] sm:$0xf0] }
 0x381   :  { %v2538_v52 = vadd.f32 %v2537_v18, %v2489_v35  ;;  %v2441_v31 = vpop.f32.mrf.mxu0  ;;  %3353 = vmatpush.bf16.msrb.mxu0 %v5205_v62  ;;  %v5261_v18 = vor.u32 %v5663_v17, %v5260_v60  ;;  %v5388_v62 = vld [vmem:[#allocation3 + $0x180] sm:$0xf] }
 0x382   :  { %v2442_v55 = vadd.f32 %v2441_v31, %v8022_v15  ;;  %v9227_v31 = vld [vmem:[#allocation43_spill] sm:$0xff] }
 0x383   :  { %v2586_v28 = vpop.f32.mrf.mxu3  ;;  %v2490_v30 = vpop.f32.mrf.mxu1  ;;  %3403 = vmatpush.bf16.msrb.mxu1 %v5261_v18  ;;  %v5692_v18 = vld [vmem:[#allocation3 + $0x174] sm:$0xf] }
 0x384   :  { %v8135_v41 = vadd.f32 %v2586_v28, %v2538_v52  ;;  %v2843_v7 = vmul.f32 0.2, %v2442_v55  ;;  %v2491_v15 = vadd.f32 %v2490_v30, %v8046_v48  ;;  %v5325_v52 = vor.u32 %v5679_v32, %v5324_v13 }
 0x385   :  { %3354 = vmatpush.bf16.msrb.mxu0 %v5197_v8 }
 0x386   :  { %v2907_v16 = vmax.f32 %v2442_v55, %v2843_v7  ;;  %3452 = vmatpush.bf16.msrb.mxu2 %v5325_v52  ;;  %v5382_v52 = vld [vmem:[#allocation3 + $0x178] sm:$0xf0] }
 0x388   :  { %v2539_v9 = vpop.f32.mrf.mxu2  ;;  %v8138_v36 = vpack.c.bf16 %v2907_v16, %v2903_v14 }
 0x389   :  { %v8140_v37 = vadd.f32 %v2539_v9, %v2491_v15  ;;  %v2444_v0 = vpop.f32.mrf.mxu0  ;;  %v9229_v9 = vld [vmem:[#allocation46_spill] sm:$0xff] }
 0x38a   :  { %v2445_v56 = vadd.f32 %v2444_v0, %v8030_v25 }
 0x38b   :  { %v8142_v61 = vpop.f32.mrf.mxu3  ;;  %v2493_v35 = vpop.f32.mrf.mxu1 }
 0x38c   :  { %2639 = vmatmul.bf16.gmra.mxu0 %v6473_v23  ;;  %v2494_v28 = vadd.f32 %v2493_v35, %v8046_v48  ;;  %v2847_v58 = vmul.f32 0.2, %v2445_v56 }
 0x38d   :  { %2737 = vmatmul.bf16.gmra.mxu2 %v9227_v31 }
 0x38e   :  { %2688 = vmatmul.bf16.gmra.mxu1 %v9196_v39  ;;  %v2911_v10 = vmax.f32 %v2445_v56, %v2847_v58 }
 0x390   :  { %5192 = vmatmul.msk.bf16.gmra.mxu3 %vm1400_vm0, %v9219_v53  ;;  %v2542_v59 = vpop.f32.mrf.mxu2  ;;  %v5389_v53 = vor.u32 %v5695_v29, %v5388_v62  ;;  %v9230_v62 = vld [vmem:[#allocation48_spill] sm:$0xff] }
 0x391   :  { %v2543_v55 = vadd.f32 %v2542_v59, %v2494_v28  ;;  %v2446_v30 = vpop.f32.mrf.mxu0  ;;  %v5660_v28 = vld [vmem:[#allocation3 + $0x74] sm:$0xf]  ;;  %v5254_v59 = vld [vmem:[#allocation3 + $0x78] sm:$0xf0] }
 0x392   :  { %v2447_v44 = vadd.f32 %v2446_v30, %v8033_v12  ;;  %3501 = vmatpush.bf16.msrb.mxu3 %v5389_v53 }
 0x393   :  { %v2591_v25 = vpop.f32.mrf.mxu3  ;;  %v2495_v7 = vpop.f32.mrf.mxu1 }
 0x394   :  { %v8152_v23 = vadd.f32 %v2591_v25, %v2543_v55  ;;  %v2851_v46 = vmul.f32 0.2, %v2447_v44  ;;  %v2496_v39 = vadd.f32 %v2495_v7, %v8046_v48  ;;  %v5708_v55 = vld [vmem:[#allocation3 + $0x1f4] sm:$0xf]  ;;  %v5446_v25 = vld [vmem:[#allocation3 + $0x1f8] sm:$0xf0]  ;;  %v5257_v7 = vor.u32 %v5660_v28, %v5254_v59 }
 0x396   :  { %v2915_v43 = vmax.f32 %v2447_v44, %v2851_v46  ;;  %v5449_v46 = vor.u32 %v5708_v55, %v5446_v25  ;;  %3543 = vmatpush.bf16.msra.mxu0 %v5257_v7 }
 0x398   :  { %v2544_v4 = vpop.f32.mrf.mxu2  ;;  %v8155_v14 = vpack.c.bf16 %v2915_v43, %v2911_v10  ;;  %v5676_v10 = vld [vmem:[#allocation3 + $0xf4] sm:$0xf]  ;;  %v5318_v43 = vld [vmem:[#allocation3 + $0xf8] sm:$0xf0]  ;;  %3690 = vmatpush.bf16.msra.mxu3 %v5449_v46 }
 0x399   :  { %v8157_v16 = vadd.f32 %v2544_v4, %v2496_v39  ;;  %v2449_v11 = vpop.f32.mrf.mxu0  ;;  %v5321_v39 = vor.u32 %v5676_v10, %v5318_v43  ;;  %v9231_v4 = vld [vmem:[#allocation31_spill] sm:$0xff]  ;;  %v9233_v10 = vld [vmem:[#allocation36_spill] sm:$0xff] }
 0x39a   :  { %v2450_v12 = vadd.f32 %v2449_v11, %v8041_v5 }
 0x39b   :  { %v8159_v40 = vpop.f32.mrf.mxu3  ;;  %v2498_v21 = vpop.f32.mrf.mxu1  ;;  %3592 = vmatpush.bf16.msra.mxu1 %v5321_v39 }
 0x39c   :  { %2644 = vmatmul.bf16.gmra.mxu0 %v9199_v27  ;;  %v2499_v15 = vadd.f32 %v2498_v21, %v8046_v48  ;;  %v2855_v8 = vmul.f32 0.2, %v2450_v12 }
 0x39d   :  { %2742 = vmatmul.bf16.gmra.mxu2 %v9229_v9 }
 0x39e   :  { %2693 = vmatmul.bf16.gmra.mxu1 %v9228_v33  ;;  %v2919_v32 = vmax.f32 %v2450_v12, %v2855_v8  ;;  %v5658_v8 = vld [vmem:[#allocation3 + $0x64] sm:$0xf] }
 0x3a0   :  { %5193 = vmatmul.msk.bf16.gmra.mxu3 %vm1400_vm0, %v9187_v1  ;;  %v2547_v19 = vpop.f32.mrf.mxu2  ;;  %v5385_v1 = vor.u32 %v5692_v18, %v5382_v52 }
 0x3a1   :  { %v2548_v6 = vadd.f32 %v2547_v19, %v2499_v15  ;;  %v2451_v0 = vpop.f32.mrf.mxu0 }
 0x3a2   :  { %v2452_v5 = vadd.f32 %v2451_v0, %v8049_v24  ;;  %3641 = vmatpush.bf16.msra.mxu2 %v5385_v1  ;;  %v5374_v0 = vld [vmem:[#allocation3 + $0x168] sm:$0xf0] }
 0x3a3   :  { %v2596_v60 = vpop.f32.mrf.mxu3  ;;  %v2500_v17 = vpop.f32.mrf.mxu1  ;;  %v5310_v1 = vld [vmem:[#allocation3 + $0xe8] sm:$0xf0] }
 0x3a4   :  { %v8169_v13 = vadd.f32 %v2596_v60, %v2548_v6  ;;  %v2859_v27 = vmul.f32 0.2, %v2452_v5  ;;  %v2501_v35 = vadd.f32 %v2500_v17, %v8046_v48  ;;  %v5690_v60 = vld [vmem:[#allocation3 + $0x164] sm:$0xf] }
 0x3a5   :  { %v5377_v17 = vor.u32 %v5690_v60, %v5374_v0  ;;  %v5366_v60 = vld [vmem:[#allocation3 + $0x158] sm:$0xf0]  ;;  %v5656_v0 = vld [vmem:[#allocation3 + $0x54] sm:$0xf] }
 0x3a6   :  { %v2923_v56 = vmax.f32 %v2452_v5, %v2859_v27  ;;  %v5706_v27 = vld [vmem:[#allocation3 + $0x1e4] sm:$0xf] }
 0x3a7   :  { %3642 = vmatpush.bf16.msra.mxu2 %v5377_v17  ;;  %v5704_v17 = vld [vmem:[#allocation3 + $0x1d4] sm:$0xf] }
 0x3a8   :  { %v2549_v31 = vpop.f32.mrf.mxu2  ;;  %v8172_v30 = vpack.c.bf16 %v2923_v56, %v2919_v32  ;;  %v5438_v32 = vld [vmem:[#allocation3 + $0x1e8] sm:$0xf0] }
 0x3a9   :  { %v8174_v58 = vadd.f32 %v2549_v31, %v2501_v35  ;;  %v2610_v44 = vpop.f32.mrf.mxu0  ;;  %v5441_v28 = vor.u32 %v5706_v27, %v5438_v32  ;;  %v5674_v31 = vld [vmem:[#allocation3 + $0xe4] sm:$0xf] }
 0x3aa   :  { %v2611_v29 = vadd.f32 %v2610_v44, %v8058_v50  ;;  %v5246_v50 = vld [vmem:[#allocation3 + $0x68] sm:$0xf0]  ;;  %v9232_v44 = vld [vmem:[#allocation49_spill] sm:$0xff] }
 0x3ab   :  { %v8176_v24 = vpop.f32.mrf.mxu3  ;;  %v2659_v48 = vpop.f32.mrf.mxu1  ;;  %v5249_v52 = vor.u32 %v5658_v8, %v5246_v50  ;;  %3691 = vmatpush.bf16.msra.mxu3 %v5441_v28  ;;  %v5430_v50 = vld [vmem:[#allocation3 + $0x1d8] sm:$0xf0] }
 0x3ac   :  { %3355 = vmatmul.bf16.vlgmr.msrb.gmra.mxu0 %v9230_v62  ;;  %v2660_v11 = vadd.f32 %v2659_v48, %v2611_v29  ;;  %v5302_v28 = vld [vmem:[#allocation3 + $0xd8] sm:$0xf0] }
 0x3ad   :  { %3453 = vmatmul.bf16.vlgmr.msrb.gmra.mxu2 %v8061_v45  ;;  %3544 = vmatpush.bf16.msra.mxu0 %v5249_v52  ;;  %v5672_v52 = vld [vmem:[#allocation3 + $0xd4] sm:$0xf] }
 0x3ae   :  { %3404 = vmatmul.bf16.vlgmr.msrb.gmra.mxu1 %v9231_v4 }
 0x3b0   :  { %v2708_v53 = vpop.f32.mrf.mxu2 }
 0x3b1   :  { %v2612_v21 = vpop.f32.mrf.mxu0  ;;  %v2709_v33 = vadd.f32 %v2708_v53, %v2660_v11 }
 0x3b2   :  { %v2613_v9 = vadd.f32 %v2612_v21, %v8064_v2  ;;  %v5313_v2 = vor.u32 %v5674_v31, %v5310_v1  ;;  %v5305_v31 = vor.u32 %v5672_v52, %v5302_v28  ;;  %v5294_v52 = vld [vmem:[#allocation3 + $0xc8] sm:$0xf0] }
 0x3b3   :  { %v2757_v12 = vpop.f32.mrf.mxu3  ;;  %v2661_v15 = vpop.f32.mrf.mxu1 }
 0x3b4   :  { %v2758_v19 = vadd.f32 %v2757_v12, %v2709_v33  ;;  %v2662_v6 = vadd.f32 %v2661_v15, %v2613_v9  ;;  %3593 = vmatpush.bf16.msra.mxu1 %v5313_v2  ;;  %v9234_v2 = vld [vmem:[#allocation50_spill] sm:$0xff] }
 0x3b6   :  { %v2800_v55 = vmul.f32 0.2, %v2758_v19 }
 0x3b8   :  { %v2710_v5 = vpop.f32.mrf.mxu2  ;;  %v2864_v43 = vmax.f32 %v2758_v19, %v2800_v55  ;;  %3594 = vmatpush.bf16.msra.mxu1 %v5305_v31 }
 0x3b9   :  { %v2711_v56 = vadd.f32 %v2710_v5, %v2662_v6  ;;  %v2615_v18 = vpop.f32.mrf.mxu0  ;;  %v5688_v6 = vld [vmem:[#allocation3 + $0x154] sm:$0xf]  ;;  %v5238_v5 = vld [vmem:[#allocation3 + $0x58] sm:$0xf0] }
 0x3ba   :  { %v2616_v46 = vadd.f32 %v2615_v18, %v8073_v20  ;;  %v5369_v19 = vor.u32 %v5688_v6, %v5366_v60  ;;  %v5433_v18 = vor.u32 %v5704_v17, %v5430_v50  ;;  %v5686_v6 = vld [vmem:[#allocation3 + $0x144] sm:$0xf]  ;;  %v5358_v60 = vld [vmem:[#allocation3 + $0x148] sm:$0xf0] }
 0x3bb   :  { %v2759_v35 = vpop.f32.mrf.mxu3  ;;  %v2664_v59 = vpop.f32.mrf.mxu1  ;;  %v5422_v17 = vld [vmem:[#allocation3 + $0x1c8] sm:$0xf0] }
 0x3bc   :  { %v2760_v25 = vadd.f32 %v2759_v35, %v2711_v56  ;;  %3360 = vmatmul.bf16.gmra.mxu0 %v9232_v44  ;;  %v2665_v53 = vadd.f32 %v2664_v59, %v2616_v46  ;;  %v5241_v35 = vor.u32 %v5656_v0, %v5238_v5  ;;  %3643 = vmatpush.bf16.msra.mxu2 %v5369_v19  ;;  %v5654_v0 = vld [vmem:[#allocation3 + $0x44] sm:$0xf]  ;;  %v5230_v19 = vld [vmem:[#allocation3 + $0x48] sm:$0xf0] }
 0x3bd   :  { %3458 = vmatmul.bf16.gmra.mxu2 %v8076_v42  ;;  %3692 = vmatpush.bf16.msra.mxu3 %v5433_v18  ;;  %v5702_v5 = vld [vmem:[#allocation3 + $0x1c4] sm:$0xf] }
 0x3be   :  { %v2804_v7 = vmul.f32 0.2, %v2760_v25  ;;  %3409 = vmatmul.bf16.gmra.mxu1 %v9233_v10  ;;  %3545 = vmatpush.bf16.msra.mxu0 %v5241_v35  ;;  %v5425_v35 = vor.u32 %v5702_v5, %v5422_v17  ;;  %v5670_v18 = vld [vmem:[#allocation3 + $0xc4] sm:$0xf]  ;;  %v5700_v5 = vld [vmem:[#allocation3 + $0x1b4] sm:$0xf] }
 0x3bf   :  { %v5297_v28 = vor.u32 %v5670_v18, %v5294_v52  ;;  %v5414_v17 = vld [vmem:[#allocation3 + $0x1b8] sm:$0xf0]  ;;  %v5668_v18 = vld [vmem:[#allocation3 + $0xb4] sm:$0xf] }
 0x3c0   :  { %v2868_v48 = vmax.f32 %v2760_v25, %v2804_v7  ;;  %v2713_v39 = vpop.f32.mrf.mxu2  ;;  %v9235_v7 = vld [vmem:[#allocation38_spill] sm:$0xff]  ;;  %v5286_v52 = vld [vmem:[#allocation3 + $0xb8] sm:$0xf0] }
 0x3c1   :  { %v2617_v12 = vpop.f32.mrf.mxu0  ;;  %v2714_v15 = vadd.f32 %v2713_v39, %v2665_v53  ;;  %3693 = vmatpush.bf16.msra.mxu3 %v5425_v35  ;;  %3595 = vmatpush.bf16.msra.mxu1 %v5297_v28  ;;  %v5417_v35 = vor.u32 %v5700_v5, %v5414_v17  ;;  %v5214_v17 = vld [vmem:[#allocation3 + $0x28] sm:$0xf0] }
 0x3c2   :  { %v8187_v29 = vpack.c.bf16 %v2868_v48, %v2864_v43  ;;  %v2618_v33 = vadd.f32 %v2617_v12, %v8079_v54 }
 0x3c3   :  { %v2762_v11 = vpop.f32.mrf.mxu3  ;;  %v2666_v21 = vpop.f32.mrf.mxu1 }
 0x3c4   :  { %3502 = vmatmul.bf16.vlgmr.msrb.gmra.mxu3 %v8187_v29  ;;  %v2763_v9 = vadd.f32 %v2762_v11, %v2714_v15  ;;  %v2667_v20 = vadd.f32 %v2666_v21, %v2618_v33 }
 0x3c5   :  { %3694 = vmatpush.bf16.msra.mxu3 %v5417_v35 }
 0x3c6   :  { %v2808_v1 = vmul.f32 0.2, %v2763_v9 }
 0x3c8   :  { %v2715_v8 = vpop.f32.mrf.mxu2  ;;  %v2872_v46 = vmax.f32 %v2763_v9, %v2808_v1  ;;  %v5361_v9 = vor.u32 %v5686_v6, %v5358_v60  ;;  %v9236_v1 = vld [vmem:[#allocation51_spill] sm:$0xff] }
 0x3c9   :  { %v2716_v27 = vadd.f32 %v2715_v8, %v2667_v20  ;;  %v2620_v56 = vpop.f32.mrf.mxu0  ;;  %v5684_v60 = vld [vmem:[#allocation3 + $0x134] sm:$0xf] }
 0x3ca   :  { %v2621_v25 = vadd.f32 %v2620_v56, %v8088_v47  ;;  %v5233_v56 = vor.u32 %v5654_v0, %v5230_v19  ;;  %3644 = vmatpush.bf16.msra.mxu2 %v5361_v9  ;;  %v5350_v0 = vld [vmem:[#allocation3 + $0x138] sm:$0xf0] }
 0x3cb   :  { %v2764_v32 = vpop.f32.mrf.mxu3  ;;  %v2669_v54 = vpop.f32.mrf.mxu1  ;;  %v5222_v19 = vld [vmem:[#allocation3 + $0x38] sm:$0xf0] }
 0x3cc   :  { %v2765_v59 = vadd.f32 %v2764_v32, %v2716_v27  ;;  %3365 = vmatmul.bf16.gmra.mxu0 %v9234_v2  ;;  %v2670_v39 = vadd.f32 %v2669_v54, %v2621_v25  ;;  %v9237_v25 = vld [vmem:[#allocation40_spill] sm:$0xff] }
 0x3cd   :  { %3463 = vmatmul.bf16.gmra.mxu2 %v8091_v3  ;;  %3546 = vmatpush.bf16.msra.mxu0 %v5233_v56 }
 0x3ce   :  { %v2812_v55 = vmul.f32 0.2, %v2765_v59  ;;  %3414 = vmatmul.bf16.gmra.mxu1 %v9235_v7 }
 0x3d0   :  { %v2876_v43 = vmax.f32 %v2765_v59, %v2812_v55  ;;  %v2718_v48 = vpop.f32.mrf.mxu2 }
 0x3d1   :  { %v2622_v11 = vpop.f32.mrf.mxu0  ;;  %v2719_v15 = vadd.f32 %v2718_v48, %v2670_v39 }
 0x3d2   :  { %v8195_v12 = vpack.c.bf16 %v2876_v43, %v2872_v46  ;;  %v2623_v33 = vadd.f32 %v2622_v11, %v8094_v22 }
 0x3d3   :  { %v2767_v53 = vpop.f32.mrf.mxu3  ;;  %v2671_v21 = vpop.f32.mrf.mxu1 }
 0x3d4   :  { %3507 = vmatmul.bf16.gmra.mxu3 %v8195_v12  ;;  %v2768_v20 = vadd.f32 %v2767_v53, %v2719_v15  ;;  %v2672_v47 = vadd.f32 %v2671_v21, %v2623_v33 }
 0x3d6   :  { %v2816_v54 = vmul.f32 0.2, %v2768_v20 }
 0x3d8   :  { %v2720_v8 = vpop.f32.mrf.mxu2  ;;  %v2880_v46 = vmax.f32 %v2768_v20, %v2816_v54  ;;  %v5353_v20 = vor.u32 %v5684_v60, %v5350_v0 }
 0x3d9   :  { %v2721_v50 = vadd.f32 %v2720_v8, %v2672_v47  ;;  %v2625_v32 = vpop.f32.mrf.mxu0  ;;  %v5652_v8 = vld [vmem:[#allocation3 + $0x34] sm:$0xf] }
 0x3da   :  { %v2626_v55 = vadd.f32 %v2625_v32, %v8103_v57  ;;  %v5225_v56 = vor.u32 %v5652_v8, %v5222_v19  ;;  %3645 = vmatpush.bf16.msra.mxu2 %v5353_v20  ;;  %v5342_v20 = vld [vmem:[#allocation3 + $0x128] sm:$0xf0] }
 0x3db   :  { %v2769_v27 = vpop.f32.mrf.mxu3  ;;  %v2674_v22 = vpop.f32.mrf.mxu1 }
 0x3dc   :  { %v2770_v31 = vadd.f32 %v2769_v27, %v2721_v50  ;;  %3370 = vmatmul.bf16.gmra.mxu0 %v9236_v1  ;;  %v2675_v39 = vadd.f32 %v2674_v22, %v2626_v55  ;;  %v5289_v22 = vor.u32 %v5668_v18, %v5286_v52  ;;  %v5666_v18 = vld [vmem:[#allocation3 + $0xa4] sm:$0xf]  ;;  %v5278_v52 = vld [vmem:[#allocation3 + $0xa8] sm:$0xf0] }
 0x3dd   :  { %3468 = vmatmul.bf16.gmra.mxu2 %v8106_v38  ;;  %3547 = vmatpush.bf16.msra.mxu0 %v5225_v56 }
 0x3de   :  { %v2820_v59 = vmul.f32 0.2, %v2770_v31  ;;  %3419 = vmatmul.bf16.gmra.mxu1 %v9237_v25 }
 0x3df   :  { %3596 = vmatpush.bf16.msra.mxu1 %v5289_v22  ;;  %v5281_v22 = vor.u32 %v5666_v18, %v5278_v52  ;;  %v5646_v18 = vld [vmem:[#allocation3 + $0x4] sm:$0xf]  ;;  %v5198_v52 = vld [vmem:[#allocation3 + $0x8] sm:$0xf0] }
 0x3e0   :  { %v2884_v43 = vmax.f32 %v2770_v31, %v2820_v59  ;;  %v2723_v48 = vpop.f32.mrf.mxu2  ;;  %v9238_v31 = vld [vmem:[#allocation52_spill] sm:$0xff] }
 0x3e1   :  { %v2627_v11 = vpop.f32.mrf.mxu0  ;;  %v2724_v33 = vadd.f32 %v2723_v48, %v2675_v39 }
 0x3e2   :  { %v8203_v21 = vpack.c.bf16 %v2884_v43, %v2880_v46  ;;  %v2628_v47 = vadd.f32 %v2627_v11, %v8109_v49  ;;  %v9239_v46 = vld [vmem:[#allocation47_spill] sm:$0xff] }
 0x3e3   :  { %v2772_v53 = vpop.f32.mrf.mxu3  ;;  %v2676_v15 = vpop.f32.mrf.mxu1  ;;  %3597 = vmatpush.bf16.msra.mxu1 %v5281_v22 }
 0x3e4   :  { %3512 = vmatmul.bf16.gmra.mxu3 %v8203_v21  ;;  %v2773_v6 = vadd.f32 %v2772_v53, %v2724_v33  ;;  %v2677_v57 = vadd.f32 %v2676_v15, %v2628_v47  ;;  %v2584_v53 = vadd.f32 %v8125_v63, %v8123_v34  ;;  %v5406_v34 = vld [vmem:[#allocation3 + $0x1a8] sm:$0xf0] }
 0x3e6   :  { %v2824_v28 = vmul.f32 0.2, %v2773_v6 }
 0x3e8   :  { %v2725_v9 = vpop.f32.mrf.mxu2  ;;  %v2888_v43 = vmax.f32 %v2773_v6, %v2824_v28  ;;  %v5650_v6 = vld [vmem:[#allocation3 + $0x24] sm:$0xf] }
 0x3e9   :  { %v2726_v50 = vadd.f32 %v2725_v9, %v2677_v57  ;;  %v2630_v32 = vpop.f32.mrf.mxu0  ;;  %v5682_v9 = vld [vmem:[#allocation3 + $0x124] sm:$0xf]  ;;  %v5217_v56 = vor.u32 %v5650_v6, %v5214_v17  ;;  %v5334_v6 = vld [vmem:[#allocation3 + $0x118] sm:$0xf0]  ;;  %v5664_v17 = vld [vmem:[#allocation3 + $0x94] sm:$0xf] }
 0x3ea   :  { %v2631_v55 = vadd.f32 %v2630_v32, %v8118_v26  ;;  %v5345_v5 = vor.u32 %v5682_v9, %v5342_v20 }
 0x3eb   :  { %v2774_v27 = vpop.f32.mrf.mxu3  ;;  %v2679_v49 = vpop.f32.mrf.mxu1  ;;  %3548 = vmatpush.bf16.msra.mxu0 %v5217_v56 }
 0x3ec   :  { %v2775_v54 = vadd.f32 %v2774_v27, %v2726_v50  ;;  %3375 = vmatmul.bf16.gmra.mxu0 %v9238_v31  ;;  %v2680_v11 = vadd.f32 %v2679_v49, %v2631_v55  ;;  %v5698_v50 = vld [vmem:[#allocation3 + $0x1a4] sm:$0xf]  ;;  %3646 = vmatpush.bf16.msra.mxu2 %v5345_v5 }
 0x3ed   :  { %3473 = vmatmul.bf16.gmra.mxu2 %v8121_v51  ;;  %v5409_v35 = vor.u32 %v5698_v50, %v5406_v34  ;;  %v5270_v34 = vld [vmem:[#allocation3 + $0x98] sm:$0xf0] }
 0x3ee   :  { %v2828_v59 = vmul.f32 0.2, %v2775_v54  ;;  %3424 = vmatmul.bf16.gmra.mxu1 %v9239_v46 }
 0x3ef   :  { %3695 = vmatpush.bf16.msra.mxu3 %v5409_v35 }
 0x3f0   :  { %v2892_v48 = vmax.f32 %v2775_v54, %v2828_v59  ;;  %v2728_v39 = vpop.f32.mrf.mxu2  ;;  %v9240_v59 = vld [vmem:[#allocation53_spill] sm:$0xff] }
 0x3f1   :  { %v2632_v33 = vpop.f32.mrf.mxu0  ;;  %v2729_v60 = vadd.f32 %v2728_v39, %v2680_v11 }
 0x3f2   :  { %v8213_v47 = vpack.c.bf16 %v2892_v48, %v2888_v43  ;;  %v2633_v0 = vadd.f32 %v2632_v33, %v2584_v53  ;;  %v9241_v48 = vld [vmem:[#allocation24_spill] sm:$0xff] }
 0x3f3   :  { %v2777_v15 = vpop.f32.mrf.mxu3  ;;  %v2681_v57 = vpop.f32.mrf.mxu1 }
 0x3f4   :  { %3517 = vmatmul.bf16.gmra.mxu3 %v8213_v47  ;;  %v2778_v26 = vadd.f32 %v2777_v15, %v2729_v60  ;;  %v2682_v8 = vadd.f32 %v2681_v57, %v2633_v0  ;;  %v2589_v15 = vadd.f32 %v8142_v61, %v8140_v37  ;;  %v5696_v61 = vld [vmem:[#allocation3 + $0x194] sm:$0xf] }
 0x3f6   :  { %v2832_v28 = vmul.f32 0.2, %v2778_v26 }
 0x3f8   :  { %v2730_v19 = vpop.f32.mrf.mxu2  ;;  %v2896_v39 = vmax.f32 %v2778_v26, %v2832_v28  ;;  %v5206_v26 = vld [vmem:[#allocation3 + $0x18] sm:$0xf0] }
 0x3f9   :  { %v2731_v63 = vadd.f32 %v2730_v19, %v2682_v8  ;;  %v2635_v32 = vpop.f32.mrf.mxu0  ;;  %v5648_v19 = vld [vmem:[#allocation3 + $0x14] sm:$0xf] }
 0x3fa   :  { %v2636_v43 = vadd.f32 %v2635_v32, %v8135_v41  ;;  %v5680_v41 = vld [vmem:[#allocation3 + $0x114] sm:$0xf]  ;;  %v5209_v50 = vor.u32 %v5648_v19, %v5206_v26  ;;  %v5273_v32 = vor.u32 %v5664_v17, %v5270_v34  ;;  %v2594_v26 = vadd.f32 %v8159_v40, %v8157_v16 }
 0x3fb   :  { %v2779_v27 = vpop.f32.mrf.mxu3  ;;  %v2684_v49 = vpop.f32.mrf.mxu1  ;;  %v5337_v5 = vor.u32 %v5680_v41, %v5334_v6  ;;  %v9243_v41 = vld [vmem:[#allocation33_spill] sm:$0xff] }
 0x3fc   :  { %v2780_v54 = vadd.f32 %v2779_v27, %v2731_v63  ;;  %3380 = vmatmul.bf16.gmra.mxu0 %v9240_v59  ;;  %v2685_v33 = vadd.f32 %v2684_v49, %v2636_v43  ;;  %v5398_v27 = vld [vmem:[#allocation3 + $0x198] sm:$0xf0]  ;;  %v5662_v49 = vld [vmem:[#allocation3 + $0x84] sm:$0xf]  ;;  %3598 = vmatpush.bf16.msra.mxu1 %v5273_v32 }
 0x3fd   :  { %3478 = vmatmul.bf16.gmra.mxu2 %v8138_v36  ;;  %3549 = vmatpush.bf16.msra.mxu0 %v5209_v50  ;;  %v5401_v35 = vor.u32 %v5696_v61, %v5398_v27  ;;  %v5678_v43 = vld [vmem:[#allocation3 + $0x104] sm:$0xf] }
 0x3fe   :  { %v2836_v55 = vmul.f32 0.2, %v2780_v54  ;;  %3429 = vmatmul.bf16.gmra.mxu1 %v9241_v48  ;;  %3647 = vmatpush.bf16.msra.mxu2 %v5337_v5  ;;  %v5694_v32 = vld [vmem:[#allocation3 + $0x184] sm:$0xf] }
 0x3ff   :  { %3696 = vmatpush.bf16.msra.mxu3 %v5401_v35 }
 0x400   :  { %v2900_v53 = vmax.f32 %v2780_v54, %v2836_v55  ;;  %v2733_v11 = vpop.f32.mrf.mxu2  ;;  %v5262_v55 = vld [vmem:[#allocation3 + $0x88] sm:$0xf0] }
 0x401   :  { %v2637_v60 = vpop.f32.mrf.mxu0  ;;  %v2734_v9 = vadd.f32 %v2733_v11, %v2685_v33  ;;  %v5265_v11 = vor.u32 %v5662_v49, %v5262_v55  ;;  %v9244_v55 = vld [vmem:[#allocation30_spill] sm:$0xff] }
 0x402   :  { %v8222_v0 = vpack.c.bf16 %v2900_v53, %v2896_v39  ;;  %v2638_v20 = vadd.f32 %v2637_v60, %v2589_v15  ;;  %v5201_v53 = vor.u32 %v5646_v18, %v5198_v52  ;;  %v5326_v15 = vld [vmem:[#allocation3 + $0x108] sm:$0xf0] }
 0x403   :  { %v2782_v57 = vpop.f32.mrf.mxu3  ;;  %v2686_v8 = vpop.f32.mrf.mxu1  ;;  %v5329_v60 = vor.u32 %v5678_v43, %v5326_v15  ;;  %3599 = vmatpush.bf16.msra.mxu1 %v5265_v11 }
 0x404   :  { %3522 = vmatmul.bf16.gmra.mxu3 %v8222_v0  ;;  %v2783_v63 = vadd.f32 %v2782_v57, %v2734_v9  ;;  %v2687_v37 = vadd.f32 %v2686_v8, %v2638_v20  ;;  %v9242_v8 = vld [vmem:[#allocation54_spill] sm:$0xff]  ;;  %3550 = vmatpush.bf16.msra.mxu0 %v5201_v53 }
 0x405   :  { %3648 = vmatpush.bf16.msra.mxu2 %v5329_v60  ;;  %v9245_v53 = vld [vmem:[#allocation42_spill] sm:$0xff] }
 0x406   :  { %v2840_v33 = vmul.f32 0.2, %v2783_v63 }
 0x408   :  { %v2735_v56 = vpop.f32.mrf.mxu2  ;;  %v2904_v6 = vmax.f32 %v2783_v63, %v2840_v33 }
 0x409   :  { %v2736_v22 = vadd.f32 %v2735_v56, %v2687_v37  ;;  %v2640_v54 = vpop.f32.mrf.mxu0  ;;  %v5390_v56 = vld [vmem:[#allocation3 + $0x188] sm:$0xf0] }
 0x40a   :  { %v2641_v20 = vadd.f32 %v2640_v54, %v8152_v23  ;;  %v5393_v35 = vor.u32 %v5694_v32, %v5390_v56 }
 0x40b   :  { %v2784_v28 = vpop.f32.mrf.mxu3  ;;  %v2689_v39 = vpop.f32.mrf.mxu1 }
 0x40c   :  { %v2785_v57 = vadd.f32 %v2784_v28, %v2736_v22  ;;  %3385 = vmatmul.bf16.gmra.mxu0 %v9242_v8  ;;  %v2690_v17 = vadd.f32 %v2689_v39, %v2641_v20  ;;  %3697 = vmatpush.bf16.msra.mxu3 %v5393_v35 }
 0x40d   :  { %3483 = vmatmul.bf16.gmra.mxu2 %v8155_v14 }
 0x40e   :  { %v2844_v9 = vmul.f32 0.2, %v2785_v57  ;;  %3434 = vmatmul.bf16.gmra.mxu1 %v9243_v41 }
 0x410   :  { %v2908_v19 = vmax.f32 %v2785_v57, %v2844_v9  ;;  %v2738_v5 = vpop.f32.mrf.mxu2  ;;  %v2599_v57 = vadd.f32 %v8176_v24, %v8174_v58 }
 0x411   :  { %v2642_v34 = vpop.f32.mrf.mxu0  ;;  %v2739_v23 = vadd.f32 %v2738_v5, %v2690_v17 }
 0x412   :  { %v8231_v37 = vpack.c.bf16 %v2908_v19, %v2904_v6  ;;  %v2643_v27 = vadd.f32 %v2642_v34, %v2594_v26 }
 0x413   :  { %v2787_v50 = vpop.f32.mrf.mxu3  ;;  %v2691_v61 = vpop.f32.mrf.mxu1 }
 0x414   :  { %3527 = vmatmul.bf16.gmra.mxu3 %v8231_v37  ;;  %v2788_v63 = vadd.f32 %v2787_v50, %v2739_v23  ;;  %v2692_v18 = vadd.f32 %v2691_v61, %v2643_v27 }
 0x416   :  { %v2848_v28 = vmul.f32 0.2, %v2788_v63 }
 0x418   :  { %v2740_v52 = vpop.f32.mrf.mxu2  ;;  %v2912_v11 = vmax.f32 %v2788_v63, %v2848_v28 }
 0x419   :  { %v2741_v49 = vadd.f32 %v2740_v52, %v2692_v18  ;;  %v2645_v16 = vpop.f32.mrf.mxu0 }
 0x41a   :  { %v2646_v39 = vadd.f32 %v2645_v16, %v8169_v13  ;;  %v8246_v13 = vld [vmem:[%s9020_s4] sm:$0x3] }
 0x41b   :  { %v2789_v22 = vpop.f32.mrf.mxu3  ;;  %v2694_v40 = vpop.f32.mrf.mxu1  ;;  %v8249_v17 = vperm.slane %v8246_v13, 0 }
 0x41c   :  { %v2790_v54 = vadd.f32 %v2789_v22, %v2741_v49  ;;  %3390 = vmatmul.bf16.gmra.mxu0 %v9244_v55  ;;  %v2695_v60 = vadd.f32 %v2694_v40, %v2646_v39 }
 0x41d   :  { %3488 = vmatmul.bf16.gmra.mxu2 %v8172_v30 }
 0x41e   :  { %v2852_v43 = vmul.f32 0.2, %v2790_v54  ;;  %3439 = vmatmul.bf16.gmra.mxu1 %v9245_v53 }
 0x420   :  { %v2916_v15 = vmax.f32 %v2790_v54, %v2852_v43  ;;  %v2743_v33 = vpop.f32.mrf.mxu2 }
 0x421   :  { %v2647_v20 = vpop.f32.mrf.mxu0  ;;  %v2744_v5 = vadd.f32 %v2743_v33, %v2695_v60 }
 0x422   :  { %v8240_v6 = vpack.c.bf16 %v2916_v15, %v2912_v11  ;;  %v2648_v26 = vadd.f32 %v2647_v20, %v2599_v57 }
 0x423   :  { %v2792_v9 = vpop.f32.mrf.mxu3  ;;  %v2696_v19 = vpop.f32.mrf.mxu1 }
 0x424   :  { %3532 = vmatmul.bf16.gmra.mxu3 %v8240_v6  ;;  %v2793_v50 = vadd.f32 %v2792_v9, %v2744_v5  ;;  %v2697_v58 = vadd.f32 %v2696_v19, %v2648_v26 }
 0x426   :  { %v2856_v56 = vmul.f32 0.2, %v2793_v50 }
 0x428   :  { %v2745_v24 = vpop.f32.mrf.mxu2  ;;  %v2920_v52 = vmax.f32 %v2793_v50, %v2856_v56 }
 0x429   :  { %v2746_v34 = vadd.f32 %v2745_v24, %v2697_v58  ;;  %v3356_v61 = vpop.f32.mrf.mxu0 }
 0x42a   :  { %v3357_v27 = vadd.f32 %v3356_v61, %v8249_v17 }
 0x42b   :  { %v2794_v23 = vpop.f32.mrf.mxu3  ;;  %v3405_v32 = vpop.f32.mrf.mxu1 }
 0x42c   :  { %v2795_v35 = vadd.f32 %v2794_v23, %v2746_v34  ;;  %v3406_v63 = vadd.f32 %v3405_v32, %v3357_v27  ;;  %3551 = vmatmul.bf16.vlgmr.msra.gmra.mxu0 %v9230_v62 }
 0x42d   :  { %3649 = vmatmul.bf16.vlgmr.msra.gmra.mxu2 %v8061_v45 }
 0x42e   :  { %v2860_v18 = vmul.f32 0.2, %v2795_v35  ;;  %3600 = vmatmul.bf16.vlgmr.msra.gmra.mxu1 %v9231_v4 }
 0x430   :  { %v2924_v49 = vmax.f32 %v2795_v35, %v2860_v18  ;;  %v3454_v22 = vpop.f32.mrf.mxu2 }
 0x431   :  { %v3455_v16 = vadd.f32 %v3454_v22, %v3406_v63  ;;  %v3358_v40 = vpop.f32.mrf.mxu0 }
 0x432   :  { %v8255_v28 = vpack.c.bf16 %v2924_v49, %v2920_v52  ;;  %v3359_v54 = vadd.f32 %v3358_v40, %v8249_v17 }
 0x433   :  { %v3407_v43 = vpop.f32.mrf.mxu1 }
 0x434   :  { %3537 = vmatmul.bf16.gmra.mxu3 %v8255_v28  ;;  %v3408_v39 = vadd.f32 %v3407_v43, %v3359_v54 }
 0x438   :  { %v3456_v11 = vpop.f32.mrf.mxu2 }
 0x439   :  { %v3457_v62 = vadd.f32 %v3456_v11, %v3408_v39  ;;  %v3361_v15 = vpop.f32.mrf.mxu0 }
 0x43a   :  { %v3362_v4 = vadd.f32 %v3361_v15, %v8249_v17 }
 0x43b   :  { %v3410_v33 = vpop.f32.mrf.mxu1 }
 0x43c   :  { %v3411_v45 = vadd.f32 %v3410_v33, %v3362_v4  ;;  %3556 = vmatmul.bf16.gmra.mxu0 %v9232_v44 }
 0x43d   :  { %3654 = vmatmul.bf16.gmra.mxu2 %v8076_v42 }
 0x43e   :  { %3605 = vmatmul.bf16.gmra.mxu1 %v9233_v10 }
 0x440   :  { %v3459_v57 = vpop.f32.mrf.mxu2 }
 0x441   :  { %v3460_v60 = vadd.f32 %v3459_v57, %v3411_v45  ;;  %v3363_v9 = vpop.f32.mrf.mxu0 }
 0x442   :  { %v3364_v20 = vadd.f32 %v3363_v9, %v8249_v17 }
 0x443   :  { %v3412_v19 = vpop.f32.mrf.mxu1 }
 0x444   :  { %3698 = vmatmul.bf16.vlgmr.msra.gmra.mxu3 %v8187_v29  ;;  %v3413_v5 = vadd.f32 %v3412_v19, %v3364_v20 }
 0x447   :  { %v3503_v26 = vpop.f32.mrf.mxu3 }
 0x448   :  { %v8265_v50 = vadd.f32 %v3503_v26, %v3455_v16  ;;  %v3461_v58 = vpop.f32.mrf.mxu2 }
 0x449   :  { %v3462_v24 = vadd.f32 %v3461_v58, %v3413_v5  ;;  %v3366_v34 = vpop.f32.mrf.mxu0 }
 0x44a   :  { %v3367_v44 = vadd.f32 %v3366_v34, %v8249_v17 }
 0x44b   :  { %v3415_v10 = vpop.f32.mrf.mxu1 }
 0x44c   :  { %v3416_v61 = vadd.f32 %v3415_v10, %v3367_v44  ;;  %3561 = vmatmul.bf16.gmra.mxu0 %v9234_v2 }
 0x44d   :  { %3659 = vmatmul.bf16.gmra.mxu2 %v8091_v3 }
 0x44e   :  { %3610 = vmatmul.bf16.gmra.mxu1 %v9235_v7 }
 0x44f   :  { %v3505_v42 = vpop.f32.mrf.mxu3 }
 0x450   :  { %v8271_v23 = vadd.f32 %v3505_v42, %v3457_v62  ;;  %v3464_v29 = vpop.f32.mrf.mxu2 }
 0x451   :  { %v3465_v27 = vadd.f32 %v3464_v29, %v3416_v61  ;;  %v3368_v32 = vpop.f32.mrf.mxu0 }
 0x452   :  { %v3369_v56 = vadd.f32 %v3368_v32, %v8249_v17 }
 0x453   :  { %v3417_v35 = vpop.f32.mrf.mxu1 }
 0x454   :  { %3703 = vmatmul.bf16.gmra.mxu3 %v8195_v12  ;;  %v3418_v63 = vadd.f32 %v3417_v35, %v3369_v56 }
 0x457   :  { %v3508_v18 = vpop.f32.mrf.mxu3 }
 0x458   :  { %v8275_v52 = vadd.f32 %v3508_v18, %v3460_v60  ;;  %v3466_v2 = vpop.f32.mrf.mxu2 }
 0x459   :  { %v3467_v49 = vadd.f32 %v3466_v2, %v3418_v63  ;;  %v3371_v7 = vpop.f32.mrf.mxu0  ;;  %v5837_v2 = vmov 0  }
 0x45a   :  { %v3372_v3 = vadd.f32 %v3371_v7, %v8249_v17  ;;  %5715 = vset.pattern.permute.xlu0 %v5837_v2 }
 0x45b   :  { %v3420_v22 = vpop.f32.mrf.mxu1 }
 0x45c   :  { %v3421_v16 = vadd.f32 %v3420_v22, %v3372_v3  ;;  %3566 = vmatmul.bf16.gmra.mxu0 %v9236_v1 }
 0x45d   :  { %3664 = vmatmul.bf16.gmra.mxu2 %v8106_v38 }
 0x45e   :  { %3615 = vmatmul.bf16.gmra.mxu1 %v9237_v25 }
 0x45f   :  { %v3510_v40 = vpop.f32.mrf.mxu3 }
 0x460   :  { %v8281_v54 = vadd.f32 %v3510_v40, %v3462_v24  ;;  %v3469_v12 = vpop.f32.mrf.mxu2 }
 0x461   :  { %v3470_v43 = vadd.f32 %v3469_v12, %v3421_v16  ;;  %v3373_v39 = vpop.f32.mrf.mxu0 }
 0x462   :  { %v3374_v11 = vadd.f32 %v3373_v39, %v8249_v17 }
 0x463   :  { %v3422_v62 = vpop.f32.mrf.mxu1 }
 0x464   :  { %3708 = vmatmul.bf16.gmra.mxu3 %v8203_v21  ;;  %v3423_v15 = vadd.f32 %v3422_v62, %v3374_v11 }
 0x467   :  { %v3513_v4 = vpop.f32.mrf.mxu3 }
 0x468   :  { %v8285_v33 = vadd.f32 %v3513_v4, %v3465_v27  ;;  %v3471_v1 = vpop.f32.mrf.mxu2 }
 0x469   :  { %v3472_v45 = vadd.f32 %v3471_v1, %v3423_v15  ;;  %v3376_v25 = vpop.f32.mrf.mxu0 }
 0x46a   :  { %v3377_v38 = vadd.f32 %v3376_v25, %v8249_v17 }
 0x46b   :  { %v3425_v57 = vpop.f32.mrf.mxu1 }
 0x46c   :  { %v3426_v60 = vadd.f32 %v3425_v57, %v3377_v38  ;;  %3571 = vmatmul.bf16.gmra.mxu0 %v9238_v31 }
 0x46d   :  { %3669 = vmatmul.bf16.gmra.mxu2 %v8121_v51 }
 0x46e   :  { %3620 = vmatmul.bf16.gmra.mxu1 %v9239_v46 }
 0x46f   :  { %v3515_v9 = vpop.f32.mrf.mxu3 }
 0x470   :  { %v8291_v20 = vadd.f32 %v3515_v9, %v3467_v49  ;;  %v3474_v21 = vpop.f32.mrf.mxu2 }
 0x471   :  { %v3475_v19 = vadd.f32 %v3474_v21, %v3426_v60  ;;  %v3378_v5 = vpop.f32.mrf.mxu0 }
 0x472   :  { %v3379_v26 = vadd.f32 %v3378_v5, %v8249_v17 }
 0x473   :  { %v3427_v58 = vpop.f32.mrf.mxu1 }
 0x474   :  { %3713 = vmatmul.bf16.gmra.mxu3 %v8213_v47  ;;  %v3428_v24 = vadd.f32 %v3427_v58, %v3379_v26 }
 0x477   :  { %v3518_v34 = vpop.f32.mrf.mxu3 }
 0x478   :  { %v8295_v44 = vadd.f32 %v3518_v34, %v3470_v43  ;;  %v3476_v31 = vpop.f32.mrf.mxu2 }
 0x479   :  { %v3477_v10 = vadd.f32 %v3476_v31, %v3428_v24  ;;  %v3381_v46 = vpop.f32.mrf.mxu0 }
 0x47a   :  { %v3382_v51 = vadd.f32 %v3381_v46, %v8249_v17 }
 0x47b   :  { %v3430_v61 = vpop.f32.mrf.mxu1 }
 0x47c   :  { %v3431_v42 = vadd.f32 %v3430_v61, %v3382_v51  ;;  %3576 = vmatmul.bf16.gmra.mxu0 %v9240_v59 }
 0x47d   :  { %3674 = vmatmul.bf16.gmra.mxu2 %v8138_v36 }
 0x47e   :  { %3625 = vmatmul.bf16.gmra.mxu1 %v9241_v48  ;;  %v3889_v48 = vld [vmem:[#allocation2] sm:$0x1] }
 0x47f   :  { %v3520_v29 = vpop.f32.mrf.mxu3  ;;  %3892 = vperm.xlu0 %5715, %v3889_v48  }
 0x480   :  { %v8301_v27 = vadd.f32 %v3520_v29, %v3472_v45  ;;  %v3479_v47 = vpop.f32.mrf.mxu2 }
 0x481   :  { %v3480_v32 = vadd.f32 %v3479_v47, %v3431_v42  ;;  %v3383_v56 = vpop.f32.mrf.mxu0 }
 0x482   :  { %v3384_v35 = vadd.f32 %v3383_v56, %v8249_v17  ;;  %v8333_v56 = vperm.slane %v8246_v13, 1 }
 0x483   :  { %v3432_v63 = vpop.f32.mrf.mxu1 }
 0x484   :  { %3718 = vmatmul.bf16.gmra.mxu3 %v8222_v0  ;;  %v3433_v18 = vadd.f32 %v3432_v63, %v3384_v35 }
 0x487   :  { %v3523_v49 = vpop.f32.mrf.mxu3 }
 0x488   :  { %v8305_v59 = vadd.f32 %v3523_v49, %v3475_v19  ;;  %v3481_v7 = vpop.f32.mrf.mxu2 }
 0x489   :  { %v3482_v36 = vadd.f32 %v3481_v7, %v3433_v18  ;;  %v3386_v3 = vpop.f32.mrf.mxu0 }
 0x48a   :  { %v3387_v22 = vadd.f32 %v3386_v3, %v8249_v17 }
 0x48b   :  { %v3435_v16 = vpop.f32.mrf.mxu1 }
 0x48c   :  { %v3436_v40 = vadd.f32 %v3435_v16, %v3387_v22  ;;  %3581 = vmatmul.bf16.gmra.mxu0 %v9242_v8  ;;  %v3803_v22 = vld [vmem:[%s9021_s5] sm:$0x3]  ;;  %s5838_s5 = smov [#allocation6]  }
 0x48d   :  { %3679 = vmatmul.bf16.gmra.mxu2 %v8155_v14  ;;  %s4366_s8 = sshll.u32 %s5838_s5, 4  ;;  %s4367_s8 = int_to_ptr.vmem [resolvable:$true] %s4366_s8 }
 0x48e   :  { %3630 = vmatmul.bf16.gmra.mxu1 %v9243_v41 }
 0x48f   :  { %v3525_v0 = vpop.f32.mrf.mxu3 }
 0x490   :  { %v8311_v12 = vadd.f32 %v3525_v0, %v3477_v10  ;;  %v3484_v43 = vpop.f32.mrf.mxu2 }
 0x491   :  { %v3485_v39 = vadd.f32 %v3484_v43, %v3436_v40  ;;  %v3388_v11 = vpop.f32.mrf.mxu0 }
 0x492   :  { %v3389_v62 = vadd.f32 %v3388_v11, %v8249_v17  ;;  %v8344_v11 = vperm.slane %v3803_v22, 0 }
 0x493   :  { %v3437_v15 = vpop.f32.mrf.mxu1 }
 0x494   :  { %3723 = vmatmul.bf16.gmra.mxu3 %v8231_v37  ;;  %v3438_v4 = vadd.f32 %v3437_v15, %v3389_v62  ;;  %v8346_v62 = vperm.slane %v3803_v22, 1 }
 0x497   :  { %v3528_v1 = vpop.f32.mrf.mxu3 }
 0x498   :  { %v8315_v45 = vadd.f32 %v3528_v1, %v3480_v32  ;;  %v3486_v8 = vpop.f32.mrf.mxu2 }
 0x499   :  { %v3487_v25 = vadd.f32 %v3486_v8, %v3438_v4  ;;  %v3391_v41 = vpop.f32.mrf.mxu0  ;;  %v3741_v8 = vmul.f32 0.2, %v8271_v23 }
 0x49a   :  { %v3392_v14 = vadd.f32 %v3391_v41, %v8249_v17 }
 0x49b   :  { %v3440_v38 = vpop.f32.mrf.mxu1 }
 0x49c   :  { %v3441_v57 = vadd.f32 %v3440_v38, %v3392_v14  ;;  %3586 = vmatmul.bf16.gmra.mxu0 %v9244_v55 }
 0x49d   :  { %3684 = vmatmul.bf16.gmra.mxu2 %v8172_v30 }
 0x49e   :  { %3635 = vmatmul.bf16.gmra.mxu1 %v9245_v53 }
 0x49f   :  { %v3530_v60 = vpop.f32.mrf.mxu3 }
 0x4a0   :  { %v8321_v9 = vadd.f32 %v3530_v60, %v3482_v36  ;;  %v3489_v37 = vpop.f32.mrf.mxu2 }
 0x4a1   :  { %v3490_v21 = vadd.f32 %v3489_v37, %v3441_v57  ;;  %v3393_v19 = vpop.f32.mrf.mxu0 }
 0x4a2   :  { %v3394_v5 = vadd.f32 %v3393_v19, %v8249_v17 }
 0x4a3   :  { %v3442_v26 = vpop.f32.mrf.mxu1 }
 0x4a4   :  { %3728 = vmatmul.bf16.gmra.mxu3 %v8240_v6  ;;  %v3443_v58 = vadd.f32 %v3442_v26, %v3394_v5 }
 0x4a7   :  { %v3533_v24 = vpop.f32.mrf.mxu3 }
 0x4a8   :  { %v8325_v34 = vadd.f32 %v3533_v24, %v3485_v39  ;;  %v3491_v55 = vpop.f32.mrf.mxu2  ;;  %v3743_v24 = vmul.f32 0.2, %v8275_v52 }
 0x4a9   :  { %v3492_v31 = vadd.f32 %v3491_v55, %v3443_v58  ;;  %v3552_v53 = vpop.f32.mrf.mxu0 }
 0x4aa   :  { %v3553_v63 = vadd.f32 %v3552_v53, %v8333_v56 }
 0x4ab   :  { %v3601_v10 = vpop.f32.mrf.mxu1 }
 0x4ac   :  { %v3602_v7 = vadd.f32 %v3601_v10, %v3553_v63  ;;  %v3745_v63 = vmul.f32 0.2, %v8281_v54 }
 0x4af   :  { %v3535_v30 = vpop.f32.mrf.mxu3 }
 0x4b0   :  { %v8327_v46 = vadd.f32 %v3535_v30, %v3487_v25  ;;  %v3650_v51 = vpop.f32.mrf.mxu2 }
 0x4b1   :  { %v3554_v61 = vpop.f32.mrf.mxu0  ;;  %v3651_v36 = vadd.f32 %v3650_v51, %v3602_v7 }
 0x4b2   :  { %v3555_v13 = vadd.f32 %v3554_v61, %v8333_v56 }
 0x4b3   :  { %v3603_v42 = vpop.f32.mrf.mxu1 }
 0x4b4   :  { %3733 = vmatmul.bf16.gmra.mxu3 %v8255_v28  ;;  %v3739_v28 = vmul.f32 0.2, %v8265_v50  ;;  %v3604_v15 = vadd.f32 %v3603_v42, %v3555_v13 }
 0x4b6   :  { %v3771_v0 = vmax.f32 %v8265_v50, %v3739_v28 }
 0x4b7   :  { %v3538_v17 = vpop.f32.mrf.mxu3 }
 0x4b8   :  { %v8330_v29 = vadd.f32 %v3538_v17, %v3490_v21  ;;  %v3652_v6 = vpop.f32.mrf.mxu2  ;;  %v3809_v41 = vmul.f32 %v8344_v11, %v3771_v0  ;;  %v3773_v21 = vmax.f32 %v8271_v23, %v3741_v8  ;;  %v3775_v23 = vmax.f32 %v8275_v52, %v3743_v24 }
 0x4b9   :  { %v3557_v47 = vpop.f32.mrf.mxu0  ;;  %v3653_v25 = vadd.f32 %v3652_v6, %v3604_v15  ;;  %v3777_v52 = vmax.f32 %v8281_v54, %v3745_v63 }
 0x4ba   :  { %v3558_v57 = vadd.f32 %v3557_v47, %v8333_v56  ;;  %v3811_v53 = vmul.f32 %v8344_v11, %v3773_v21  ;;  %v3813_v7 = vmul.f32 %v8344_v11, %v3775_v23 }
 0x4bb   :  { %v3606_v32 = vpop.f32.mrf.mxu1  ;;  %v3815_v8 = vmul.f32 %v8344_v11, %v3777_v52 }
 0x4bc   :  { %v3607_v26 = vadd.f32 %v3606_v32, %v3558_v57 }
 0x4bf   :  { %v3540_v35 = vpop.f32.mrf.mxu3 }
 0x4c0   :  { %v8336_v18 = vadd.f32 %v3540_v35, %v3492_v31  ;;  %v3655_v2 = vpop.f32.mrf.mxu2 }
 0x4c1   :  { %v3559_v49 = vpop.f32.mrf.mxu0  ;;  %v3656_v55 = vadd.f32 %v3655_v2, %v3607_v26 }
 0x4c2   :  { %v3560_v51 = vadd.f32 %v3559_v49, %v8333_v56 }
 0x4c3   :  { %v3608_v48 = vpop.f32.mrf.mxu1 }
 0x4c4   :  { %v3609_v32 = vadd.f32 %v3608_v48, %v3560_v51 }
 0x4c7   :  { %v3699_v3 = vpop.f32.mrf.mxu3 }
 0x4c8   :  { %v3700_v16 = vadd.f32 %v3699_v3, %v3651_v36  ;;  %v3657_v40 = vpop.f32.mrf.mxu2 }
 0x4c9   :  { %v3562_v39 = vpop.f32.mrf.mxu0  ;;  %v3658_v2 = vadd.f32 %v3657_v40, %v3609_v32  ;;  %v3747_v40 = vmul.f32 0.2, %v8285_v33 }
 0x4ca   :  { %v3740_v43 = vmul.f32 0.2, %v3700_v16  ;;  %v3563_v49 = vadd.f32 %v3562_v39, %v8333_v56 }
 0x4cb   :  { %v3611_v1 = vpop.f32.mrf.mxu1  ;;  %v3779_v57 = vmax.f32 %v8285_v33, %v3747_v40 }
 0x4cc   :  { %v3772_v4 = vmax.f32 %v3700_v16, %v3740_v43  ;;  %v3612_v48 = vadd.f32 %v3611_v1, %v3563_v49 }
 0x4cd   :  { %v3817_v26 = vmul.f32 %v8344_v11, %v3779_v57 }
 0x4ce   :  { %v3810_v14 = vmul.f32 %v8346_v62, %v3772_v4 }
 0x4cf   :  { %v3701_v38 = vpop.f32.mrf.mxu3 }
 0x4d0   :  { %v3702_v50 = vadd.f32 %v3701_v38, %v3653_v25  ;;  %v3841_v60 = vadd.f32 %v3810_v14, %v3809_v41  ;;  %v3660_v37 = vpop.f32.mrf.mxu2 }
 0x4d1   :  { %v3564_v5 = vpop.f32.mrf.mxu0  ;;  %v3661_v4 = vadd.f32 %v3660_v37, %v3612_v48 }
 0x4d2   :  { %v3742_v19 = vmul.f32 0.2, %v3702_v50  ;;  %3842 = vadd.xlane.f32.xlu0 %v3841_v60  ;;  %v3565_v39 = vadd.f32 %v3564_v5, %v8333_v56 }
 0x4d3   :  { %v3613_v31 = vpop.f32.mrf.mxu1 }
 0x4d4   :  { %v3774_v58 = vmax.f32 %v3702_v50, %v3742_v19  ;;  %v3614_v60 = vadd.f32 %v3613_v31, %v3565_v39  ;;  %v3749_v19 = vmul.f32 0.2, %v8291_v20  ;;  %v3755_v39 = vmul.f32 0.2, %v8305_v59 }
 0x4d6   :  { %v3812_v10 = vmul.f32 %v8346_v62, %v3774_v58  ;;  %v3781_v33 = vmax.f32 %v8291_v20, %v3749_v19 }
 0x4d7   :  { %v3704_v30 = vpop.f32.mrf.mxu3 }
 0x4d8   :  { %v3705_v61 = vadd.f32 %v3704_v30, %v3656_v55  ;;  %v3844_v42 = vadd.f32 %v3812_v10, %v3811_v53  ;;  %v3662_v17 = vpop.f32.mrf.mxu2 }
 0x4d9   :  { %v3567_v47 = vpop.f32.mrf.mxu0  ;;  %v3663_v37 = vadd.f32 %v3662_v17, %v3614_v60  ;;  %v3751_v17 = vmul.f32 0.2, %v8295_v44 }
 0x4da   :  { %v3744_v6 = vmul.f32 0.2, %v3705_v61  ;;  %3845 = vadd.xlane.f32.xlu1 %v3844_v42  ;;  %v3568_v5 = vadd.f32 %v3567_v47, %v8333_v56 }
 0x4db   :  { %v3616_v3 = vpop.f32.mrf.mxu1  ;;  %v3783_v20 = vmax.f32 %v8295_v44, %v3751_v17 }
 0x4dc   :  { %v3776_v35 = vmax.f32 %v3705_v61, %v3744_v6  ;;  %v3617_v51 = vadd.f32 %v3616_v3, %v3568_v5  ;;  %v3819_v6 = vmul.f32 %v8344_v11, %v3781_v33  ;;  %v3753_v3 = vmul.f32 0.2, %v8301_v27 }
 0x4de   :  { %v3814_v28 = vmul.f32 %v8346_v62, %v3776_v35  ;;  %v3785_v44 = vmax.f32 %v8301_v27, %v3753_v3  ;;  %v3787_v27 = vmax.f32 %v8305_v59, %v3755_v39 }
 0x4df   :  { %v3706_v36 = vpop.f32.mrf.mxu3 }
 0x4e0   :  { %v3707_v22 = vadd.f32 %v3706_v36, %v3658_v2  ;;  %v3847_v13 = vadd.f32 %v3814_v28, %v3813_v7  ;;  %v3665_v16 = vpop.f32.mrf.mxu2 }
 0x4e1   :  { %v3569_v15 = vpop.f32.mrf.mxu0  ;;  %v3666_v23 = vadd.f32 %v3665_v16, %v3617_v51  ;;  %v3821_v16 = vmul.f32 %v8344_v11, %v3783_v20 }
 0x4e2   :  { %v3746_v0 = vmul.f32 0.2, %v3707_v22  ;;  %3848 = vadd.xlane.f32.xlu1 %v3847_v13  ;;  %v3570_v47 = vadd.f32 %v3569_v15, %v8333_v56 }
 0x4e3   :  { %v3618_v54 = vpop.f32.mrf.mxu1 }
 0x4e4   :  { %v3778_v43 = vmax.f32 %v3707_v22, %v3746_v0  ;;  %v3619_v36 = vadd.f32 %v3618_v54, %v3570_v47 }
 0x4e6   :  { %v3816_v25 = vmul.f32 %v8346_v62, %v3778_v43 }
 0x4e7   :  { %v3709_v41 = vpop.f32.mrf.mxu3 }
 0x4e8   :  { %v3710_v14 = vadd.f32 %v3709_v41, %v3661_v4  ;;  %v3850_v38 = vadd.f32 %v3816_v25, %v3815_v8  ;;  %v3667_v1 = vpop.f32.mrf.mxu2 }
 0x4e9   :  { %v3572_v24 = vpop.f32.mrf.mxu0  ;;  %v3668_v22 = vadd.f32 %v3667_v1, %v3619_v36 }
 0x4ea   :  { %v3748_v50 = vmul.f32 0.2, %v3710_v14  ;;  %3851 = vadd.xlane.f32.xlu2 %v3850_v38  ;;  %v3573_v43 = vadd.f32 %v3572_v24, %v8333_v56  ;;  %v3823_v38 = vmul.f32 %v8344_v11, %v3785_v44 }
 0x4eb   :  { %v3621_v31 = vpop.f32.mrf.mxu1 }
 0x4ec   :  { %v3780_v21 = vmax.f32 %v3710_v14, %v3748_v50  ;;  %v3622_v25 = vadd.f32 %v3621_v31, %v3573_v43 }
 0x4ee   :  { %v3818_v58 = vmul.f32 %v8346_v62, %v3780_v21 }
 0x4ef   :  { %v3711_v55 = vpop.f32.mrf.mxu3 }
 0x4f0   :  { %v3712_v53 = vadd.f32 %v3711_v55, %v3663_v37  ;;  %v3853_v10 = vadd.f32 %v3818_v58, %v3817_v26  ;;  %v3670_v42 = vpop.f32.mrf.mxu2  ;;  %v3757_v55 = vmul.f32 0.2, %v8311_v12 }
 0x4f1   :  { %v3574_v7 = vpop.f32.mrf.mxu0  ;;  %v3671_v14 = vadd.f32 %v3670_v42, %v3622_v25 }
 0x4f2   :  { %v3750_v30 = vmul.f32 0.2, %v3712_v53  ;;  %3854 = vadd.xlane.f32.xlu2 %v3853_v10  ;;  %v3575_v50 = vadd.f32 %v3574_v7, %v8333_v56 }
 0x4f3   :  { %v3623_v13 = vpop.f32.mrf.mxu1 }
 0x4f4   :  { %v3782_v61 = vmax.f32 %v3712_v53, %v3750_v30  ;;  %v3624_v26 = vadd.f32 %v3623_v13, %v3575_v50  ;;  %v3825_v53 = vmul.f32 %v8344_v11, %v3787_v27 }
 0x4f6   :  { %v3820_v32 = vmul.f32 %v8346_v62, %v3782_v61  ;;  %v3789_v61 = vmax.f32 %v8311_v12, %v3757_v55  ;;  %v3765_v55 = vmul.f32 0.2, %v8327_v46 }
 0x4f7   :  { %v3714_v35 = vpop.f32.mrf.mxu3 }
 0x4f8   :  { %v3715_v63 = vadd.f32 %v3714_v35, %v3666_v23  ;;  %v3856_v2 = vadd.f32 %v3820_v32, %v3819_v6  ;;  %v3672_v0 = vpop.f32.mrf.mxu2  ;;  %v3759_v32 = vmul.f32 0.2, %v8315_v45  ;;  %v3827_v47 = vmul.f32 %v8344_v11, %v3789_v61 }
 0x4f9   :  { %v3577_v8 = vpop.f32.mrf.mxu0  ;;  %v3673_v5 = vadd.f32 %v3672_v0, %v3624_v26 }
 0x4fa   :  { %v3752_v28 = vmul.f32 0.2, %v3715_v63  ;;  %3857 = vadd.xlane.f32.xlu1 %v3856_v2  ;;  %v3578_v30 = vadd.f32 %v3577_v8, %v8333_v56  ;;  %v3791_v12 = vmax.f32 %v8315_v45, %v3759_v32  ;;  %v3767_v32 = vmul.f32 0.2, %v8330_v29 }
 0x4fb   :  { %v3626_v1 = vpop.f32.mrf.mxu1 }
 0x4fc   :  { %v3784_v49 = vmax.f32 %v3715_v63, %v3752_v28  ;;  %v3627_v23 = vadd.f32 %v3626_v1, %v3578_v30 }
 0x4fe   :  { %v3822_v52 = vmul.f32 %v8346_v62, %v3784_v49 }
 0x4ff   :  { %v3716_v48 = vpop.f32.mrf.mxu3 }
 0x500   :  { %v3717_v15 = vadd.f32 %v3716_v48, %v3668_v22  ;;  %v3859_v40 = vadd.f32 %v3822_v52, %v3821_v16  ;;  %v3675_v19 = vpop.f32.mrf.mxu2  ;;  %v3761_v52 = vmul.f32 0.2, %v8321_v9  ;;  %v3829_v48 = vmul.f32 %v8344_v11, %v3791_v12 }
 0x501   :  { %v3579_v24 = vpop.f32.mrf.mxu0  ;;  %v3676_v35 = vadd.f32 %v3675_v19, %v3627_v23 }
 0x502   :  { %v3754_v4 = vmul.f32 0.2, %v3717_v15  ;;  %3860 = vadd.xlane.f32.xlu2 %v3859_v40  ;;  %v3580_v20 = vadd.f32 %v3579_v24, %v8333_v56  ;;  %v3793_v45 = vmax.f32 %v8321_v9, %v3761_v52 }
 0x503   :  { %v3628_v59 = vpop.f32.mrf.mxu1 }
 0x504   :  { %v3786_v41 = vmax.f32 %v3717_v15, %v3754_v4  ;;  %v3629_v3 = vadd.f32 %v3628_v59, %v3580_v20 }
 0x506   :  { %v3824_v57 = vmul.f32 %v8346_v62, %v3786_v41 }
 0x507   :  { %v3719_v54 = vpop.f32.mrf.mxu3 }
 0x508   :  { %v3720_v60 = vadd.f32 %v3719_v54, %v3671_v14  ;;  %v3862_v21 = vadd.f32 %v3824_v57, %v3823_v38  ;;  %v3677_v17 = vpop.f32.mrf.mxu2  ;;  %v3763_v14 = vmul.f32 0.2, %v8325_v34  ;;  %v3831_v54 = vmul.f32 %v8344_v11, %v3793_v45  ;;  %v3893_v45 = vpop.permute.xlu0 %3892 }
 0x509   :  { %v3582_v2 = vpop.f32.mrf.mxu0  ;;  %v3678_v0 = vadd.f32 %v3677_v17, %v3629_v3 }
 0x50a   :  { %v3756_v37 = vmul.f32 0.2, %v3720_v60  ;;  %3863 = vadd.xlane.f32.xlu1 %v3862_v21  ;;  %v3583_v40 = vadd.f32 %v3582_v2, %v8333_v56  ;;  %v3795_v9 = vmax.f32 %v8325_v34, %v3763_v14  ;;  %v3797_v34 = vmax.f32 %v8327_v46, %v3765_v55 }
 0x50b   :  { %v3631_v22 = vpop.f32.mrf.mxu1 }
 0x50c   :  { %v3788_v58 = vmax.f32 %v3720_v60, %v3756_v37  ;;  %v3632_v41 = vadd.f32 %v3631_v22, %v3583_v40 }
 0x50e   :  { %v3826_v10 = vmul.f32 %v8346_v62, %v3788_v58 }
 0x50f   :  { %v3721_v33 = vpop.f32.mrf.mxu3 }
 0x510   :  { %v3722_v51 = vadd.f32 %v3721_v33, %v3673_v5  ;;  %v3865_v31 = vadd.f32 %v3826_v10, %v3825_v53  ;;  %v3680_v16 = vpop.f32.mrf.mxu2  ;;  %v3833_v53 = vmul.f32 %v8344_v11, %v3795_v9 }
 0x511   :  { %v3584_v8 = vpop.f32.mrf.mxu0  ;;  %v3681_v38 = vadd.f32 %v3680_v16, %v3632_v41  ;;  %v8424_v41 = vperm.slane %v3893_v45, 0 }
 0x512   :  { %v3758_v42 = vmul.f32 0.2, %v3722_v51  ;;  %3866 = vadd.xlane.f32.xlu2 %v3865_v31  ;;  %v3585_v21 = vadd.f32 %v3584_v8, %v8333_v56 }
 0x513   :  { %v3633_v57 = vpop.f32.mrf.mxu1 }
 0x514   :  { %v3790_v6 = vmax.f32 %v3722_v51, %v3758_v42  ;;  %v3634_v58 = vadd.f32 %v3633_v57, %v3585_v21 }
 0x516   :  { %v3828_v63 = vmul.f32 %v8346_v62, %v3790_v6 }
 0x517   :  { %v3724_v7 = vpop.f32.mrf.mxu3 }
 0x518   :  { %v3725_v28 = vadd.f32 %v3724_v7, %v3676_v35  ;;  %v3868_v36 = vadd.f32 %v3828_v63, %v3827_v47  ;;  %v3682_v1 = vpop.f32.mrf.mxu2  ;;  %v3835_v47 = vmul.f32 %v8344_v11, %v3797_v34 }
 0x519   :  { %v3587_v26 = vpop.f32.mrf.mxu0  ;;  %v3683_v5 = vadd.f32 %v3682_v1, %v3634_v58 }
 0x51a   :  { %v3760_v49 = vmul.f32 0.2, %v3725_v28  ;;  %3869 = vadd.xlane.f32.xlu1 %v3868_v36  ;;  %v3588_v30 = vadd.f32 %v3587_v26, %v8333_v56  ;;  %v3799_v36 = vmax.f32 %v8330_v29, %v3767_v32 }
 0x51b   :  { %v3636_v61 = vpop.f32.mrf.mxu1 }
 0x51c   :  { %v3792_v13 = vmax.f32 %v3725_v28, %v3760_v49  ;;  %v3637_v17 = vadd.f32 %v3636_v61, %v3588_v30  ;;  %v3837_v52 = vmul.f32 %v8344_v11, %v3799_v36 }
 0x51e   :  { %v3830_v43 = vmul.f32 %v8346_v62, %v3792_v13  ;;  %v3769_v13 = vmul.f32 0.2, %v8336_v18 }
 0x51f   :  { %v3726_v15 = vpop.f32.mrf.mxu3 }
 0x520   :  { %v3727_v44 = vadd.f32 %v3726_v15, %v3678_v0  ;;  %v3871_v4 = vadd.f32 %v3830_v43, %v3829_v48  ;;  %v3685_v59 = vpop.f32.mrf.mxu2  ;;  %v3801_v15 = vmax.f32 %v8336_v18, %v3769_v13 }
 0x521   :  { %v3589_v6 = vpop.f32.mrf.mxu0  ;;  %v3686_v35 = vadd.f32 %v3685_v59, %v3637_v17 }
 0x522   :  { %v3762_v25 = vmul.f32 0.2, %v3727_v44  ;;  %3872 = vadd.xlane.f32.xlu2 %v3871_v4  ;;  %v3590_v7 = vadd.f32 %v3589_v6, %v8333_v56 }
 0x523   :  { %v3638_v12 = vpop.f32.mrf.mxu1 }
 0x524   :  { %v3794_v39 = vmax.f32 %v3727_v44, %v3762_v25  ;;  %v3639_v3 = vadd.f32 %v3638_v12, %v3590_v7  ;;  %v3839_v44 = vmul.f32 %v8344_v11, %v3801_v15 }
 0x526   :  { %v3832_v50 = vmul.f32 %v8346_v62, %v3794_v39 }
 0x527   :  { %v3729_v60 = vpop.f32.mrf.mxu3 }
 0x528   :  { %v3730_v19 = vadd.f32 %v3729_v60, %v3681_v38  ;;  %v3874_v27 = vadd.f32 %v3832_v50, %v3831_v54  ;;  %v3687_v49 = vpop.f32.mrf.mxu2 }
 0x529   :  { %v3688_v16 = vadd.f32 %v3687_v49, %v3639_v3 }
 0x52a   :  { %v3764_v37 = vmul.f32 0.2, %v3730_v19  ;;  %3875 = vadd.xlane.f32.xlu1 %v3874_v27 }
 0x52c   :  { %v3796_v24 = vmax.f32 %v3730_v19, %v3764_v37 }
 0x52e   :  { %v3834_v10 = vmul.f32 %v8346_v62, %v3796_v24 }
 0x52f   :  { %v3731_v33 = vpop.f32.mrf.mxu3 }
 0x530   :  { %v3732_v51 = vadd.f32 %v3731_v33, %v3683_v5  ;;  %v3877_v31 = vadd.f32 %v3834_v10, %v3833_v53 }
 0x532   :  { %v3766_v42 = vmul.f32 0.2, %v3732_v51  ;;  %3878 = vadd.xlane.f32.xlu2 %v3877_v31 }
 0x534   :  { %v3798_v23 = vmax.f32 %v3732_v51, %v3766_v42 }
 0x536   :  { %v3836_v63 = vmul.f32 %v8346_v62, %v3798_v23 }
 0x537   :  { %v3734_v2 = vpop.f32.mrf.mxu3 }
 0x538   :  { %v3735_v20 = vadd.f32 %v3734_v2, %v3686_v35  ;;  %v3880_v28 = vadd.f32 %v3836_v63, %v3835_v47 }
 0x53a   :  { %v3768_v46 = vmul.f32 0.2, %v3735_v20  ;;  %3881 = vadd.xlane.f32.xlu1 %v3880_v28 }
 0x53c   :  { %v3800_v22 = vmax.f32 %v3735_v20, %v3768_v46 }
 0x53e   :  { %v3838_v0 = vmul.f32 %v8346_v62, %v3800_v22 }
 0x53f   :  { %v3736_v48 = vpop.f32.mrf.mxu3 }
 0x540   :  { %v3737_v43 = vadd.f32 %v3736_v48, %v3688_v16  ;;  %v3883_v56 = vadd.f32 %v3838_v0, %v3837_v52 }
 0x542   :  { %v3770_v40 = vmul.f32 0.2, %v3737_v43  ;;  %3884 = vadd.xlane.f32.xlu2 %v3883_v56 }
 0x544   :  { %v3802_v29 = vmax.f32 %v3737_v43, %v3770_v40 }
 0x545   :  { %v3843_v39 = vpop.xlane.xlu0 %3842 }
 0x546   :  { %v3840_v4 = vmul.f32 %v8346_v62, %v3802_v29  ;;  %v8427_v14 = vadd.f32 %v8424_v41, %v3843_v39  ;;  %v4296_v39 = vlaneseq }
 0x548   :  { %v3886_v8 = vadd.f32 %v3840_v4, %v3839_v44  ;;  %v3912_v18 = vand.u32 2147483647, %v8427_v14  ;;  %vm3976_vm12 = vcmp.ge.f32.partialorder %v8427_v14, 0.0 }
 0x54a   :  { %3887 = vadd.xlane.f32.xlu0 %v3886_v8  ;;  %v3928_v54 = vsub.f32 0.0, %v3912_v18 }
 0x54c   :  { %v3944_v21 = vmul.f32 1.442695, %v3928_v54 }
 0x54d   :  { %v3846_v25 = vpop.xlane.xlu1 %3845 }
 0x54e   :  { %v8430_v38 = vadd.f32 %v8424_v41, %v3846_v25  ;;  %5716 = vpow2.f32 %v3944_v21 }
 0x550   :  { %v3913_v11 = vand.u32 2147483647, %v8430_v38  ;;  %vm3977_vm14 = vcmp.ge.f32.partialorder %v8430_v38, 0.0 }
 0x552   :  { %v3929_v50 = vsub.f32 0.0, %v3913_v11 }
 0x554   :  { %v3946_v19 = vmul.f32 1.442695, %v3929_v50  ;;  %v8442_v24 = vpop.eup %5716 }
 0x555   :  { %v3849_v57 = vpop.xlane.xlu1 %3848  ;;  %v8447_v10 = vadd.f32 1.0, %v8442_v24 }
 0x556   :  { %v8435_v62 = vadd.f32 %v8424_v41, %v3849_v57  ;;  %5718 = vpow2.f32 %v3946_v19 }
 0x557   :  { %vm4013_vm1 = vweird.f32 %v8447_v10  ;;  %v4019_v54 = vand.u32 2147483648, %v8447_v10 }
 0x558   :  { %v3914_v60 = vand.u32 2147483647, %v8435_v62  ;;  %vm3978_vm0 = vcmp.ge.f32.partialorder %v8435_v62, 0.0 }
 0x55a   :  { %v3930_v27 = vsub.f32 0.0, %v3914_v60 }
 0x55c   :  { %v3948_v37 = vmul.f32 1.442695, %v3930_v27  ;;  %v8444_v55 = vpop.eup %5718  ;;  %v4017_v27 = vand.u32 2147483647, %v8447_v10 }
 0x55d   :  { %v3852_v1 = vpop.xlane.xlu2 %3851  ;;  %v8450_v33 = vadd.f32 1.0, %v8444_v55 }
 0x55e   :  { %v8439_v9 = vadd.f32 %v8424_v41, %v3852_v1  ;;  %5720 = vpow2.f32 %v3948_v37  ;;  %vm4018_vm8 = vcmp.eq.f32.partialorder %v4017_v27, 8.507059e+37 }
 0x55f   :  { %5722 = vrcp.f32 %v8447_v10  ;;  %v4034_v37 = vand.u32 2147483648, %v8450_v33  ;;  %vm4028_vm5 = vweird.f32 %v8450_v33 }
 0x560   :  { %v3915_v26 = vand.u32 2147483647, %v8439_v9  ;;  %5724 = vrcp.f32 %v8450_v33 }
 0x562   :  { %v3931_v5 = vsub.f32 0.0, %v3915_v26 }
 0x564   :  { %v3950_v51 = vmul.f32 1.442695, %v3931_v5  ;;  %v8458_v59 = vpop.eup %5720 }
 0x565   :  { %v3855_v58 = vpop.xlane.xlu2 %3854  ;;  %v8468_v23 = vadd.f32 1.0, %v8458_v59  ;;  %v8470_v32 = vpop.eup %5722 }
 0x566   :  { %v8453_v30 = vadd.f32 %v8424_v41, %v3855_v58  ;;  %5726 = vpow2.f32 %v3950_v51  ;;  %v8473_v2 = vpop.eup %5724  ;;  %v4009_v36 = vmul.f32 %v8470_v32, %v8447_v10  ;;  %vm4014_vm2 = vweird.f32 %v8470_v32 }
 0x567   :  { %5728 = vrcp.f32 %v8468_v23  ;;  %v4024_v49 = vmul.f32 %v8473_v2, %v8450_v33  ;;  %vm4029_vm3 = vweird.f32 %v8473_v2  ;;  %vm8530_vm4 = vmor %vm4013_vm1, %vm4014_vm2  ;;  %vm4043_vm10 = vweird.f32 %v8468_v23 }
 0x568   :  { %v3916_v34 = vand.u32 2147483647, %v8453_v30  ;;  %v4010_v16 = vsub.f32 1.0, %v4009_v36  ;;  %vm8543_vm6 = vmor %vm4028_vm5, %vm4029_vm3  ;;  %v4049_v36 = vand.u32 2147483648, %v8468_v23 }
 0x569   :  { %v4025_v48 = vsub.f32 1.0, %v4024_v49  ;;  %v4047_v49 = vand.u32 2147483647, %v8468_v23 }
 0x56a   :  { %v3932_v6 = vsub.f32 0.0, %v3916_v34  ;;  %v4011_v40 = vmul.f32 %v8470_v32, %v4010_v16 }
 0x56b   :  { %v4026_v44 = vmul.f32 %v8473_v2, %v4025_v48  ;;  %vm4048_vm15 = vcmp.eq.f32.partialorder %v4047_v49, 8.507059e+37 }
 0x56c   :  { %v8476_v7 = vpop.eup %5726  ;;  %v3952_v20 = vmul.f32 1.442695, %v3932_v6  ;;  %v4012_v11 = vadd.f32 %v8470_v32, %v4011_v40 }
 0x56d   :  { %v3858_v53 = vpop.xlane.xlu1 %3857  ;;  %v8486_v3 = vadd.f32 1.0, %v8476_v7  ;;  %v8488_v22 = vpop.eup %5728  ;;  %v4027_v1 = vadd.f32 %v8473_v2, %v4026_v44 }
 0x56e   :  { %v8456_v31 = vadd.f32 %v8424_v41, %v3858_v53  ;;  %5730 = vpow2.f32 %v3952_v20  ;;  %v4039_v43 = vmul.f32 %v8488_v22, %v8468_v23  ;;  %v4032_v53 = vand.u32 2147483647, %v8450_v33 }
 0x56f   :  { %v4016_v34 = vsel %vm8530_vm4, %v8470_v32, %v4012_v11  ;;  %v4031_v33 = vsel %vm8543_vm6, %v8473_v2, %v4027_v1  ;;  %vm4044_vm7 = vweird.f32 %v8488_v22  ;;  %vm4058_vm2 = vweird.f32 %v8486_v3 }
 0x570   :  { %v3917_v42 = vand.u32 2147483647, %v8456_v31  ;;  %v4040_v8 = vsub.f32 1.0, %v4039_v43  ;;  %vm4033_vm9 = vcmp.eq.f32.partialorder %v4032_v53, 8.507059e+37  ;;  %vm8563_vm11 = vmor %vm4043_vm10, %vm4044_vm7  ;;  %v4062_v53 = vand.u32 2147483647, %v8486_v3 }
 0x571   :  { %vm3979_vm4 = vcmp.ge.f32.partialorder %v8439_v9, 0.0  ;;  %vm4305_vm6 = vcmask 195712  }
 0x572   :  { %v3933_v35 = vsub.f32 0.0, %v3917_v42  ;;  %v4041_v26 = vmul.f32 %v8488_v22, %v4040_v8  ;;  %v4020_v42 = vor.u32 1.1754944e-38, %v4019_v54  ;;  %vm4063_vm5 = vcmp.eq.f32.partialorder %v4062_v53, 8.507059e+37 }
 0x574   :  { %v3954_v46 = vmul.f32 1.442695, %v3933_v35  ;;  %v8498_v29 = vpop.eup %5730  ;;  %v4035_v35 = vor.u32 1.1754944e-38, %v4034_v37  ;;  %v4021_v2 = vsel %vm4018_vm8, %v4020_v42, %v4016_v34 }
 0x575   :  { %v3861_v61 = vpop.xlane.xlu2 %3860  ;;  %v8511_v50 = vadd.f32 1.0, %v8498_v29  ;;  %v4248_v44 = vmul.f32 %v8442_v24, %v4021_v2 }
 0x576   :  { %v8465_v17 = vadd.f32 %v8424_v41, %v3861_v61  ;;  %5732 = vpow2.f32 %v3954_v46  ;;  %v8536_v61 = vand.u32 127, %v4296_v39 }
 0x577   :  { %5734 = vrcp.f32 %v8486_v3  ;;  %v4264_v27 = vsel %vm3976_vm12, %v4021_v2, %v4248_v44  ;;  %vm4073_vm7 = vweird.f32 %v8511_v50 }
 0x578   :  { %v3918_v47 = vand.u32 2147483647, %v8465_v17  ;;  %v4299_v43 = vadd.s32 4294967288, %v8536_v61  ;;  %v8585_v39 = vadd.s32 4294967280, %v8536_v61  ;;  %v8613_v34 = vadd.s32 4294967272, %v8536_v61 }
 0x57a   :  { %v3934_v12 = vsub.f32 0.0, %v3918_v47  ;;  %v4042_v47 = vadd.f32 %v8488_v22, %v4041_v26  ;;  %v4064_v26 = vand.u32 2147483648, %v8486_v3 }
 0x57c   :  { %v3956_v52 = vmul.f32 1.442695, %v3934_v12  ;;  %v8501_v4 = vpop.eup %5732  ;;  %v4036_v12 = vsel %vm4033_vm9, %v4035_v35, %v4031_v33  ;;  %v4046_v23 = vsel %vm8563_vm11, %v8488_v22, %v4042_v47  ;;  %v4298_v35 = vperm.slane %v4264_v27, %v8536_v61 }
 0x57d   :  { %v3864_v63 = vpop.xlane.xlu1 %3863  ;;  %v8503_v25 = vpop.eup %5734  ;;  %v8516_v60 = vadd.f32 1.0, %v8501_v4  ;;  %v4249_v8 = vmul.f32 %v8444_v55, %v4036_v12  ;;  %v4065_v47 = vor.u32 1.1754944e-38, %v4064_v26 }
 0x57e   :  { %v8479_v28 = vadd.f32 %v8424_v41, %v3864_v63  ;;  %5736 = vpow2.f32 %v3956_v52  ;;  %v4054_v58 = vmul.f32 %v8503_v25, %v8486_v3  ;;  %vm4059_vm1 = vweird.f32 %v8503_v25 }
 0x57f   :  { %v4265_v37 = vsel %vm3977_vm14, %v4036_v12, %v4249_v8  ;;  %vm8615_vm3 = vmor %vm4058_vm2, %vm4059_vm1  ;;  %v4094_v26 = vand.u32 2147483648, %v8516_v60  ;;  %vm4088_vm12 = vweird.f32 %v8516_v60  ;;  %vm3981_vm1 = vcmp.ge.f32.partialorder %v8456_v31, 0.0 }
 0x580   :  { %v3919_v13 = vand.u32 2147483647, %v8479_v28  ;;  %v4055_v63 = vsub.f32 1.0, %v4054_v58  ;;  %v4300_v33 = vperm.slane %v4265_v37, %v4299_v43  ;;  %v4092_v37 = vand.u32 2147483647, %v8516_v60 }
 0x582   :  { %v3935_v56 = vsub.f32 0.0, %v3919_v13  ;;  %vm4093_vm2 = vcmp.eq.f32.partialorder %v4092_v37, 8.507059e+37 }
 0x584   :  { %v3958_v18 = vmul.f32 1.442695, %v3935_v56  ;;  %v8521_v19 = vpop.eup %5736  ;;  %v4056_v56 = vmul.f32 %v8503_v25, %v4055_v63  ;;  %v8627_v63 = vadd.s32 4294967264, %v8536_v61 }
 0x585   :  { %v3867_v0 = vpop.xlane.xlu2 %3866  ;;  %v8553_v6 = vadd.f32 1.0, %v8521_v19 }
 0x586   :  { %v8495_v15 = vadd.f32 %v8424_v41, %v3867_v0  ;;  %5738 = vpow2.f32 %v3958_v18  ;;  %v4057_v55 = vadd.f32 %v8503_v25, %v4056_v56 }
 0x587   :  { %5740 = vrcp.f32 %v8511_v50 }
 0x588   :  { %v3920_v57 = vand.u32 2147483647, %v8495_v15  ;;  %5742 = vrcp.f32 %v8516_v60 }
 0x589   :  { %5744 = vrcp.f32 %v8553_v6 }
 0x58a   :  { %v3936_v51 = vsub.f32 0.0, %v3920_v57 }
 0x58c   :  { %v3960_v46 = vmul.f32 1.442695, %v3936_v51  ;;  %v8561_v13 = vpop.eup %5738 }
 0x58d   :  { %v3870_v45 = vpop.xlane.xlu1 %3869  ;;  %v8571_v48 = vpop.eup %5740  ;;  %v8588_v18 = vadd.f32 1.0, %v8561_v13 }
 0x58e   :  { %v8519_v21 = vadd.f32 %v8424_v41, %v3870_v45  ;;  %v8579_v40 = vpop.eup %5742  ;;  %v4050_v45 = vor.u32 1.1754944e-38, %v4049_v36  ;;  %5746 = vpow2.f32 %v3960_v46  ;;  %v4069_v57 = vmul.f32 %v8571_v48, %v8511_v50 }
 0x58f   :  { %v4084_v38 = vmul.f32 %v8579_v40, %v8516_v60  ;;  %v8598_v1 = vpop.eup %5744  ;;  %5748 = vrcp.f32 %v8588_v18  ;;  %vm4074_vm8 = vweird.f32 %v8571_v48  ;;  %vm4089_vm9 = vweird.f32 %v8579_v40 }
 0x590   :  { %v3921_v32 = vand.u32 2147483647, %v8519_v21  ;;  %v4051_v22 = vsel %vm4048_vm15, %v4050_v45, %v4046_v23  ;;  %v4070_v42 = vsub.f32 1.0, %v4069_v57  ;;  %v4302_v23 = vsel %vm4301_vm13, %v4300_v33, %v4298_v35  ;;  %vm8678_vm10 = vmor %vm4073_vm7, %vm4074_vm8 }
 0x591   :  { %v4250_v5 = vmul.f32 %v8458_v59, %v4051_v22  ;;  %v4061_v59 = vsel %vm8615_vm3, %v8503_v25, %v4057_v55  ;;  %v4085_v3 = vsub.f32 1.0, %v4084_v38  ;;  %v8635_v25 = vadd.s32 4294967256, %v8536_v61  ;;  %vm8690_vm13 = vmor %vm4088_vm12, %vm4089_vm9 }
 0x592   :  { %v3937_v52 = vsub.f32 0.0, %v3921_v32  ;;  %v4099_v32 = vmul.f32 %v8598_v1, %v8553_v6  ;;  %v4066_v2 = vsel %vm4063_vm5, %v4065_v47, %v4061_v59  ;;  %v4071_v12 = vmul.f32 %v8571_v48, %v4070_v42 }
 0x593   :  { %v8632_v36 = vsel %vm3978_vm0, %v4051_v22, %v4250_v5  ;;  %v4086_v62 = vmul.f32 %v8579_v40, %v4085_v3  ;;  %v4077_v45 = vand.u32 2147483647, %v8511_v50  ;;  %v4079_v22 = vand.u32 2147483648, %v8511_v50 }
 0x594   :  { %v3962_v11 = vmul.f32 1.442695, %v3937_v52  ;;  %v8610_v51 = vpop.eup %5746  ;;  %v4100_v56 = vsub.f32 1.0, %v4099_v32  ;;  %vm4104_vm14 = vweird.f32 %v8598_v1  ;;  %vm3980_vm15 = vcmp.ge.f32.partialorder %v8453_v30, 0.0 }
 0x595   :  { %v3873_v20 = vpop.xlane.xlu2 %3872  ;;  %v8638_v46 = vadd.f32 1.0, %v8610_v51  ;;  %v8641_v43 = vpop.eup %5748  ;;  %v4087_v27 = vadd.f32 %v8579_v40, %v4086_v62  ;;  %vm8682_vm11 = vcmp.eq.f32.partialorder %v4077_v45, 8.507059e+37  ;;  %vm4309_vm0 = vcmask 261312  }
 0x596   :  { %v8569_v0 = vadd.f32 %v8424_v41, %v3873_v20  ;;  %5750 = vpow2.f32 %v3962_v11  ;;  %v4304_v11 = vperm.slane %v8632_v36, %v8585_v39  ;;  %v4114_v55 = vmul.f32 %v8641_v43, %v8588_v18 }
 0x597   :  { %5752 = vrcp.f32 %v8638_v46  ;;  %v4101_v39 = vmul.f32 %v8598_v1, %v4100_v56  ;;  %v4091_v60 = vsel %vm8690_vm13, %v8579_v40, %v4087_v27  ;;  %v4109_v36 = vand.u32 2147483648, %v8553_v6 }
 0x598   :  { %v3922_v24 = vand.u32 2147483647, %v8569_v0  ;;  %v4115_v50 = vsub.f32 1.0, %v4114_v55  ;;  %vm4103_vm3 = vweird.f32 %v8553_v6  ;;  %vm3982_vm5 = vcmp.ge.f32.partialorder %v8465_v17, 0.0 }
 0x599   :  { %v4102_v35 = vadd.f32 %v8598_v1, %v4101_v39  ;;  %vm4119_vm7 = vweird.f32 %v8641_v43  ;;  %vm4313_vm8 = vcmask 326912   ;;  %vm4317_vm9 = vcmask 392512  }
 0x59a   :  { %v3938_v10 = vsub.f32 0.0, %v3922_v24  ;;  %v4251_v24 = vmul.f32 %v8476_v7, %v4066_v2  ;;  %v4116_v56 = vmul.f32 %v8641_v43, %v4115_v50  ;;  %vm3983_vm13 = vcmp.ge.f32.partialorder %v8479_v28, 0.0 }
 0x59c   :  { %v3964_v49 = vmul.f32 1.442695, %v3938_v10  ;;  %v8648_v8 = vpop.eup %5750  ;;  %v8672_v53 = vsel %vm3979_vm4, %v4066_v2, %v4251_v24  ;;  %v4080_v10 = vor.u32 1.1754944e-38, %v4079_v22  ;;  %v4107_v2 = vand.u32 2147483647, %v8553_v6  ;;  %vm8722_vm4 = vmor %vm4103_vm3, %vm4104_vm14 }
 0x59d   :  { %v3876_v54 = vpop.xlane.xlu1 %3875  ;;  %v8666_v7 = vadd.f32 1.0, %v8648_v8  ;;  %v8695_v32 = vpop.eup %5752  ;;  %v4306_v6 = vsel %vm4305_vm6, %v4304_v11, %v4302_v23  ;;  %v4106_v22 = vsel %vm8722_vm4, %v8598_v1, %v4102_v35  ;;  %vm3984_vm3 = vcmp.ge.f32.partialorder %v8495_v15, 0.0 }
 0x59e   :  { %v8604_v58 = vadd.f32 %v8424_v41, %v3876_v54  ;;  %v4072_v54 = vadd.f32 %v8571_v48, %v4071_v12  ;;  %5754 = vpow2.f32 %v3964_v49  ;;  %v4129_v45 = vmul.f32 %v8695_v32, %v8638_v46 }
 0x59f   :  { %vm4108_vm6 = vcmp.eq.f32.partialorder %v4107_v2, 8.507059e+37 }
 0x5a0   :  { %v3923_v20 = vand.u32 2147483647, %v8604_v58  ;;  %v4076_v9 = vsel %vm8678_vm10, %v8571_v48, %v4072_v54  ;;  %v4308_v54 = vperm.slane %v8672_v53, %v8613_v34  ;;  %v4130_v37 = vsub.f32 1.0, %v4129_v45 }
 0x5a1   :  { %v4081_v40 = vsel %vm8682_vm11, %v4080_v10, %v4076_v9  ;;  %v4124_v53 = vand.u32 2147483648, %v8588_v18  ;;  %vm4118_vm10 = vweird.f32 %v8588_v18  ;;  %v4122_v10 = vand.u32 2147483647, %v8588_v18 }
 0x5a2   :  { %v3939_v16 = vsub.f32 0.0, %v3923_v20  ;;  %v4095_v20 = vor.u32 1.1754944e-38, %v4094_v26  ;;  %v4252_v55 = vmul.f32 %v8498_v29, %v4081_v40  ;;  %v4117_v29 = vadd.f32 %v8641_v43, %v4116_v56  ;;  %vm8770_vm12 = vmor %vm4118_vm10, %vm4119_vm7 }
 0x5a3   :  { %vm4321_vm11 = vcmask 458112   ;;  %v4131_v31 = vmul.f32 %v8695_v32, %v4130_v37  ;;  %vm4123_vm14 = vcmp.eq.f32.partialorder %v4122_v10, 8.507059e+37 }
 0x5a4   :  { %v3966_v57 = vmul.f32 1.442695, %v3939_v16  ;;  %v8706_v47 = vpop.eup %5754  ;;  %v4096_v16 = vsel %vm4093_vm2, %v4095_v20, %v4091_v60  ;;  %v4268_v42 = vsel %vm3980_vm15, %v4081_v40, %v4252_v55  ;;  %v4121_v18 = vsel %vm8770_vm12, %v8641_v43, %v4117_v29 }
 0x5a5   :  { %v3879_v52 = vpop.xlane.xlu2 %3878  ;;  %v8737_v24 = vadd.f32 1.0, %v8706_v47  ;;  %v4253_v11 = vmul.f32 %v8501_v4, %v4096_v16  ;;  %v8786_v60 = vadd.s32 4294967232, %v8536_v61  ;;  %v4312_v35 = vperm.slane %v4268_v42, %v8627_v63 }
 0x5a6   :  { %v8646_v44 = vadd.f32 %v8424_v41, %v3879_v52  ;;  %5756 = vpow2.f32 %v3966_v57  ;;  %v8718_v52 = vadd.s32 4294967248, %v8536_v61  ;;  %v8734_v57 = vadd.s32 4294967240, %v8536_v61 }
 0x5a7   :  { %5758 = vrcp.f32 %v8666_v7  ;;  %v4269_v9 = vsel %vm3981_vm1, %v4096_v16, %v4253_v11  ;;  %v8790_v20 = vadd.s32 4294967224, %v8536_v61  ;;  %v4132_v56 = vadd.f32 %v8695_v32, %v4131_v31 }
 0x5a8   :  { %v3924_v38 = vand.u32 2147483647, %v8646_v44  ;;  %v4316_v40 = vperm.slane %v4269_v9, %v8635_v25  ;;  %vm4133_vm15 = vweird.f32 %v8638_v46  ;;  %v4139_v25 = vand.u32 2147483648, %v8638_v46 }
 0x5a9   :  { %vm4325_vm1 = vcmask 523712   ;;  %v4154_v31 = vand.u32 2147483648, %v8666_v7 }
 0x5aa   :  { %v3940_v5 = vsub.f32 0.0, %v3924_v38  ;;  %v4110_v38 = vor.u32 1.1754944e-38, %v4109_v36 }
 0x5ac   :  { %v3968_v59 = vmul.f32 1.442695, %v3940_v5  ;;  %v8715_v49 = vpop.eup %5756  ;;  %v4111_v34 = vsel %vm4108_vm6, %v4110_v38, %v4106_v22  ;;  %v4137_v22 = vand.u32 2147483647, %v8638_v46 }
 0x5ad   :  { %v3882_v3 = vpop.xlane.xlu1 %3881  ;;  %v8743_v23 = vpop.eup %5758  ;;  %v8748_v1 = vadd.f32 1.0, %v8715_v49  ;;  %v4254_v33 = vmul.f32 %v8521_v19, %v4111_v34 }
 0x5ae   :  { %v8704_v48 = vadd.f32 %v8424_v41, %v3882_v3  ;;  %5760 = vpow2.f32 %v3968_v59  ;;  %v4144_v30 = vmul.f32 %v8743_v23, %v8666_v7  ;;  %v4310_v59 = vsel %vm4309_vm0, %v4308_v54, %v4306_v6 }
 0x5af   :  { %5762 = vrcp.f32 %v8737_v24  ;;  %v4125_v3 = vor.u32 1.1754944e-38, %v4124_v53  ;;  %v4270_v2 = vsel %vm3982_vm5, %v4111_v34, %v4254_v33  ;;  %vm4134_vm0 = vweird.f32 %v8695_v32 }
 0x5b0   :  { %v3925_v12 = vand.u32 2147483647, %v8704_v48  ;;  %v4145_v16 = vsub.f32 1.0, %v4144_v30  ;;  %v4320_v38 = vperm.slane %v4270_v2, %v8718_v52  ;;  %v4314_v34 = vsel %vm4313_vm8, %v4312_v35, %v4310_v59  ;;  %vm8823_vm2 = vmor %vm4133_vm15, %vm4134_vm0 }
 0x5b1   :  { %v8829_v52 = vadd.s32 4294967216, %v8536_v61  ;;  %v4136_v37 = vsel %vm8823_vm2, %v8695_v32, %v4132_v56  ;;  %vm4138_vm4 = vcmp.eq.f32.partialorder %v4137_v22, 8.507059e+37  ;;  %v4152_v53 = vand.u32 2147483647, %v8666_v7 }
 0x5b2   :  { %v3941_v27 = vsub.f32 0.0, %v3925_v12  ;;  %v4126_v12 = vsel %vm4123_vm14, %v4125_v3, %v4121_v18  ;;  %v4146_v29 = vmul.f32 %v8743_v23, %v4145_v16  ;;  %vm4148_vm5 = vweird.f32 %v8666_v7 }
 0x5b3   :  { %vm4149_vm6 = vweird.f32 %v8743_v23  ;;  %vm8858_vm7 = vcmp.eq.f32.partialorder %v4152_v53, 8.507059e+37  ;;  %v4182_v22 = vand.u32 2147483647, %v8748_v1  ;;  %vm4178_vm12 = vweird.f32 %v8748_v1 }
 0x5b4   :  { %v8750_v39 = vpop.eup %5760  ;;  %v3970_v26 = vmul.f32 1.442695, %v3941_v27  ;;  %v4255_v27 = vmul.f32 %v8561_v13, %v4126_v12  ;;  %v4318_v13 = vsel %vm4317_vm9, %v4316_v40, %v4314_v34  ;;  %v4147_v30 = vadd.f32 %v8743_v23, %v4146_v29  ;;  %vm8866_vm8 = vmor %vm4148_vm5, %vm4149_vm6 }
 0x5b5   :  { %v3885_v5 = vpop.xlane.xlu2 %3884  ;;  %v8756_v4 = vadd.f32 1.0, %v8750_v39  ;;  %v8792_v36 = vpop.eup %5762  ;;  %v4322_v10 = vsel %vm4321_vm11, %v4320_v38, %v4318_v13  ;;  %vm4163_vm9 = vweird.f32 %v8737_v24  ;;  %vm8907_vm14 = vcmp.eq.f32.partialorder %v4182_v22, 8.507059e+37 }
 0x5b6   :  { %v8759_v14 = vadd.f32 %v8424_v41, %v3885_v5  ;;  %5764 = vpow2.f32 %v3970_v26  ;;  %v4159_v11 = vmul.f32 %v8792_v36, %v8737_v24  ;;  %v4140_v5 = vor.u32 1.1754944e-38, %v4139_v25 }
 0x5b7   :  { %5766 = vrcp.f32 %v8748_v1  ;;  %v4271_v9 = vsel %vm3983_vm13, %v4126_v12, %v4255_v27  ;;  %v4184_v25 = vand.u32 2147483648, %v8748_v1  ;;  %vm4164_vm10 = vweird.f32 %v8792_v36 }
 0x5b8   :  { %5768 = vrcp.f32 %v8756_v4  ;;  %v3926_v19 = vand.u32 2147483647, %v8759_v14  ;;  %v4160_v32 = vsub.f32 1.0, %v4159_v11  ;;  %v4141_v50 = vsel %vm4138_vm4, %v4140_v5, %v4136_v37  ;;  %vm8913_vm15 = vmor %vm4163_vm9, %vm4164_vm10 }
 0x5b9   :  { %v4324_v35 = vperm.slane %v4271_v9, %v8734_v57  ;;  %v4256_v12 = vmul.f32 %v8610_v51, %v4141_v50  ;;  %v4151_v57 = vsel %vm8866_vm8, %v8743_v23, %v4147_v30  ;;  %v4155_v11 = vor.u32 1.1754944e-38, %v4154_v31 }
 0x5ba   :  { %v3942_v43 = vsub.f32 0.0, %v3926_v19  ;;  %v8853_v19 = vadd.s32 4294967208, %v8536_v61  ;;  %v4161_v16 = vmul.f32 %v8792_v36, %v4160_v32  ;;  %v4185_v53 = vor.u32 1.1754944e-38, %v4184_v25 }
 0x5bb   :  { %v8883_v27 = vsel %vm4325_vm1, %v4324_v35, %v4322_v10  ;;  %v8889_v34 = vsel %vm3984_vm3, %v4141_v50, %v4256_v12  ;;  %v8896_v13 = vsel %vm8858_vm7, %v4155_v11, %v4151_v57  ;;  %v4199_v32 = vand.u32 2147483648, %v8756_v4 }
 0x5bc   :  { %v8797_v62 = vpop.eup %5764  ;;  %v3972_v63 = vmul.f32 1.442695, %v3942_v43  ;;  %vm3985_vm2 = vcmp.ge.f32.partialorder %v8519_v21, 0.0  ;;  %vm4193_vm4 = vweird.f32 %v8756_v4  ;;  %vm3986_vm5 = vcmp.ge.f32.partialorder %v8569_v0, 0.0 }
 0x5bd   :  { %v3888_v45 = vpop.xlane.xlu0 %3887  ;;  %v8802_v6 = vpop.eup %5766  ;;  %v8807_v17 = vadd.f32 1.0, %v8797_v62  ;;  %vm3987_vm8 = vcmp.ge.f32.partialorder %v8604_v58, 0.0  ;;  %v4343_v25 = vadd.s32 4294967200, %v8536_v61  ;;  %v4351_v0 = vadd.s32 4294967184, %v8536_v61 }
 0x5be   :  { %v8810_v54 = vadd.f32 %v8424_v41, %v3888_v45  ;;  %v8812_v55 = vpop.eup %5768  ;;  %5770 = vpow2.f32 %v3972_v63  ;;  %v4174_v46 = vmul.f32 %v8802_v6, %v8748_v1  ;;  %v4167_v63 = vand.u32 2147483647, %v8737_v24 }
 0x5bf   :  { %5772 = vrcp.f32 %v8807_v17  ;;  %v4189_v42 = vmul.f32 %v8812_v55, %v8756_v4  ;;  %v4169_v45 = vand.u32 2147483648, %v8737_v24  ;;  %v4162_v41 = vadd.f32 %v8792_v36, %v4161_v16 }
 0x5c0   :  { %v3927_v26 = vand.u32 2147483647, %v8810_v54  ;;  %v4175_v59 = vsub.f32 1.0, %v4174_v46  ;;  %vm8898_vm11 = vcmp.eq.f32.partialorder %v4167_v63, 8.507059e+37  ;;  %vm4179_vm13 = vweird.f32 %v8802_v6 }
 0x5c1   :  { %v4190_v40 = vsub.f32 1.0, %v4189_v42  ;;  %v4170_v46 = vor.u32 1.1754944e-38, %v4169_v45  ;;  %vm4194_vm0 = vweird.f32 %v8812_v55  ;;  %v4166_v50 = vsel %vm8913_vm15, %v8792_v36, %v4162_v41  ;;  %vm8932_vm3 = vmor %vm4178_vm12, %vm4179_vm13 }
 0x5c2   :  { %v3943_v33 = vsub.f32 0.0, %v3927_v26  ;;  %v4176_v51 = vmul.f32 %v8802_v6, %v4175_v59  ;;  %v4197_v59 = vand.u32 2147483647, %v8756_v4  ;;  %v4214_v36 = vand.u32 2147483648, %v8807_v17  ;;  %vm8946_vm6 = vmor %vm4193_vm4, %vm4194_vm0 }
 0x5c3   :  { %v4191_v23 = vmul.f32 %v8812_v55, %v4190_v40  ;;  %vm4208_vm7 = vweird.f32 %v8807_v17  ;;  %v4212_v4 = vand.u32 2147483647, %v8807_v17  ;;  %v4171_v43 = vsel %vm8898_vm11, %v4170_v46, %v4166_v50 }
 0x5c4   :  { %v8849_v18 = vpop.eup %5770  ;;  %v3974_v3 = vmul.f32 1.442695, %v3943_v33  ;;  %v4177_v26 = vadd.f32 %v8802_v6, %v4176_v51  ;;  %v4200_v40 = vor.u32 1.1754944e-38, %v4199_v32  ;;  %vm4329_vm11 = vcmask 589312  }
 0x5c5   :  { %v8855_v28 = vpop.eup %5772  ;;  %v8863_v2 = vadd.f32 1.0, %v8849_v18  ;;  %v4192_v9 = vadd.f32 %v8812_v55, %v4191_v23  ;;  %vm4198_vm12 = vcmp.eq.f32.partialorder %v4197_v59, 8.507059e+37  ;;  %v4215_v63 = vor.u32 1.1754944e-38, %v4214_v36 }
 0x5c6   :  { %v4204_v56 = vmul.f32 %v8855_v28, %v8807_v17  ;;  %5774 = vpow2.f32 %v3974_v3  ;;  %vm4209_vm1 = vweird.f32 %v8855_v28  ;;  %v4181_v3 = vsel %vm8932_vm3, %v8802_v6, %v4177_v26 }
 0x5c7   :  { %5776 = vrcp.f32 %v8863_v2  ;;  %v4196_v6 = vsel %vm8946_vm6, %v8812_v55, %v4192_v9  ;;  %vm8960_vm9 = vmor %vm4208_vm7, %vm4209_vm1  ;;  %v4229_v7 = vand.u32 2147483648, %v8863_v2  ;;  %v4257_v55 = vmul.f32 %v8648_v8, %v8896_v13 }
 0x5c8   :  { %v4205_v38 = vsub.f32 1.0, %v4204_v56  ;;  %v4227_v56 = vand.u32 2147483647, %v8863_v2  ;;  %v4186_v57 = vsel %vm8907_vm14, %v4185_v53, %v4181_v3  ;;  %vm4333_vm13 = vcmask 654912  }
 0x5c9   :  { %v4201_v45 = vsel %vm4198_vm12, %v4200_v40, %v4196_v6  ;;  %vm4213_vm15 = vcmp.eq.f32.partialorder %v4212_v4, 8.507059e+37  ;;  %vm4223_vm0 = vweird.f32 %v8863_v2  ;;  %vm4337_vm1 = vcmask 720512  }
 0x5ca   :  { %v4206_v29 = vmul.f32 %v8855_v28, %v4205_v38  ;;  %v4258_v22 = vmul.f32 %v8706_v47, %v4171_v43  ;;  %v4230_v8 = vor.u32 1.1754944e-38, %v4229_v7  ;;  %vm4341_vm4 = vcmask 786112  }
 0x5cb   :  { %v4259_v11 = vmul.f32 %v8715_v49, %v4186_v57  ;;  %vm4228_vm14 = vcmp.eq.f32.partialorder %v4227_v56, 8.507059e+37  ;;  %vm3988_vm6 = vcmp.ge.f32.partialorder %v8646_v44, 0.0  ;;  %v4260_v47 = vmul.f32 %v8750_v39, %v4201_v45 }
 0x5cc   :  { %v8903_v15 = vpop.eup %5774  ;;  %v4207_v30 = vadd.f32 %v8855_v28, %v4206_v29  ;;  %v4273_v37 = vsel %vm3985_vm2, %v8896_v13, %v4257_v55  ;;  %v4347_v46 = vadd.s32 4294967192, %v8536_v61  ;;  %v4274_v5 = vsel %vm3986_vm5, %v4171_v43, %v4258_v22 }
 0x5cd   :  { %v5777_v42 = vpop.eup %5776  ;;  %v8921_v33 = vadd.f32 1.0, %v8903_v15  ;;  %vm3989_vm7 = vcmp.ge.f32.partialorder %v8704_v48, 0.0  ;;  %v4275_v39 = vsel %vm3987_vm8, %v4186_v57, %v4259_v11  ;;  %v4332_v13 = vperm.slane %v4273_v37, %v8790_v20 }
 0x5ce   :  { %v4219_v24 = vmul.f32 %v5777_v42, %v8863_v2  ;;  %v4211_v17 = vsel %vm8960_vm9, %v8855_v28, %v4207_v30  ;;  %vm4224_vm10 = vweird.f32 %v5777_v42  ;;  %v4328_v2 = vperm.slane %v8889_v34, %v8786_v60 }
 0x5cf   :  { %5778 = vrcp.f32 %v8921_v33  ;;  %v4216_v38 = vsel %vm4213_vm15, %v4215_v63, %v4211_v17  ;;  %vm4225_vm3 = vmor %vm4223_vm0, %vm4224_vm10  ;;  %v4244_v34 = vand.u32 2147483648, %v8921_v33  ;;  %v4242_v21 = vand.u32 2147483647, %v8921_v33 }
 0x5d0   :  { %v4220_v35 = vsub.f32 1.0, %v4219_v24  ;;  %v4261_v49 = vmul.f32 %v8797_v62, %v4216_v38  ;;  %v4276_v62 = vsel %vm3988_vm6, %v4201_v45, %v4260_v47  ;;  %vm3990_vm2 = vcmp.ge.f32.partialorder %v8759_v14, 0.0 }
 0x5d1   :  { %v4336_v48 = vperm.slane %v4274_v5, %v8829_v52  ;;  %vm4238_vm5 = vweird.f32 %v8921_v33  ;;  %v4340_v58 = vperm.slane %v4275_v39, %v8853_v19  ;;  %vm4345_vm8 = vcmask 851712  }
 0x5d2   :  { %v4221_v16 = vmul.f32 %v5777_v42, %v4220_v35  ;;  %v4245_v9 = vor.u32 1.1754944e-38, %v4244_v34  ;;  %v4330_v44 = vsel %vm4329_vm11, %v4328_v2, %v8883_v27  ;;  %v4344_v20 = vperm.slane %v4276_v62, %v4343_v25 }
 0x5d3   :  { %vm4243_vm12 = vcmp.eq.f32.partialorder %v4242_v21, 8.507059e+37  ;;  %v4334_v14 = vsel %vm4333_vm13, %v4332_v13, %v4330_v44  ;;  %v4355_v52 = vadd.s32 4294967176, %v8536_v61  ;;  %vm4349_vm15 = vcmask 917312  }
 0x5d4   :  { %v4222_v51 = vadd.f32 %v5777_v42, %v4221_v16  ;;  %vm3991_vm0 = vcmp.ge.f32.partialorder %v8810_v54, 0.0  ;;  %vm4353_vm11 = vcmask 982912   ;;  %vm4357_vm13 = vcmask 1048512  }
 0x5d5   :  { %v5779_v28 = vpop.eup %5778 }
 0x5d6   :  { %v4226_v23 = vsel %vm4225_vm3, %v5777_v42, %v4222_v51  ;;  %v4234_v41 = vmul.f32 %v5779_v28, %v8921_v33  ;;  %vm4239_vm9 = vweird.f32 %v5779_v28  ;;  %v4338_v33 = vsel %vm4337_vm1, %v4336_v48, %v4334_v14 }
 0x5d7   :  { %v4231_v29 = vsel %vm4228_vm14, %v4230_v8, %v4226_v23  ;;  %vm4240_vm10 = vmor %vm4238_vm5, %vm4239_vm9  ;;  %v4342_v31 = vsel %vm4341_vm4, %v4340_v58, %v4338_v33 }
 0x5d8   :  { %v4235_v26 = vsub.f32 1.0, %v4234_v41  ;;  %v4262_v60 = vmul.f32 %v8849_v18, %v4231_v29  ;;  %v4277_v18 = vsel %vm3989_vm7, %v4216_v38, %v4261_v49  ;;  %v4346_v61 = vsel %vm4345_vm8, %v4344_v20, %v4342_v31 }
 0x5d9   :  { %v4348_v50 = vperm.slane %v4277_v18, %v4347_v46 }
 0x5da   :  { %v4236_v53 = vmul.f32 %v5779_v28, %v4235_v26  ;;  %v4278_v10 = vsel %vm3990_vm2, %v4231_v29, %v4262_v60 }
 0x5db   :  { %v4352_v24 = vperm.slane %v4278_v10, %v4351_v0  ;;  %v4350_v36 = vsel %vm4349_vm15, %v4348_v50, %v4346_v61 }
 0x5dc   :  { %v4237_v42 = vadd.f32 %v5779_v28, %v4236_v53 }
 0x5dd   :  { %v4354_v3 = vsel %vm4353_vm11, %v4352_v24, %v4350_v36 }
 0x5de   :  { %v4241_v32 = vsel %vm4240_vm10, %v5779_v28, %v4237_v42 }
 0x5df   :  { %v4246_v30 = vsel %vm4243_vm12, %v4245_v9, %v4241_v32 }
 0x5e0   :  { %v4263_v19 = vmul.f32 %v8903_v15, %v4246_v30 }
 0x5e2   :  { %v4279_v27 = vsel %vm3991_vm0, %v4246_v30, %v4263_v19 }
 0x5e3   :  { %v4356_v59 = vperm.slane %v4279_v27, %v4355_v52 }
 0x5e5   :  { %v4358_v15 = vsel %vm4357_vm13, %v4356_v59, %v4354_v3 }
 0x5e6   :  { %4360 = vst [vmem:[#allocation6] sm:$0x1] %v4358_v15 }
 0x5e7   :  { %4371 = dma.vmem_to_hbm [thread:$0]  %s4367_s8, 16, %s4369_s11, [#allocation5]  }
 0x5e8   :  { %5832 = dma.done.wait [#allocation5], 16  }
 0x5e9   :  { %5833 = vsyncadd [#allocation5], 4294967280 }
 0x5ea   :  { %4376 = vsyncpa [#allocation4], 1 }
 0x5eb   :  { %4377 = vsyncpa [#allocation5], 1 }

</bundles_post_ra>
